<compile_context>
chip_gen: v7x
topology: tpu7x:2x2x1
jax: 0.10.0
libtpu: 0.0.40
codegen_flags: <defaults>
</compile_context>

<pallas_src>
import functools
import numpy as np
import jax
import jax.numpy as jnp
from jax.experimental import pallas as pl
from jax.experimental.pallas import tpu as pltpu

_SMEM = pltpu.MemorySpace.SMEM


# ---------------------------------------------------------------------------
# Helpers
# ---------------------------------------------------------------------------
def _pad128(n):
    return max(128, pl.cdiv(n, 128) * 128)


def _lane_tile(lp, lane_tile=1024):
    """Pick a lane tile: multiple of 128, divides lp, prefer >=2 grid steps
    (v7x has 2 TensorCores; 'parallel' only helps with >=2 steps)."""
    if lp <= 128:
        return lp
    lt = min(lane_tile, lp)
    lt = max(128, (lt // 128) * 128)
    if lp // lt < 2:
        lt = max(128, (lp // 2 // 128) * 128)
    while lp % lt != 0:
        lt -= 128
    return lt


# ---------------------------------------------------------------------------
# Pallas kernels
# ---------------------------------------------------------------------------
def _pw_kernel(x_ref, w_ref, shift_ref, o_ref, *, relu):
    # x: (Cin, LT) bf16 ; w: (Cout, Cin) bf16 (BN scale folded) ; shift: (Cout,1) f32
    acc = jnp.dot(w_ref[...], x_ref[...], preferred_element_type=jnp.float32)
    acc = acc + shift_ref[...]
    if relu:
        acc = jnp.maximum(acc, 0.0)
    o_ref[...] = acc.astype(o_ref.dtype)


def _predict_kernel(o3_ref, o4_ref, o5_ref, w5_ref, w45_ref, w345_ref, b_ref, out_ref):
    # pred = cat([o5, o4*o5, o3*o4*o5]) ; 'predict' 1x1 conv.  No in-kernel concat:
    # three partial MXU dots with pre-split weight slices, f32 accumulation.
    o5b = o5_ref[...]                                   # bf16
    o5 = o5b.astype(jnp.float32)
    o4 = o4_ref[...].astype(jnp.float32)
    o3 = o3_ref[...].astype(jnp.float32)
    p45 = o4 * o5
    p345 = o3 * p45
    acc = jnp.dot(w5_ref[...], o5b, preferred_element_type=jnp.float32)
    acc = acc + jnp.dot(w45_ref[...], p45.astype(jnp.bfloat16),
                        preferred_element_type=jnp.float32)
    acc = acc + jnp.dot(w345_ref[...], p345.astype(jnp.bfloat16),
                        preferred_element_type=jnp.float32)
    out_ref[...] = acc + b_ref[...]


def _conv_taps_accumulate(plane, w_ref, *, H, C, K):
    """'Same' KxK conv over a padded (C, H+K-1, Wp) plane.

    Taps are built ONCE per (ci, kh, kw); all C output-channel accumulators
    stay live (co is the innermost loop), so the XLU roll / sublane-slice work
    is done once instead of C times.  Accumulators are (H, Wp) f32; for much
    larger H than the 64 used here they should additionally be tiled over rows
    to stay register-resident.
    """
    Wp = plane.shape[-1]
    KK = K * K
    accs = [jnp.zeros((H, Wp), jnp.float32) for _ in range(C)]
    for ci in range(C):
        for kh in range(K):
            slab = plane[ci, kh:kh + H, :]              # (H, Wp)
            for kw in range(K):
                tap = slab if kw == 0 else pltpu.roll(slab, shift=Wp - kw, axis=1)
                for co in range(C):
                    accs[co] = accs[co] + tap * w_ref[(co * C + ci) * KK + kh * K + kw]
    return accs


def _sal1_kernel(lm_ref, w_ref, b_ref, c1_ref, *, H, C, K):
    # sigmoid fused in: lm was padded with -1e9 so pads sigmoid to exactly 0.
    sig = jax.nn.sigmoid(lm_ref[0])                     # (C, H+2, Wp)
    accs = _conv_taps_accumulate(sig, w_ref, H=H, C=C, K=K)
    for co in range(C):
        # lane-dense store over the full padded width (pad lanes cropped in XLA)
        c1_ref[0, co] = jnp.maximum(accs[co] + b_ref[co], 0.0)


def _sal2_kernel(c1p_ref, x_ref, w_ref, b_ref, xs_ref, *, H, C, K):
    # 5x5 conv + bias, with the x*saliency multiply fused in the epilogue.
    accs = _conv_taps_accumulate(c1p_ref[0], w_ref, H=H, C=C, K=K)
    for co in range(C):
        # x is zero-padded on pad lanes, so pad lanes produce 0; lane-dense store
        xs_ref[0, co] = x_ref[0, co] * (accs[co] + b_ref[co])


def _final_kernel(h_ref, w_ref, prob_ref, ev_ref):
    # One exp per element: softplus(h) and sigmoid(h) both derived from exp(-|h|).
    # h stays f32 so the -9999999 uncrop sentinel maps to exactly 0 in both.
    h = h_ref[...]                                      # (3, LT) f32
    e = jnp.exp(-jnp.abs(h))
    ev_ref[...] = jnp.log1p(e) + jnp.maximum(h, 0.0)    # softplus
    sig = jnp.where(h >= 0.0, 1.0, e) * pl.reciprocal(1.0 + e, approx=True)
    prob_ref[...] = (sig[0:1] * w_ref[0] + sig[1:2] * w_ref[1]
                     + sig[2:3] * w_ref[2] + w_ref[3])


# ---------------------------------------------------------------------------
# Pallas wrappers
# ---------------------------------------------------------------------------
def pointwise_conv_nchw(x_nchw, wT_eff, shift, relu=False, lane_tile=1024,
                        out_dtype=jnp.bfloat16):
    """1x1 conv (+ folded BN + optional ReLU) as (Cout,Cin)@(Cin, N*HW).

    Batch is folded into the lane axis (lane-dense, padded to a 128-multiple)
    so MXU columns are full and all stores are unmasked."""
    N, Cin, H, W = x_nchw.shape
    Cout = wT_eff.shape[0]
    HW = H * W
    L = N * HW
    Lp = _pad128(L)
    LT = _lane_tile(Lp, lane_tile)
    x2 = jnp.transpose(x_nchw.reshape(N, Cin, HW), (1, 0, 2)).reshape(Cin, L)
    if Lp != L:
        x2 = jnp.pad(x2, ((0, 0), (0, Lp - L)))
    out = pl.pallas_call(
        functools.partial(_pw_kernel, relu=relu),
        out_shape=jax.ShapeDtypeStruct((Cout, Lp), out_dtype),
        grid=(Lp // LT,),
        in_specs=[pl.BlockSpec((Cin, LT), lambda t: (0, t)),
                  pl.BlockSpec((Cout, Cin), lambda t: (0, 0)),
                  pl.BlockSpec((Cout, 1), lambda t: (0, 0))],
        out_specs=pl.BlockSpec((Cout, LT), lambda t: (0, t)),
        compiler_params=pltpu.CompilerParams(dimension_semantics=("parallel",)),
    )(x2.astype(jnp.bfloat16), wT_eff.astype(jnp.bfloat16),
      shift.reshape(Cout, 1).astype(jnp.float32))
    out = out[:, :L].reshape(Cout, N, HW)
    return jnp.transpose(out, (1, 0, 2)).reshape(N, Cout, H, W)


def predict_fused(out3, out4, out5, wT, b, lane_tile=1024):
    """pred = cat([o5, o4*o5, o3*o4*o5]); 'predict' 1x1 conv — fused, batch in lanes."""
    N, C, H, W = out3.shape                             # C == 64
    HW = H * W
    L = N * HW
    Lp = _pad128(L)
    LT = _lane_tile(Lp, lane_tile)

    def prep(t):
        t = jnp.transpose(t.reshape(N, C, HW), (1, 0, 2)).reshape(C, L)
        if Lp != L:
            t = jnp.pad(t, ((0, 0), (0, Lp - L)))
        return t.astype(jnp.bfloat16)

    a3, a4, a5 = prep(out3), prep(out4), prep(out5)
    wTb = wT.astype(jnp.bfloat16)
    w5, w45, w345 = wTb[:, :C], wTb[:, C:2 * C], wTb[:, 2 * C:]
    out = pl.pallas_call(
        _predict_kernel,
        out_shape=jax.ShapeDtypeStruct((3, Lp), jnp.float32),
        grid=(Lp // LT,),
        in_specs=[pl.BlockSpec((C, LT), lambda t: (0, t)),
                  pl.BlockSpec((C, LT), lambda t: (0, t)),
                  pl.BlockSpec((C, LT), lambda t: (0, t)),
                  pl.BlockSpec((3, C), lambda t: (0, 0)),
                  pl.BlockSpec((3, C), lambda t: (0, 0)),
                  pl.BlockSpec((3, C), lambda t: (0, 0)),
                  pl.BlockSpec((3, 1), lambda t: (0, 0))],
        out_specs=pl.BlockSpec((3, LT), lambda t: (0, t)),
        compiler_params=pltpu.CompilerParams(dimension_semantics=("parallel",)),
    )(a3, a4, a5, w5, w45, w345, b.reshape(3, 1).astype(jnp.float32))
    out = out[:, :L].reshape(3, N, HW)
    return jnp.transpose(out, (1, 0, 2)).reshape(N, 3, H, W)


def saliency_pair(lateral_map, x, p):
    """sigmoid + saliency1(3x3)+ReLU, then saliency2(5x5) with x*saliency epilogue.
    Returns x * saliency (NCHW, f32)."""
    N, C, H, W = lateral_map.shape                      # C == 3
    K1, K2 = 3, 5
    NEG = -1e9
    Wp1 = _pad128(W + 2)
    Wp2 = _pad128(W + 4)
    # circular-roll taps must never wrap into kept output columns
    assert Wp1 >= W + K1 - 1 and Wp2 >= W + K2 - 1

    # stage 1: pad with -1e9 (sigmoid -> 0 on pads); lane axis padded dense to 128.
    lm_pad = jnp.pad(lateral_map.astype(jnp.float32),
                     ((0, 0), (0, 0), (1, 1), (1, Wp1 - W - 1)),
                     constant_values=NEG)
    c1_full = pl.pallas_call(
        functools.partial(_sal1_kernel, H=H, C=C, K=K1),
        out_shape=jax.ShapeDtypeStruct((N, C, H, Wp1), jnp.float32),
        grid=(N,),
        in_specs=[pl.BlockSpec((1, C, H + 2, Wp1), lambda n: (n, 0, 0, 0)),
                  pl.BlockSpec(memory_space=_SMEM),
                  pl.BlockSpec(memory_space=_SMEM)],
        out_specs=pl.BlockSpec((1, C, H, Wp1), lambda n: (n, 0, 0, 0)),
        compiler_params=pltpu.CompilerParams(dimension_semantics=("parallel",)),
    )(lm_pad, p['sal1_w'].reshape(-1).astype(jnp.float32),
      p['sal1_b'].astype(jnp.float32))

    # stage 2: keep only valid columns, zero-pad by 2, lane axis dense to 128.
    c1p = jnp.pad(c1_full[:, :, :, :W],
                  ((0, 0), (0, 0), (2, 2), (2, Wp2 - W - 2)))
    x_pad = jnp.pad(x.astype(jnp.float32),
                    ((0, 0), (0, 0), (0, 0), (0, Wp2 - W)))
    xs_full = pl.pallas_call(
        functools.partial(_sal2_kernel, H=H, C=C, K=K2),
        out_shape=jax.ShapeDtypeStruct((N, C, H, Wp2), jnp.float32),
        grid=(N,),
        in_specs=[pl.BlockSpec((1, C, H + 4, Wp2), lambda n: (n, 0, 0, 0)),
                  pl.BlockSpec((1, C, H, Wp2), lambda n: (n, 0, 0, 0)),
                  pl.BlockSpec(memory_space=_SMEM),
                  pl.BlockSpec(memory_space=_SMEM)],
        out_specs=pl.BlockSpec((1, C, H, Wp2), lambda n: (n, 0, 0, 0)),
        compiler_params=pltpu.CompilerParams(dimension_semantics=("parallel",)),
    )(c1p, x_pad, p['sal2_w'].reshape(-1).astype(jnp.float32),
      p['sal2_b'].astype(jnp.float32))
    return xs_full[:, :, :, :W]


def final_fused(h_nchw, conv5_w, conv5_b, lane_tile=2048):
    """evidence = softplus(h); fine_prob = conv5(sigmoid(h)) — one fused kernel,
    batch folded into the lane axis."""
    N, C, H, W = h_nchw.shape                           # C == 3
    HW = H * W
    L = N * HW
    Lp = _pad128(L)
    LT = _lane_tile(Lp, lane_tile)
    h2 = jnp.transpose(h_nchw.astype(jnp.float32).reshape(N, C, HW),
                       (1, 0, 2)).reshape(C, L)
    if Lp != L:
        h2 = jnp.pad(h2, ((0, 0), (0, Lp - L)))
    wvec = jnp.concatenate([conv5_w.reshape(3), conv5_b.reshape(1)]).astype(jnp.float32)
    prob, ev = pl.pallas_call(
        _final_kernel,
        out_shape=(jax.ShapeDtypeStruct((1, Lp), jnp.float32),
                   jax.ShapeDtypeStruct((C, Lp), jnp.float32)),
        grid=(Lp // LT,),
        in_specs=[pl.BlockSpec((C, LT), lambda t: (0, t)),
                  pl.BlockSpec(memory_space=_SMEM)],
        out_specs=(pl.BlockSpec((1, LT), lambda t: (0, t)),
                   pl.BlockSpec((C, LT), lambda t: (0, t))),
        compiler_params=pltpu.CompilerParams(dimension_semantics=("parallel",)),
    )(h2, wvec)
    fine_prob = jnp.transpose(prob[:, :L].reshape(1, N, HW), (1, 0, 2)).reshape(N, 1, H, W)
    evidence = jnp.transpose(ev[:, :L].reshape(C, N, HW), (1, 0, 2)).reshape(N, C, H, W)
    return fine_prob, evidence


# ---------------------------------------------------------------------------
# Plain-JAX glue (resize / crop / uncrop), matching PyTorch semantics
# ---------------------------------------------------------------------------
def resize_bilinear(x, out_h, out_w, align_corners):
    N, C, H, W = x.shape
    x = x.astype(jnp.float32)
    if align_corners:
        ys = jnp.linspace(0.0, H - 1.0, out_h)
        xs = jnp.linspace(0.0, W - 1.0, out_w)
    else:
        ys = jnp.maximum((jnp.arange(out_h) + 0.5) * (H / out_h) - 0.5, 0.0)
        xs = jnp.maximum((jnp.arange(out_w) + 0.5) * (W / out_w) - 0.5, 0.0)
    y0 = jnp.floor(ys).astype(jnp.int32)
    x0 = jnp.floor(xs).astype(jnp.int32)
    y1 = jnp.minimum(y0 + 1, H - 1)
    x1 = jnp.minimum(x0 + 1, W - 1)
    wy = (ys - y0)[None, None, :, None]
    wx = (xs - x0)[None, None, None, :]
    rows = jnp.take(x, y0, axis=2) * (1 - wy) + jnp.take(x, y1, axis=2) * wy
    out = jnp.take(rows, x0, axis=3) * (1 - wx) + jnp.take(rows, x1, axis=3) * wx
    return out


def crop(prob_map, saliency_data, margin=20, label=None):
    # Host-side bbox computation (data-dependent crop shapes, as in the PyTorch
    # reference).  Note: this device->host sync + per-bbox recompile dominates
    # end-to-end latency; production code should bucket crop sizes.
    pm = np.asarray(jax.device_get(prob_map))
    N, C, Wd, Hd = pm.shape
    binary_mask = pm >= 0.5
    if label is not None and binary_mask.sum() == 0:
        binary_mask = np.asarray(jax.device_get(label)) >= 0.5
    left = right = top = bottom = margin
    if binary_mask.sum() == 0:
        minA, maxA, minB, maxB = 0, Wd, 0, Hd
        no_forward = True
    else:
        if N > 1:
            mask = np.zeros((N, C, Wd, Hd), dtype=np.float32)
            for n in range(N):
                arr = np.argwhere(binary_mask[n])
                if arr.shape[0] > 0:
                    minA, maxA = arr[:, 1].min(), arr[:, 1].max()
                    minB, maxB = arr[:, 2].min(), arr[:, 2].max()
                else:
                    minA, maxA, minB, maxB = 0, Wd, 0, Hd
                bb = [int(max(minA - left, 0)), int(min(maxA + right + 1, Wd)),
                      int(max(minB - top, 0)), int(min(maxB + bottom + 1, Hd))]
                mask[n, :, bb[0]:bb[1], bb[2]:bb[3]] = 1
            saliency_data = saliency_data * jnp.asarray(mask)
        arr = np.argwhere(binary_mask)
        if arr.shape[0] > 0:
            minA, maxA = arr[:, 2].min(), arr[:, 2].max()
            minB, maxB = arr[:, 3].min(), arr[:, 3].max()
        else:
            minA, maxA, minB, maxB = 0, Wd, 0, Hd
        no_forward = False
    bbox = [int(max(minA - left, 0)), int(min(maxA + right + 1, Wd)),
            int(max(minB - top, 0)), int(min(maxB + bottom + 1, Hd))]
    cropped = saliency_data[:, :, bbox[0]:bbox[1], bbox[2]:bbox[3]]
    if no_forward:
        cropped = jnp.zeros_like(cropped)
    crop_info = np.array([bbox], dtype=np.int16)
    return cropped, crop_info


def uncrop(crop_info, cropped_image, image):
    out = jnp.full(image.shape, -9999999.0, dtype=jnp.float32)
    b = crop_info[0]
    return out.at[:, :, int(b[0]):int(b[1]), int(b[2]):int(b[3])].set(cropped_image)


# ---------------------------------------------------------------------------
# Parameter init (deterministic, matching __init__ shapes; BN scale pre-folded)
# ---------------------------------------------------------------------------
def make_params(key):
    ks = jax.random.split(key, 16)
    p = {}
    p['sal1_w'] = 0.05 * jax.random.normal(ks[0], (3, 3, 3, 3))
    p['sal1_b'] = 0.05 * jax.random.normal(ks[1], (3,))
    p['sal2_w'] = 0.05 * jax.random.normal(ks[2], (3, 3, 5, 5))
    p['sal2_b'] = 0.05 * jax.random.normal(ks[3], (3,))

    def linear_block(kw_, kb, kg, cin):
        w = 0.02 * jax.random.normal(kw_, (cin, 64))
        bias = 0.02 * jax.random.normal(kb, (64,))
        kg1, kg2, kg3, kg4 = jax.random.split(kg, 4)
        gamma = 1.0 + 0.1 * jax.random.normal(kg1, (64,))
        beta = 0.1 * jax.random.normal(kg2, (64,))
        mean = 0.1 * jax.random.normal(kg3, (64,))
        var = 1.0 + 0.1 * jax.random.uniform(kg4, (64,))
        s = gamma / jnp.sqrt(var + 1e-5)              # eval-mode BN folding
        shift = (bias - mean) * s + beta
        wT_eff = (w * s[None, :]).T                   # (64, cin), scale folded into W
        return wT_eff, shift

    p['lin5_wT'], p['lin5_shift'] = linear_block(ks[4], ks[5], ks[6], 2048)
    p['lin4_wT'], p['lin4_shift'] = linear_block(ks[7], ks[8], ks[9], 1024)
    p['lin3_wT'], p['lin3_shift'] = linear_block(ks[10], ks[11], ks[12], 512)

    p['pred_wT'] = 0.05 * jax.random.normal(ks[13], (3, 192))  # cols: o5 | o4*o5 | o3*o4*o5
    p['pred_b'] = 0.05 * jax.random.normal(ks[14], (3,))
    p['conv5_w'] = 0.2 * jax.random.normal(ks[15], (3,))
    p['conv5_b'] = jnp.zeros((1,))
    return p


# ---------------------------------------------------------------------------
# MFTN forward (test == 'O' branch)
# ---------------------------------------------------------------------------
def mftn_forward_test_O(params, x, key):
    N, _, H, W = x.shape

    # coarse backbone (res2net50 + rfb2/3/4 + aggregation): undefined pretrained
    # modules -> deterministic synthetic 3-channel decoder output at 1/8 resolution.
    # TODO(synk): real res2net/rfb/aggregation not representable from this file.
    decoder_1 = jax.random.normal(jax.random.fold_in(key, 1),
                                  (N, 3, H // 8, W // 8), jnp.float32)

    lateral_map_1 = resize_bilinear(decoder_1, H, W, align_corners=False)

    # coarse_prob is only consumed on host by crop(): plain XLA sigmoid (no Pallas
    # store of an offset interior slice).  The Pallas saliency kernels fuse
    # sigmoid + 3x3 conv + ReLU, then 5x5 conv + x*saliency epilogue.
    coarse_prob = jax.nn.sigmoid(lateral_map_1)
    xs = saliency_pair(lateral_map_1, x, params)

    cropped_image, crop_info = crop(coarse_prob, xs)

    hc, wc = int(cropped_image.shape[2]), int(cropped_image.shape[3])
    # fine_model = Res2Net50 (undefined pretrained) -> synthetic multi-scale feats.
    # TODO(synk): real Res2Net50 features not representable from this file.
    h3, w3 = max(1, hc // 8), max(1, wc // 8)
    h4, w4 = max(1, hc // 16), max(1, wc // 16)
    h5, w5 = max(1, hc // 32), max(1, wc // 32)
    out3 = jax.random.normal(jax.random.fold_in(key, 3), (N, 512, h3, w3), jnp.float32)
    out4 = jax.random.normal(jax.random.fold_in(key, 4), (N, 1024, h4, w4), jnp.float32)
    out5 = jax.random.normal(jax.random.fold_in(key, 5), (N, 2048, h5, w5), jnp.float32)

    out5 = pointwise_conv_nchw(out5, params['lin5_wT'], params['lin5_shift'], relu=True)
    out4 = pointwise_conv_nchw(out4, params['lin4_wT'], params['lin4_shift'], relu=True)
    out3 = pointwise_conv_nchw(out3, params['lin3_wT'], params['lin3_shift'], relu=True)

    out5 = resize_bilinear(out5, h3, w3, align_corners=True)
    out4 = resize_bilinear(out4, h3, w3, align_corners=True)

    h = predict_fused(out3, out4, out5, params['pred_wT'], params['pred_b'])
    h = resize_bilinear(h, hc, wc, align_corners=True)
    h = uncrop(crop_info, h, x)                        # f32, -9999999 sentinel

    # fused: evidence = softplus(h); fine_prob = conv5(sigmoid(h))
    fine_prob, evidence = final_fused(h, params['conv5_w'], params['conv5_b'])
    return fine_prob, evidence


if __name__ == "__main__":
    key = jax.random.PRNGKey(0)
    k_x, k_p, k_feat = jax.random.split(key, 3)
    x = jax.random.normal(k_x, (2, 3, 64, 64), jnp.float32)   # NCHW
    params = make_params(k_p)

    fine_prob, evidence = mftn_forward_test_O(params, x, k_feat)
    jax.block_until_ready(fine_prob)
    jax.block_until_ready(evidence)
    assert fine_prob.shape == (2, 1, 64, 64)
    assert evidence.shape == (2, 3, 64, 64)
    print("KERNEL_OK")
</pallas_src>

<mosaic_0001>
module attributes {stable_mosaic.version = 11 : i64} {
  func.func @_sal1_kernel(%arg0: i32, %arg1: memref<1x3x66x128xf32, #tpu.memory_space<vmem>>, %arg2: memref<81xf32, #tpu.memory_space<smem>>, %arg3: memref<3xf32, #tpu.memory_space<smem>>, %arg4: memref<1x3x64x128xf32, #tpu.memory_space<vmem>>) attributes {dimension_semantics = [#tpu.dimension_semantics<parallel>], iteration_bounds = array<i64: 2>, scalar_prefetch = 0 : i64, scratch_operands = 0 : i64, tpu.core_type = #tpu.core_type<tc>, window_params = [{transform_indices = @transform_0, window_bounds = array<i64: 1, 3, 66, 128>}, {transform_indices = @transform_1, window_bounds = array<i64: 81>}, {transform_indices = @transform_2, window_bounds = array<i64: 3>}, {transform_indices = @transform_3, window_bounds = array<i64: 1, 3, 64, 128>}]} {
    %c0 = arith.constant 0 : index
    %c0_0 = arith.constant 0 : index
    %c0_1 = arith.constant 0 : index
    %c0_2 = arith.constant 0 : index
    %0 = vector.load %arg1[%c0, %c0_0, %c0_1, %c0_2] : memref<1x3x66x128xf32, #tpu.memory_space<vmem>>, vector<1x3x66x128xf32>
    %1 = vector.shape_cast %0 : vector<1x3x66x128xf32> to vector<3x66x128xf32>
    %2 = arith.negf %1 : vector<3x66x128xf32>
    %3 = math.exp %2 : vector<3x66x128xf32>
    %cst = arith.constant 1.000000e+00 : f32
    %4 = vector.broadcast %cst : f32 to vector<3x66x128xf32>
    %5 = arith.addf %4, %3 : vector<3x66x128xf32>
    %6 = arith.divf %4, %5 : vector<3x66x128xf32>
    %cst_3 = arith.constant 0.000000e+00 : f32
    %7 = vector.broadcast %cst_3 : f32 to vector<64x128xf32>
    %cst_4 = arith.constant 0.000000e+00 : f32
    %8 = vector.broadcast %cst_4 : f32 to vector<64x128xf32>
    %cst_5 = arith.constant 0.000000e+00 : f32
    %9 = vector.broadcast %cst_5 : f32 to vector<64x128xf32>
    %10 = vector.extract_strided_slice %6 {offsets = [0, 0, 0], sizes = [1, 64, 128], strides = [1, 1, 1]} : vector<3x66x128xf32> to vector<1x64x128xf32>
    %11 = vector.shape_cast %10 : vector<1x64x128xf32> to vector<64x128xf32>
    %c0_6 = arith.constant 0 : index
    %12 = memref.load %arg2[%c0_6] : memref<81xf32, #tpu.memory_space<smem>>
    %13 = vector.broadcast %12 : f32 to vector<64x128xf32>
    %14 = arith.mulf %11, %13 : vector<64x128xf32>
    %15 = arith.addf %7, %14 : vector<64x128xf32>
    %c27 = arith.constant 27 : index
    %16 = memref.load %arg2[%c27] : memref<81xf32, #tpu.memory_space<smem>>
    %17 = vector.broadcast %16 : f32 to vector<64x128xf32>
    %18 = arith.mulf %11, %17 : vector<64x128xf32>
    %19 = arith.addf %8, %18 : vector<64x128xf32>
    %c54 = arith.constant 54 : index
    %20 = memref.load %arg2[%c54] : memref<81xf32, #tpu.memory_space<smem>>
    %21 = vector.broadcast %20 : f32 to vector<64x128xf32>
    %22 = arith.mulf %11, %21 : vector<64x128xf32>
    %23 = arith.addf %9, %22 : vector<64x128xf32>
    %c127_i32 = arith.constant 127 : i32
    %24 = tpu.dynamic_rotate %11 by %c127_i32 dim 1 : vector<64x128xf32>, i32 -> vector<64x128xf32>
    %c1 = arith.constant 1 : index
    %25 = memref.load %arg2[%c1] : memref<81xf32, #tpu.memory_space<smem>>
    %26 = vector.broadcast %25 : f32 to vector<64x128xf32>
    %27 = arith.mulf %24, %26 : vector<64x128xf32>
    %28 = arith.addf %15, %27 : vector<64x128xf32>
    %c28 = arith.constant 28 : index
    %29 = memref.load %arg2[%c28] : memref<81xf32, #tpu.memory_space<smem>>
    %30 = vector.broadcast %29 : f32 to vector<64x128xf32>
    %31 = arith.mulf %24, %30 : vector<64x128xf32>
    %32 = arith.addf %19, %31 : vector<64x128xf32>
    %c55 = arith.constant 55 : index
    %33 = memref.load %arg2[%c55] : memref<81xf32, #tpu.memory_space<smem>>
    %34 = vector.broadcast %33 : f32 to vector<64x128xf32>
    %35 = arith.mulf %24, %34 : vector<64x128xf32>
    %36 = arith.addf %23, %35 : vector<64x128xf32>
    %c126_i32 = arith.constant 126 : i32
    %37 = tpu.dynamic_rotate %11 by %c126_i32 dim 1 : vector<64x128xf32>, i32 -> vector<64x128xf32>
    %c2 = arith.constant 2 : index
    %38 = memref.load %arg2[%c2] : memref<81xf32, #tpu.memory_space<smem>>
    %39 = vector.broadcast %38 : f32 to vector<64x128xf32>
    %40 = arith.mulf %37, %39 : vector<64x128xf32>
    %41 = arith.addf %28, %40 : vector<64x128xf32>
    %c29 = arith.constant 29 : index
    %42 = memref.load %arg2[%c29] : memref<81xf32, #tpu.memory_space<smem>>
    %43 = vector.broadcast %42 : f32 to vector<64x128xf32>
    %44 = arith.mulf %37, %43 : vector<64x128xf32>
    %45 = arith.addf %32, %44 : vector<64x128xf32>
    %c56 = arith.constant 56 : index
    %46 = memref.load %arg2[%c56] : memref<81xf32, #tpu.memory_space<smem>>
    %47 = vector.broadcast %46 : f32 to vector<64x128xf32>
    %48 = arith.mulf %37, %47 : vector<64x128xf32>
    %49 = arith.addf %36, %48 : vector<64x128xf32>
    %50 = vector.extract_strided_slice %6 {offsets = [0, 1, 0], sizes = [1, 64, 128], strides = [1, 1, 1]} : vector<3x66x128xf32> to vector<1x64x128xf32>
    %51 = vector.shape_cast %50 : vector<1x64x128xf32> to vector<64x128xf32>
    %c3 = arith.constant 3 : index
    %52 = memref.load %arg2[%c3] : memref<81xf32, #tpu.memory_space<smem>>
    %53 = vector.broadcast %52 : f32 to vector<64x128xf32>
    %54 = arith.mulf %51, %53 : vector<64x128xf32>
    %55 = arith.addf %41, %54 : vector<64x128xf32>
    %c30 = arith.constant 30 : index
    %56 = memref.load %arg2[%c30] : memref<81xf32, #tpu.memory_space<smem>>
    %57 = vector.broadcast %56 : f32 to vector<64x128xf32>
    %58 = arith.mulf %51, %57 : vector<64x128xf32>
    %59 = arith.addf %45, %58 : vector<64x128xf32>
    %c57 = arith.constant 57 : index
    %60 = memref.load %arg2[%c57] : memref<81xf32, #tpu.memory_space<smem>>
    %61 = vector.broadcast %60 : f32 to vector<64x128xf32>
    %62 = arith.mulf %51, %61 : vector<64x128xf32>
    %63 = arith.addf %49, %62 : vector<64x128xf32>
    %c127_i32_7 = arith.constant 127 : i32
    %64 = tpu.dynamic_rotate %51 by %c127_i32_7 dim 1 : vector<64x128xf32>, i32 -> vector<64x128xf32>
    %c4 = arith.constant 4 : index
    %65 = memref.load %arg2[%c4] : memref<81xf32, #tpu.memory_space<smem>>
    %66 = vector.broadcast %65 : f32 to vector<64x128xf32>
    %67 = arith.mulf %64, %66 : vector<64x128xf32>
    %68 = arith.addf %55, %67 : vector<64x128xf32>
    %c31 = arith.constant 31 : index
    %69 = memref.load %arg2[%c31] : memref<81xf32, #tpu.memory_space<smem>>
    %70 = vector.broadcast %69 : f32 to vector<64x128xf32>
    %71 = arith.mulf %64, %70 : vector<64x128xf32>
    %72 = arith.addf %59, %71 : vector<64x128xf32>
    %c58 = arith.constant 58 : index
    %73 = memref.load %arg2[%c58] : memref<81xf32, #tpu.memory_space<smem>>
    %74 = vector.broadcast %73 : f32 to vector<64x128xf32>
    %75 = arith.mulf %64, %74 : vector<64x128xf32>
    %76 = arith.addf %63, %75 : vector<64x128xf32>
    %c126_i32_8 = arith.constant 126 : i32
    %77 = tpu.dynamic_rotate %51 by %c126_i32_8 dim 1 : vector<64x128xf32>, i32 -> vector<64x128xf32>
    %c5 = arith.constant 5 : index
    %78 = memref.load %arg2[%c5] : memref<81xf32, #tpu.memory_space<smem>>
    %79 = vector.broadcast %78 : f32 to vector<64x128xf32>
    %80 = arith.mulf %77, %79 : vector<64x128xf32>
    %81 = arith.addf %68, %80 : vector<64x128xf32>
    %c32 = arith.constant 32 : index
    %82 = memref.load %arg2[%c32] : memref<81xf32, #tpu.memory_space<smem>>
    %83 = vector.broadcast %82 : f32 to vector<64x128xf32>
    %84 = arith.mulf %77, %83 : vector<64x128xf32>
    %85 = arith.addf %72, %84 : vector<64x128xf32>
    %c59 = arith.constant 59 : index
    %86 = memref.load %arg2[%c59] : memref<81xf32, #tpu.memory_space<smem>>
    %87 = vector.broadcast %86 : f32 to vector<64x128xf32>
    %88 = arith.mulf %77, %87 : vector<64x128xf32>
    %89 = arith.addf %76, %88 : vector<64x128xf32>
    %90 = vector.extract_strided_slice %6 {offsets = [0, 2, 0], sizes = [1, 64, 128], strides = [1, 1, 1]} : vector<3x66x128xf32> to vector<1x64x128xf32>
    %91 = vector.shape_cast %90 : vector<1x64x128xf32> to vector<64x128xf32>
    %c6 = arith.constant 6 : index
    %92 = memref.load %arg2[%c6] : memref<81xf32, #tpu.memory_space<smem>>
    %93 = vector.broadcast %92 : f32 to vector<64x128xf32>
    %94 = arith.mulf %91, %93 : vector<64x128xf32>
    %95 = arith.addf %81, %94 : vector<64x128xf32>
    %c33 = arith.constant 33 : index
    %96 = memref.load %arg2[%c33] : memref<81xf32, #tpu.memory_space<smem>>
    %97 = vector.broadcast %96 : f32 to vector<64x128xf32>
    %98 = arith.mulf %91, %97 : vector<64x128xf32>
    %99 = arith.addf %85, %98 : vector<64x128xf32>
    %c60 = arith.constant 60 : index
    %100 = memref.load %arg2[%c60] : memref<81xf32, #tpu.memory_space<smem>>
    %101 = vector.broadcast %100 : f32 to vector<64x128xf32>
    %102 = arith.mulf %91, %101 : vector<64x128xf32>
    %103 = arith.addf %89, %102 : vector<64x128xf32>
    %c127_i32_9 = arith.constant 127 : i32
    %104 = tpu.dynamic_rotate %91 by %c127_i32_9 dim 1 : vector<64x128xf32>, i32 -> vector<64x128xf32>
    %c7 = arith.constant 7 : index
    %105 = memref.load %arg2[%c7] : memref<81xf32, #tpu.memory_space<smem>>
    %106 = vector.broadcast %105 : f32 to vector<64x128xf32>
    %107 = arith.mulf %104, %106 : vector<64x128xf32>
    %108 = arith.addf %95, %107 : vector<64x128xf32>
    %c34 = arith.constant 34 : index
    %109 = memref.load %arg2[%c34] : memref<81xf32, #tpu.memory_space<smem>>
    %110 = vector.broadcast %109 : f32 to vector<64x128xf32>
    %111 = arith.mulf %104, %110 : vector<64x128xf32>
    %112 = arith.addf %99, %111 : vector<64x128xf32>
    %c61 = arith.constant 61 : index
    %113 = memref.load %arg2[%c61] : memref<81xf32, #tpu.memory_space<smem>>
    %114 = vector.broadcast %113 : f32 to vector<64x128xf32>
    %115 = arith.mulf %104, %114 : vector<64x128xf32>
    %116 = arith.addf %103, %115 : vector<64x128xf32>
    %c126_i32_10 = arith.constant 126 : i32
    %117 = tpu.dynamic_rotate %91 by %c126_i32_10 dim 1 : vector<64x128xf32>, i32 -> vector<64x128xf32>
    %c8 = arith.constant 8 : index
    %118 = memref.load %arg2[%c8] : memref<81xf32, #tpu.memory_space<smem>>
    %119 = vector.broadcast %118 : f32 to vector<64x128xf32>
    %120 = arith.mulf %117, %119 : vector<64x128xf32>
    %121 = arith.addf %108, %120 : vector<64x128xf32>
    %c35 = arith.constant 35 : index
    %122 = memref.load %arg2[%c35] : memref<81xf32, #tpu.memory_space<smem>>
    %123 = vector.broadcast %122 : f32 to vector<64x128xf32>
    %124 = arith.mulf %117, %123 : vector<64x128xf32>
    %125 = arith.addf %112, %124 : vector<64x128xf32>
    %c62 = arith.constant 62 : index
    %126 = memref.load %arg2[%c62] : memref<81xf32, #tpu.memory_space<smem>>
    %127 = vector.broadcast %126 : f32 to vector<64x128xf32>
    %128 = arith.mulf %117, %127 : vector<64x128xf32>
    %129 = arith.addf %116, %128 : vector<64x128xf32>
    %130 = vector.extract_strided_slice %6 {offsets = [1, 0, 0], sizes = [1, 64, 128], strides = [1, 1, 1]} : vector<3x66x128xf32> to vector<1x64x128xf32>
    %131 = vector.shape_cast %130 : vector<1x64x128xf32> to vector<64x128xf32>
    %c9 = arith.constant 9 : index
    %132 = memref.load %arg2[%c9] : memref<81xf32, #tpu.memory_space<smem>>
    %133 = vector.broadcast %132 : f32 to vector<64x128xf32>
    %134 = arith.mulf %131, %133 : vector<64x128xf32>
    %135 = arith.addf %121, %134 : vector<64x128xf32>
    %c36 = arith.constant 36 : index
    %136 = memref.load %arg2[%c36] : memref<81xf32, #tpu.memory_space<smem>>
    %137 = vector.broadcast %136 : f32 to vector<64x128xf32>
    %138 = arith.mulf %131, %137 : vector<64x128xf32>
    %139 = arith.addf %125, %138 : vector<64x128xf32>
    %c63 = arith.constant 63 : index
    %140 = memref.load %arg2[%c63] : memref<81xf32, #tpu.memory_space<smem>>
    %141 = vector.broadcast %140 : f32 to vector<64x128xf32>
    %142 = arith.mulf %131, %141 : vector<64x128xf32>
    %143 = arith.addf %129, %142 : vector<64x128xf32>
    %c127_i32_11 = arith.constant 127 : i32
    %144 = tpu.dynamic_rotate %131 by %c127_i32_11 dim 1 : vector<64x128xf32>, i32 -> vector<64x128xf32>
    %c10 = arith.constant 10 : index
    %145 = memref.load %arg2[%c10] : memref<81xf32, #tpu.memory_space<smem>>
    %146 = vector.broadcast %145 : f32 to vector<64x128xf32>
    %147 = arith.mulf %144, %146 : vector<64x128xf32>
    %148 = arith.addf %135, %147 : vector<64x128xf32>
    %c37 = arith.constant 37 : index
    %149 = memref.load %arg2[%c37] : memref<81xf32, #tpu.memory_space<smem>>
    %150 = vector.broadcast %149 : f32 to vector<64x128xf32>
    %151 = arith.mulf %144, %150 : vector<64x128xf32>
    %152 = arith.addf %139, %151 : vector<64x128xf32>
    %c64 = arith.constant 64 : index
    %153 = memref.load %arg2[%c64] : memref<81xf32, #tpu.memory_space<smem>>
    %154 = vector.broadcast %153 : f32 to vector<64x128xf32>
    %155 = arith.mulf %144, %154 : vector<64x128xf32>
    %156 = arith.addf %143, %155 : vector<64x128xf32>
    %c126_i32_12 = arith.constant 126 : i32
    %157 = tpu.dynamic_rotate %131 by %c126_i32_12 dim 1 : vector<64x128xf32>, i32 -> vector<64x128xf32>
    %c11 = arith.constant 11 : index
    %158 = memref.load %arg2[%c11] : memref<81xf32, #tpu.memory_space<smem>>
    %159 = vector.broadcast %158 : f32 to vector<64x128xf32>
    %160 = arith.mulf %157, %159 : vector<64x128xf32>
    %161 = arith.addf %148, %160 : vector<64x128xf32>
    %c38 = arith.constant 38 : index
    %162 = memref.load %arg2[%c38] : memref<81xf32, #tpu.memory_space<smem>>
    %163 = vector.broadcast %162 : f32 to vector<64x128xf32>
    %164 = arith.mulf %157, %163 : vector<64x128xf32>
    %165 = arith.addf %152, %164 : vector<64x128xf32>
    %c65 = arith.constant 65 : index
    %166 = memref.load %arg2[%c65] : memref<81xf32, #tpu.memory_space<smem>>
    %167 = vector.broadcast %166 : f32 to vector<64x128xf32>
    %168 = arith.mulf %157, %167 : vector<64x128xf32>
    %169 = arith.addf %156, %168 : vector<64x128xf32>
    %170 = vector.extract_strided_slice %6 {offsets = [1, 1, 0], sizes = [1, 64, 128], strides = [1, 1, 1]} : vector<3x66x128xf32> to vector<1x64x128xf32>
    %171 = vector.shape_cast %170 : vector<1x64x128xf32> to vector<64x128xf32>
    %c12 = arith.constant 12 : index
    %172 = memref.load %arg2[%c12] : memref<81xf32, #tpu.memory_space<smem>>
    %173 = vector.broadcast %172 : f32 to vector<64x128xf32>
    %174 = arith.mulf %171, %173 : vector<64x128xf32>
    %175 = arith.addf %161, %174 : vector<64x128xf32>
    %c39 = arith.constant 39 : index
    %176 = memref.load %arg2[%c39] : memref<81xf32, #tpu.memory_space<smem>>
    %177 = vector.broadcast %176 : f32 to vector<64x128xf32>
    %178 = arith.mulf %171, %177 : vector<64x128xf32>
    %179 = arith.addf %165, %178 : vector<64x128xf32>
    %c66 = arith.constant 66 : index
    %180 = memref.load %arg2[%c66] : memref<81xf32, #tpu.memory_space<smem>>
    %181 = vector.broadcast %180 : f32 to vector<64x128xf32>
    %182 = arith.mulf %171, %181 : vector<64x128xf32>
    %183 = arith.addf %169, %182 : vector<64x128xf32>
    %c127_i32_13 = arith.constant 127 : i32
    %184 = tpu.dynamic_rotate %171 by %c127_i32_13 dim 1 : vector<64x128xf32>, i32 -> vector<64x128xf32>
    %c13 = arith.constant 13 : index
    %185 = memref.load %arg2[%c13] : memref<81xf32, #tpu.memory_space<smem>>
    %186 = vector.broadcast %185 : f32 to vector<64x128xf32>
    %187 = arith.mulf %184, %186 : vector<64x128xf32>
    %188 = arith.addf %175, %187 : vector<64x128xf32>
    %c40 = arith.constant 40 : index
    %189 = memref.load %arg2[%c40] : memref<81xf32, #tpu.memory_space<smem>>
    %190 = vector.broadcast %189 : f32 to vector<64x128xf32>
    %191 = arith.mulf %184, %190 : vector<64x128xf32>
    %192 = arith.addf %179, %191 : vector<64x128xf32>
    %c67 = arith.constant 67 : index
    %193 = memref.load %arg2[%c67] : memref<81xf32, #tpu.memory_space<smem>>
    %194 = vector.broadcast %193 : f32 to vector<64x128xf32>
    %195 = arith.mulf %184, %194 : vector<64x128xf32>
    %196 = arith.addf %183, %195 : vector<64x128xf32>
    %c126_i32_14 = arith.constant 126 : i32
    %197 = tpu.dynamic_rotate %171 by %c126_i32_14 dim 1 : vector<64x128xf32>, i32 -> vector<64x128xf32>
    %c14 = arith.constant 14 : index
    %198 = memref.load %arg2[%c14] : memref<81xf32, #tpu.memory_space<smem>>
    %199 = vector.broadcast %198 : f32 to vector<64x128xf32>
    %200 = arith.mulf %197, %199 : vector<64x128xf32>
    %201 = arith.addf %188, %200 : vector<64x128xf32>
    %c41 = arith.constant 41 : index
    %202 = memref.load %arg2[%c41] : memref<81xf32, #tpu.memory_space<smem>>
    %203 = vector.broadcast %202 : f32 to vector<64x128xf32>
    %204 = arith.mulf %197, %203 : vector<64x128xf32>
    %205 = arith.addf %192, %204 : vector<64x128xf32>
    %c68 = arith.constant 68 : index
    %206 = memref.load %arg2[%c68] : memref<81xf32, #tpu.memory_space<smem>>
    %207 = vector.broadcast %206 : f32 to vector<64x128xf32>
    %208 = arith.mulf %197, %207 : vector<64x128xf32>
    %209 = arith.addf %196, %208 : vector<64x128xf32>
    %210 = vector.extract_strided_slice %6 {offsets = [1, 2, 0], sizes = [1, 64, 128], strides = [1, 1, 1]} : vector<3x66x128xf32> to vector<1x64x128xf32>
    %211 = vector.shape_cast %210 : vector<1x64x128xf32> to vector<64x128xf32>
    %c15 = arith.constant 15 : index
    %212 = memref.load %arg2[%c15] : memref<81xf32, #tpu.memory_space<smem>>
    %213 = vector.broadcast %212 : f32 to vector<64x128xf32>
    %214 = arith.mulf %211, %213 : vector<64x128xf32>
    %215 = arith.addf %201, %214 : vector<64x128xf32>
    %c42 = arith.constant 42 : index
    %216 = memref.load %arg2[%c42] : memref<81xf32, #tpu.memory_space<smem>>
    %217 = vector.broadcast %216 : f32 to vector<64x128xf32>
    %218 = arith.mulf %211, %217 : vector<64x128xf32>
    %219 = arith.addf %205, %218 : vector<64x128xf32>
    %c69 = arith.constant 69 : index
    %220 = memref.load %arg2[%c69] : memref<81xf32, #tpu.memory_space<smem>>
    %221 = vector.broadcast %220 : f32 to vector<64x128xf32>
    %222 = arith.mulf %211, %221 : vector<64x128xf32>
    %223 = arith.addf %209, %222 : vector<64x128xf32>
    %c127_i32_15 = arith.constant 127 : i32
    %224 = tpu.dynamic_rotate %211 by %c127_i32_15 dim 1 : vector<64x128xf32>, i32 -> vector<64x128xf32>
    %c16 = arith.constant 16 : index
    %225 = memref.load %arg2[%c16] : memref<81xf32, #tpu.memory_space<smem>>
    %226 = vector.broadcast %225 : f32 to vector<64x128xf32>
    %227 = arith.mulf %224, %226 : vector<64x128xf32>
    %228 = arith.addf %215, %227 : vector<64x128xf32>
    %c43 = arith.constant 43 : index
    %229 = memref.load %arg2[%c43] : memref<81xf32, #tpu.memory_space<smem>>
    %230 = vector.broadcast %229 : f32 to vector<64x128xf32>
    %231 = arith.mulf %224, %230 : vector<64x128xf32>
    %232 = arith.addf %219, %231 : vector<64x128xf32>
    %c70 = arith.constant 70 : index
    %233 = memref.load %arg2[%c70] : memref<81xf32, #tpu.memory_space<smem>>
    %234 = vector.broadcast %233 : f32 to vector<64x128xf32>
    %235 = arith.mulf %224, %234 : vector<64x128xf32>
    %236 = arith.addf %223, %235 : vector<64x128xf32>
    %c126_i32_16 = arith.constant 126 : i32
    %237 = tpu.dynamic_rotate %211 by %c126_i32_16 dim 1 : vector<64x128xf32>, i32 -> vector<64x128xf32>
    %c17 = arith.constant 17 : index
    %238 = memref.load %arg2[%c17] : memref<81xf32, #tpu.memory_space<smem>>
    %239 = vector.broadcast %238 : f32 to vector<64x128xf32>
    %240 = arith.mulf %237, %239 : vector<64x128xf32>
    %241 = arith.addf %228, %240 : vector<64x128xf32>
    %c44 = arith.constant 44 : index
    %242 = memref.load %arg2[%c44] : memref<81xf32, #tpu.memory_space<smem>>
    %243 = vector.broadcast %242 : f32 to vector<64x128xf32>
    %244 = arith.mulf %237, %243 : vector<64x128xf32>
    %245 = arith.addf %232, %244 : vector<64x128xf32>
    %c71 = arith.constant 71 : index
    %246 = memref.load %arg2[%c71] : memref<81xf32, #tpu.memory_space<smem>>
    %247 = vector.broadcast %246 : f32 to vector<64x128xf32>
    %248 = arith.mulf %237, %247 : vector<64x128xf32>
    %249 = arith.addf %236, %248 : vector<64x128xf32>
    %250 = vector.extract_strided_slice %6 {offsets = [2, 0, 0], sizes = [1, 64, 128], strides = [1, 1, 1]} : vector<3x66x128xf32> to vector<1x64x128xf32>
    %251 = vector.shape_cast %250 : vector<1x64x128xf32> to vector<64x128xf32>
    %c18 = arith.constant 18 : index
    %252 = memref.load %arg2[%c18] : memref<81xf32, #tpu.memory_space<smem>>
    %253 = vector.broadcast %252 : f32 to vector<64x128xf32>
    %254 = arith.mulf %251, %253 : vector<64x128xf32>
    %255 = arith.addf %241, %254 : vector<64x128xf32>
    %c45 = arith.constant 45 : index
    %256 = memref.load %arg2[%c45] : memref<81xf32, #tpu.memory_space<smem>>
    %257 = vector.broadcast %256 : f32 to vector<64x128xf32>
    %258 = arith.mulf %251, %257 : vector<64x128xf32>
    %259 = arith.addf %245, %258 : vector<64x128xf32>
    %c72 = arith.constant 72 : index
    %260 = memref.load %arg2[%c72] : memref<81xf32, #tpu.memory_space<smem>>
    %261 = vector.broadcast %260 : f32 to vector<64x128xf32>
    %262 = arith.mulf %251, %261 : vector<64x128xf32>
    %263 = arith.addf %249, %262 : vector<64x128xf32>
    %c127_i32_17 = arith.constant 127 : i32
    %264 = tpu.dynamic_rotate %251 by %c127_i32_17 dim 1 : vector<64x128xf32>, i32 -> vector<64x128xf32>
    %c19 = arith.constant 19 : index
    %265 = memref.load %arg2[%c19] : memref<81xf32, #tpu.memory_space<smem>>
    %266 = vector.broadcast %265 : f32 to vector<64x128xf32>
    %267 = arith.mulf %264, %266 : vector<64x128xf32>
    %268 = arith.addf %255, %267 : vector<64x128xf32>
    %c46 = arith.constant 46 : index
    %269 = memref.load %arg2[%c46] : memref<81xf32, #tpu.memory_space<smem>>
    %270 = vector.broadcast %269 : f32 to vector<64x128xf32>
    %271 = arith.mulf %264, %270 : vector<64x128xf32>
    %272 = arith.addf %259, %271 : vector<64x128xf32>
    %c73 = arith.constant 73 : index
    %273 = memref.load %arg2[%c73] : memref<81xf32, #tpu.memory_space<smem>>
    %274 = vector.broadcast %273 : f32 to vector<64x128xf32>
    %275 = arith.mulf %264, %274 : vector<64x128xf32>
    %276 = arith.addf %263, %275 : vector<64x128xf32>
    %c126_i32_18 = arith.constant 126 : i32
    %277 = tpu.dynamic_rotate %251 by %c126_i32_18 dim 1 : vector<64x128xf32>, i32 -> vector<64x128xf32>
    %c20 = arith.constant 20 : index
    %278 = memref.load %arg2[%c20] : memref<81xf32, #tpu.memory_space<smem>>
    %279 = vector.broadcast %278 : f32 to vector<64x128xf32>
    %280 = arith.mulf %277, %279 : vector<64x128xf32>
    %281 = arith.addf %268, %280 : vector<64x128xf32>
    %c47 = arith.constant 47 : index
    %282 = memref.load %arg2[%c47] : memref<81xf32, #tpu.memory_space<smem>>
    %283 = vector.broadcast %282 : f32 to vector<64x128xf32>
    %284 = arith.mulf %277, %283 : vector<64x128xf32>
    %285 = arith.addf %272, %284 : vector<64x128xf32>
    %c74 = arith.constant 74 : index
    %286 = memref.load %arg2[%c74] : memref<81xf32, #tpu.memory_space<smem>>
    %287 = vector.broadcast %286 : f32 to vector<64x128xf32>
    %288 = arith.mulf %277, %287 : vector<64x128xf32>
    %289 = arith.addf %276, %288 : vector<64x128xf32>
    %290 = vector.extract_strided_slice %6 {offsets = [2, 1, 0], sizes = [1, 64, 128], strides = [1, 1, 1]} : vector<3x66x128xf32> to vector<1x64x128xf32>
    %291 = vector.shape_cast %290 : vector<1x64x128xf32> to vector<64x128xf32>
    %c21 = arith.constant 21 : index
    %292 = memref.load %arg2[%c21] : memref<81xf32, #tpu.memory_space<smem>>
    %293 = vector.broadcast %292 : f32 to vector<64x128xf32>
    %294 = arith.mulf %291, %293 : vector<64x128xf32>
    %295 = arith.addf %281, %294 : vector<64x128xf32>
    %c48 = arith.constant 48 : index
    %296 = memref.load %arg2[%c48] : memref<81xf32, #tpu.memory_space<smem>>
    %297 = vector.broadcast %296 : f32 to vector<64x128xf32>
    %298 = arith.mulf %291, %297 : vector<64x128xf32>
    %299 = arith.addf %285, %298 : vector<64x128xf32>
    %c75 = arith.constant 75 : index
    %300 = memref.load %arg2[%c75] : memref<81xf32, #tpu.memory_space<smem>>
    %301 = vector.broadcast %300 : f32 to vector<64x128xf32>
    %302 = arith.mulf %291, %301 : vector<64x128xf32>
    %303 = arith.addf %289, %302 : vector<64x128xf32>
    %c127_i32_19 = arith.constant 127 : i32
    %304 = tpu.dynamic_rotate %291 by %c127_i32_19 dim 1 : vector<64x128xf32>, i32 -> vector<64x128xf32>
    %c22 = arith.constant 22 : index
    %305 = memref.load %arg2[%c22] : memref<81xf32, #tpu.memory_space<smem>>
    %306 = vector.broadcast %305 : f32 to vector<64x128xf32>
    %307 = arith.mulf %304, %306 : vector<64x128xf32>
    %308 = arith.addf %295, %307 : vector<64x128xf32>
    %c49 = arith.constant 49 : index
    %309 = memref.load %arg2[%c49] : memref<81xf32, #tpu.memory_space<smem>>
    %310 = vector.broadcast %309 : f32 to vector<64x128xf32>
    %311 = arith.mulf %304, %310 : vector<64x128xf32>
    %312 = arith.addf %299, %311 : vector<64x128xf32>
    %c76 = arith.constant 76 : index
    %313 = memref.load %arg2[%c76] : memref<81xf32, #tpu.memory_space<smem>>
    %314 = vector.broadcast %313 : f32 to vector<64x128xf32>
    %315 = arith.mulf %304, %314 : vector<64x128xf32>
    %316 = arith.addf %303, %315 : vector<64x128xf32>
    %c126_i32_20 = arith.constant 126 : i32
    %317 = tpu.dynamic_rotate %291 by %c126_i32_20 dim 1 : vector<64x128xf32>, i32 -> vector<64x128xf32>
    %c23 = arith.constant 23 : index
    %318 = memref.load %arg2[%c23] : memref<81xf32, #tpu.memory_space<smem>>
    %319 = vector.broadcast %318 : f32 to vector<64x128xf32>
    %320 = arith.mulf %317, %319 : vector<64x128xf32>
    %321 = arith.addf %308, %320 : vector<64x128xf32>
    %c50 = arith.constant 50 : index
    %322 = memref.load %arg2[%c50] : memref<81xf32, #tpu.memory_space<smem>>
    %323 = vector.broadcast %322 : f32 to vector<64x128xf32>
    %324 = arith.mulf %317, %323 : vector<64x128xf32>
    %325 = arith.addf %312, %324 : vector<64x128xf32>
    %c77 = arith.constant 77 : index
    %326 = memref.load %arg2[%c77] : memref<81xf32, #tpu.memory_space<smem>>
    %327 = vector.broadcast %326 : f32 to vector<64x128xf32>
    %328 = arith.mulf %317, %327 : vector<64x128xf32>
    %329 = arith.addf %316, %328 : vector<64x128xf32>
    %330 = vector.extract_strided_slice %6 {offsets = [2, 2, 0], sizes = [1, 64, 128], strides = [1, 1, 1]} : vector<3x66x128xf32> to vector<1x64x128xf32>
    %331 = vector.shape_cast %330 : vector<1x64x128xf32> to vector<64x128xf32>
    %c24 = arith.constant 24 : index
    %332 = memref.load %arg2[%c24] : memref<81xf32, #tpu.memory_space<smem>>
    %333 = vector.broadcast %332 : f32 to vector<64x128xf32>
    %334 = arith.mulf %331, %333 : vector<64x128xf32>
    %335 = arith.addf %321, %334 : vector<64x128xf32>
    %c51 = arith.constant 51 : index
    %336 = memref.load %arg2[%c51] : memref<81xf32, #tpu.memory_space<smem>>
    %337 = vector.broadcast %336 : f32 to vector<64x128xf32>
    %338 = arith.mulf %331, %337 : vector<64x128xf32>
    %339 = arith.addf %325, %338 : vector<64x128xf32>
    %c78 = arith.constant 78 : index
    %340 = memref.load %arg2[%c78] : memref<81xf32, #tpu.memory_space<smem>>
    %341 = vector.broadcast %340 : f32 to vector<64x128xf32>
    %342 = arith.mulf %331, %341 : vector<64x128xf32>
    %343 = arith.addf %329, %342 : vector<64x128xf32>
    %c127_i32_21 = arith.constant 127 : i32
    %344 = tpu.dynamic_rotate %331 by %c127_i32_21 dim 1 : vector<64x128xf32>, i32 -> vector<64x128xf32>
    %c25 = arith.constant 25 : index
    %345 = memref.load %arg2[%c25] : memref<81xf32, #tpu.memory_space<smem>>
    %346 = vector.broadcast %345 : f32 to vector<64x128xf32>
    %347 = arith.mulf %344, %346 : vector<64x128xf32>
    %348 = arith.addf %335, %347 : vector<64x128xf32>
    %c52 = arith.constant 52 : index
    %349 = memref.load %arg2[%c52] : memref<81xf32, #tpu.memory_space<smem>>
    %350 = vector.broadcast %349 : f32 to vector<64x128xf32>
    %351 = arith.mulf %344, %350 : vector<64x128xf32>
    %352 = arith.addf %339, %351 : vector<64x128xf32>
    %c79 = arith.constant 79 : index
    %353 = memref.load %arg2[%c79] : memref<81xf32, #tpu.memory_space<smem>>
    %354 = vector.broadcast %353 : f32 to vector<64x128xf32>
    %355 = arith.mulf %344, %354 : vector<64x128xf32>
    %356 = arith.addf %343, %355 : vector<64x128xf32>
    %c126_i32_22 = arith.constant 126 : i32
    %357 = tpu.dynamic_rotate %331 by %c126_i32_22 dim 1 : vector<64x128xf32>, i32 -> vector<64x128xf32>
    %c26 = arith.constant 26 : index
    %358 = memref.load %arg2[%c26] : memref<81xf32, #tpu.memory_space<smem>>
    %359 = vector.broadcast %358 : f32 to vector<64x128xf32>
    %360 = arith.mulf %357, %359 : vector<64x128xf32>
    %361 = arith.addf %348, %360 : vector<64x128xf32>
    %c53 = arith.constant 53 : index
    %362 = memref.load %arg2[%c53] : memref<81xf32, #tpu.memory_space<smem>>
    %363 = vector.broadcast %362 : f32 to vector<64x128xf32>
    %364 = arith.mulf %357, %363 : vector<64x128xf32>
    %365 = arith.addf %352, %364 : vector<64x128xf32>
    %c80 = arith.constant 80 : index
    %366 = memref.load %arg2[%c80] : memref<81xf32, #tpu.memory_space<smem>>
    %367 = vector.broadcast %366 : f32 to vector<64x128xf32>
    %368 = arith.mulf %357, %367 : vector<64x128xf32>
    %369 = arith.addf %356, %368 : vector<64x128xf32>
    %c0_23 = arith.constant 0 : index
    %370 = memref.load %arg3[%c0_23] : memref<3xf32, #tpu.memory_space<smem>>
    %371 = vector.broadcast %370 : f32 to vector<64x128xf32>
    %372 = arith.addf %361, %371 : vector<64x128xf32>
    %cst_24 = arith.constant 0.000000e+00 : f32
    %373 = vector.broadcast %cst_24 : f32 to vector<64x128xf32>
    %374 = arith.maximumf %372, %373 : vector<64x128xf32>
    %c0_25 = arith.constant 0 : index
    %c0_26 = arith.constant 0 : index
    %c0_27 = arith.constant 0 : index
    %c0_28 = arith.constant 0 : index
    %375 = vector.load %arg4[%c0_25, %c0_26, %c0_27, %c0_28] : memref<1x3x64x128xf32, #tpu.memory_space<vmem>>, vector<1x1x64x128xf32>
    %376 = vector.shape_cast %375 : vector<1x1x64x128xf32> to vector<64x128xf32>
    %377 = vector.shape_cast %374 : vector<64x128xf32> to vector<1x1x64x128xf32>
    tpu.vector_store %arg4[%c0_25, %c0_26, %c0_27, %c0_28], %377 {strides = array<i32>} : memref<1x3x64x128xf32, #tpu.memory_space<vmem>>, vector<1x1x64x128xf32>,
    %c1_29 = arith.constant 1 : index
    %378 = memref.load %arg3[%c1_29] : memref<3xf32, #tpu.memory_space<smem>>
    %379 = vector.broadcast %378 : f32 to vector<64x128xf32>
    %380 = arith.addf %365, %379 : vector<64x128xf32>
    %cst_30 = arith.constant 0.000000e+00 : f32
    %381 = vector.broadcast %cst_30 : f32 to vector<64x128xf32>
    %382 = arith.maximumf %380, %381 : vector<64x128xf32>
    %c0_31 = arith.constant 0 : index
    %c1_32 = arith.constant 1 : index
    %c0_33 = arith.constant 0 : index
    %c0_34 = arith.constant 0 : index
    %383 = vector.load %arg4[%c0_31, %c1_32, %c0_33, %c0_34] : memref<1x3x64x128xf32, #tpu.memory_space<vmem>>, vector<1x1x64x128xf32>
    %384 = vector.shape_cast %383 : vector<1x1x64x128xf32> to vector<64x128xf32>
    %385 = vector.shape_cast %382 : vector<64x128xf32> to vector<1x1x64x128xf32>
    tpu.vector_store %arg4[%c0_31, %c1_32, %c0_33, %c0_34], %385 {strides = array<i32>} : memref<1x3x64x128xf32, #tpu.memory_space<vmem>>, vector<1x1x64x128xf32>,
    %c2_35 = arith.constant 2 : index
    %386 = memref.load %arg3[%c2_35] : memref<3xf32, #tpu.memory_space<smem>>
    %387 = vector.broadcast %386 : f32 to vector<64x128xf32>
    %388 = arith.addf %369, %387 : vector<64x128xf32>
    %cst_36 = arith.constant 0.000000e+00 : f32
    %389 = vector.broadcast %cst_36 : f32 to vector<64x128xf32>
    %390 = arith.maximumf %388, %389 : vector<64x128xf32>
    %c0_37 = arith.constant 0 : index
    %c2_38 = arith.constant 2 : index
    %c0_39 = arith.constant 0 : index
    %c0_40 = arith.constant 0 : index
    %391 = vector.load %arg4[%c0_37, %c2_38, %c0_39, %c0_40] : memref<1x3x64x128xf32, #tpu.memory_space<vmem>>, vector<1x1x64x128xf32>
    %392 = vector.shape_cast %391 : vector<1x1x64x128xf32> to vector<64x128xf32>
    %393 = vector.shape_cast %390 : vector<64x128xf32> to vector<1x1x64x128xf32>
    tpu.vector_store %arg4[%c0_37, %c2_38, %c0_39, %c0_40], %393 {strides = array<i32>} : memref<1x3x64x128xf32, #tpu.memory_space<vmem>>, vector<1x1x64x128xf32>,
    return
  }
  func.func @transform_0(%arg0: i32) -> (i32, i32, i32, i32) {
    %c0_i32 = arith.constant 0 : i32
    %c0_i32_0 = arith.constant 0 : i32
    %c0_i32_1 = arith.constant 0 : i32
    %c0_i32_2 = arith.constant 0 : i32
    return %arg0, %c0_i32, %c0_i32_0, %c0_i32_1 : i32, i32, i32, i32
  }
  func.func @transform_1(%arg0: i32) -> i32 {
    %c0_i32 = arith.constant 0 : i32
    %c0_i32_0 = arith.constant 0 : i32
    return %c0_i32 : i32
  }
  func.func @transform_2(%arg0: i32) -> i32 {
    %c0_i32 = arith.constant 0 : i32
    %c0_i32_0 = arith.constant 0 : i32
    return %c0_i32 : i32
  }
  func.func @transform_3(%arg0: i32) -> (i32, i32, i32, i32) {
    %c0_i32 = arith.constant 0 : i32
    %c0_i32_0 = arith.constant 0 : i32
    %c0_i32_1 = arith.constant 0 : i32
    %c0_i32_2 = arith.constant 0 : i32
    return %arg0, %c0_i32, %c0_i32_0, %c0_i32_1 : i32, i32, i32, i32
  }
}

</mosaic_0001>

<bundles_post_ra>
// kernel: tpu_custom_call.1
= control target key start
LH: loop header
LB: loop body
LE: loop exit
PB: predicated region body
PF: predicated region fallthrough
CT: control target
= control target key end

     0   :  { %8 = vsyncpa [#allocation4], 0  ;;  %s7270_s0 = inlined_call_operand.vmem [shape: f32[2,3,66,128], index: 0, kind: input, shape index: {}]   ;;  %s7271_s1 = inlined_call_operand.vmem [shape: f32[81], index: 1, kind: input, shape index: {}]   ;;  %s7272_s2 = inlined_call_operand.vmem [shape: f32[3], index: 2, kind: input, shape index: {}]   ;;  %s7273_s3 = inlined_call_operand.hbm [shape: f32[2,3,64,128], index: 3, kind: output, shape index: {}]  }
   0x1   :  { %9 = vsyncpa [#allocation6], 0 }
   0x2   :  { %10 = vsyncpa [#allocation3], 0 }
   0x3   :  { %12 = vsyncpa [#allocation3 + $0x1], 0  ;;  %s3559_s12 = smov 0   ;;  %s3561_s13 = smov 0  }
   0x4   :  { %s3563_s14 = smov 0   ;;  %s3565_s15 = smov 0  }
   0x5 LB: > { %s3580_s16 = sadd.s32 4294967295, %s3530_s15   ;;  %s3118_s17 = sadd.s32 4294967294, %s3530_s15   ;;  %s3530_s15 = sphi %s3565_s15, %s7747_s15   ;;  %s3526_s14 = sphi %s3563_s14, %s7746_s14   ;;  %s3522_s13 = sphi %s3561_s13, %s7745_s13   ;;  %s3518_s12 = sphi %s3559_s12, %s7744_s12  }
   0x6   : > { %s3584_s18 = sadd.s32 1, %s3530_s15   ;;  %s93_s19 = sadd.s32 1, %s3526_s14 }
   0x7   : > { %s90_s20 = ssub.s32 %s3530_s15, %s3584_s18  ;;  %p103_p0 = scmp.ne.s32.totalorder %s3526_s14, %s3522_s13 }
   0x8   : > { %p91_p1 = scmp.eq.s32.totalorder %s90_s20, 0  ;;  %p104_p2 = scmp.eq.s32.totalorder %s3580_s16, 1 }
   0x9   : > { %p109_p3 = scmp.ne.s32.totalorder %s3522_s13, %s3518_s12  ;;  %p110_p4 = scmp.eq.s32.totalorder %s3118_s17, 1 }
   0xa   : > { %s3595_s21 = scalar_select %p91_p1, %s3526_s14, %s93_s19  }
   0xb   : > { %p3597_p5 = por %p104_p2, %p103_p0  ;;  %p3601_p6 = por %p110_p4, %p109_p3 }
   0xc   : > { %p3119_p7 = scmp.ge.s32.totalorder %s3530_s15, 1  ;;  %p117_p8 = scmp.lt.s32.totalorder %s3530_s15, 3 }
   0xd   : > { %s7390_s22 = scalar_select %p3597_p5, 1, 0 }
   0xe   : > { %s7391_s23 = scalar_select %p3601_p6, 1, 0 }
   0xf   : > { %p7274_p9 = scmp.eq.s32.totalorder %s3580_s16, 0  ;;  %p3608_p10 = pnand %p3119_p7, %p117_p8 }
  0x10   : > { %s130_s27 = sshll.u32 %s7271_s1, 4  ;;  %s141_s30 = sshll.u32 %s7272_s2, 4  ;;  %s131_s27 = int_to_ptr.vmem [resolvable:$true] %s130_s27  ;;  %s142_s30 = int_to_ptr.vmem [resolvable:$true] %s141_s30 }
  0x11   : > { %s7392_s24 = scalar_select %p3608_p10, 1, 0 }
  0x12   : > { %p3268_p11 = pneg %p3608_p10  ;;  %s3430_s5 = scalar_lea.vmem %s131_s27, 16 }
  0x13   : > { %p3431_p13 = scmp.ne.s32.totalorder %s131_s27, %s3430_s5  ;;  %p3438_p3 = scmp.lt.s32.totalorder %s131_s27, %s131_s27 }
  0x14   : > { %p3622_p12 = pnand %p7274_p9, %p3268_p11  ;;  %p3439_p4 = scmp.lt.s32.totalorder %s3430_s5, %s3430_s5 }
  0x16   : > { %p3432_p0 = pneg %p3622_p12  ;;  %p3440_p7 = por %p3439_p4, %p3438_p3 }
  0x18   : > { %p3433_p1 = pnand %p3432_p0, %p3431_p13 }
  0x1a   : > { %p3434_p2 = pneg %p3433_p1 }
  0x1c   : > { %p3441_p8 = pnand %p3440_p7, %p3434_p2 }
  0x1e   : > { %3444 = shalt.err (!%p3441_p8)
}
  0x1f   : > { %s3532_s6 = smov [#allocation2]   ;;  %s3445_s7 = scalar_lea.vmem %s142_s30, 16 }
  0x20   : > { %3271 = dma.vmem_to_smem (!%p3622_p12), %s131_s27, 16, %s3532_s6, [#allocation4]  }
  0x21   : > { %p3446_p11 = scmp.ne.s32.totalorder %s142_s30, %s3445_s7  ;;  %p3453_p5 = scmp.lt.s32.totalorder %s142_s30, %s142_s30 }
  0x22   : > { %p3454_p10 = scmp.lt.s32.totalorder %s3445_s7, %s3445_s7 }
  0x23   : > { %p3448_p9 = pnand %p3446_p11, %p3432_p0 }
  0x24   : > { %p3455_p13 = por %p3454_p10, %p3453_p5 }
  0x25   : > { %p3449_p6 = pneg %p3448_p9 }
  0x27   : > { %p3456_p1 = pnand %p3455_p13, %p3449_p6 }
  0x29   : > { %3459 = shalt.err (!%p3456_p1)
}
  0x2a   : > { %s3533_s8 = smov [#allocation5]   ;;  %p7394_p2 = scmp.ne.s32.totalorder %s7392_s24, 0 }
  0x2b   : > { %3274 = dma.vmem_to_smem (!%p3622_p12), %s142_s30, 16, %s3533_s8, [#allocation6]  }
  0x2c   : > { %162 = sbr.rel (%p7394_p2) target bundleno = 608 (0x260), region = 32 }
  0x33   : > { %p7395_p3 = scmp.eq.s32.totalorder %s3580_s16, 0 }
  0x35   : > { %3505 = dma.done.wait (%p7395_p3), [#allocation4], 16   ;;  %p7396_p4 = pmov %p7395_p3 }
  0x36   : > { %p7397_p9 = pmov %p7395_p3 }
  0x37   : > { %3507 = vsyncadd (%p7396_p4), [#allocation4], 4294967280 }
  0x38   : > { %3509 = dma.done.wait (%p7397_p9), [#allocation6], 16   ;;  %p7398_p5 = pmov %p7395_p3 }
  0x3a   : > { %3511 = vsyncadd (%p7398_p5), [#allocation6], 4294967280 }
  0x3b   : > { %172 = sfence }
  0x3c   : > { %p191_p6 = scmp.lt.s32.totalorder %s3580_s16, 1  ;;  %s3534_s20 = smov 127   ;;  %vm933_vm0 = vcmask 1045504   ;;  %vm599_vm1 = vcmask 1046528  }
  0x3d   : > { %s385_s24 = sld [smem:[#allocation2]]  ;;  %s3154_s25 = sld [smem:[#allocation2 + $0x1b]] }
  0x3e   : > { %s192_s9 = scalar_select %p191_p6, %s3580_s16, 1 }
  0x3f   : > { %s3721_s26 = sld [smem:[#allocation2 + $0x36]]  ;;  %s3723_s27 = sld [smem:[#allocation2 + $0x3]] }
  0x40   : > { %s3256_s10 = smul.u32 216, %s192_s9  ;;  %s3725_s28 = sld [smem:[#allocation2 + $0x1e]] }
  0x41   : > { %s3730_s29 = sld [smem:[#allocation2 + $0x39]]  ;;  %s3535_s30 = smov 126  }
  0x42   : > { %s3647_s19 = scalar_lea.vmem %s7270_s0, %s3256_s10  ;;  %s3907_s4 = sld [smem:[#allocation2 + $0x1]] }
  0x43   : > { %v198_v0 = vld [vmem:[%s3647_s19 + $0x10] sm:$0xff]  ;;  %v196_v1 = vld [vmem:[%s3647_s19] sm:$0xff]  ;;  %v199_v2 = vld [vmem:[%s3647_s19 + $0x18] sm:$0xff]  ;;  %s3929_s5 = sld [smem:[#allocation2 + $0x1c]]  ;;  %s3931_s6 = sld [smem:[#allocation2 + $0x37]] }
  0x44   : > { %v3129_v3 = vmul.f32 -1.442695, %v198_v0  ;;  %v3127_v4 = vmul.f32 -1.442695, %v196_v1  ;;  %v3130_v5 = vmul.f32 -1.442695, %v199_v2 }
  0x45   : > { %v197_v6 = vld [vmem:[%s3647_s19 + $0x8] sm:$0xff]  ;;  %v200_v8 = vld [vmem:[%s3647_s19 + $0x20] sm:$0xff]  ;;  %v203_v12 = vld [vmem:[%s3647_s19 + $0x38] sm:$0xff]  ;;  %s3963_s7 = sld [smem:[#allocation2 + $0x6]]  ;;  %s3977_s8 = sld [smem:[#allocation2 + $0x21]] }
  0x46   : > { %v201_v7 = vld [vmem:[%s3647_s19 + $0x28] sm:$0xff]  ;;  %3322 = vpow2.f32 %v3129_v3  ;;  %v3128_v9 = vmul.f32 -1.442695, %v197_v6  ;;  %v3131_v11 = vmul.f32 -1.442695, %v200_v8  ;;  %v202_v13 = vld [vmem:[%s3647_s19 + $0x30] sm:$0xff] }
  0x47   : > { %v3132_v10 = vmul.f32 -1.442695, %v201_v7  ;;  %3324 = vpow2.f32 %v3127_v4  ;;  %v3134_v14 = vmul.f32 -1.442695, %v203_v12  ;;  %v3133_v15 = vmul.f32 -1.442695, %v202_v13 }
  0x48   : > { %3326 = vpow2.f32 %v3130_v5  ;;  %v204_v32 = vld [vmem:[%s3647_s19 + $0x40] sm:$0x3]  ;;  %v206_v33 = vld [vmem:[%s3647_s19 + $0x50] sm:$0xff]  ;;  %v205_v34 = vld [vmem:[%s3647_s19 + $0x48] sm:$0xff]  ;;  %s3979_s9 = sld [smem:[#allocation2 + $0x3c]]  ;;  %s4234_s10 = sld [smem:[#allocation2 + $0x2]] }
  0x49   : > { %3328 = vpow2.f32 %v3128_v9  ;;  %v3135_v35 = vmul.f32 -1.442695, %v204_v32  ;;  %v3137_v36 = vmul.f32 -1.442695, %v206_v33  ;;  %v3136_v38 = vmul.f32 -1.442695, %v205_v34 }
  0x4a   : > { %3330 = vpow2.f32 %v3132_v10  ;;  %v208_v39 = vld [vmem:[%s3647_s19 + $0x60] sm:$0xff]  ;;  %v207_v43 = vld [vmem:[%s3647_s19 + $0x58] sm:$0xff]  ;;  %v210_v3 = vld [vmem:[%s3647_s19 + $0x70] sm:$0xff]  ;;  %s4248_s11 = sld [smem:[#allocation2 + $0x1d]]  ;;  %s4252_s17 = sld [smem:[#allocation2 + $0x38]] }
  0x4b   : > { %3332 = vpow2.f32 %v3131_v11  ;;  %v3139_v47 = vmul.f32 -1.442695, %v208_v39  ;;  %v3138_v53 = vmul.f32 -1.442695, %v207_v43  ;;  %v209_v5 = vld [vmem:[%s3647_s19 + $0x68] sm:$0xff]  ;;  %v212_v6 = vld [vmem:[%s3647_s19 + $0x80] sm:$0xff] }
  0x4c   : > { %3334 = vpow2.f32 %v3134_v14  ;;  %v211_v8 = vld [vmem:[%s3647_s19 + $0x78] sm:$0xff]  ;;  %v213_v9 = vld [vmem:[%s3647_s19 + $0x88] sm:$0x3]  ;;  %v3141_v11 = vmul.f32 -1.442695, %v210_v3  ;;  %p7742_p12 = scmp.ne.s32.totalorder %s7390_s22, 0 }
  0x4d   : > { %3336 = vpow2.f32 %v3133_v15  ;;  %v3140_v14 = vmul.f32 -1.442695, %v209_v5  ;;  %v3740_v15 = vmul.f32 -1.442695, %v212_v6 }
  0x50   : > { %v3323_v16 = vpop.eup %3322 }
  0x51   : > { %v3325_v17 = vpop.eup %3324  ;;  %v306_v18 = vadd.f32 1.0, %v3323_v16  ;;  %v3744_v16 = vmul.f32 -1.442695, %v211_v8 }
  0x52   : > { %v3327_v19 = vpop.eup %3326  ;;  %v304_v20 = vadd.f32 1.0, %v3325_v17  ;;  %v3746_v17 = vstv %s385_s24  ;;  %s4262_s24 = sld [smem:[#allocation2 + $0x4]] }
  0x53   : > { %v3329_v21 = vpop.eup %3328  ;;  %3338 = vrcp.f32 %v306_v18  ;;  %v307_v22 = vadd.f32 1.0, %v3327_v19  ;;  %v3748_v18 = vstv %s3154_s25  ;;  %v3750_v19 = vmul.f32 -1.442695, %v213_v9  ;;  %s4264_s25 = sld [smem:[#allocation2 + $0x1f]] }
  0x54   : > { %v3331_v23 = vpop.eup %3330  ;;  %3340 = vrcp.f32 %v304_v20  ;;  %v305_v24 = vadd.f32 1.0, %v3329_v21 }
  0x55   : > { %v3333_v25 = vpop.eup %3332  ;;  %3342 = vrcp.f32 %v307_v22  ;;  %v309_v26 = vadd.f32 1.0, %v3331_v23  ;;  %v3755_v23 = vstv %s3721_s26  ;;  %s4303_s26 = sld [smem:[#allocation2 + $0x3a]] }
  0x56   : > { %v3335_v27 = vpop.eup %3334  ;;  %3344 = vrcp.f32 %v305_v24  ;;  %v308_v28 = vadd.f32 1.0, %v3333_v25  ;;  %v3760_v25 = vstv %s3723_s27  ;;  %s4346_s27 = sld [smem:[#allocation2 + $0x5]] }
  0x57   : > { %v3337_v29 = vpop.eup %3336  ;;  %3346 = vrcp.f32 %v309_v26  ;;  %v311_v30 = vadd.f32 1.0, %v3335_v27  ;;  %v3763_v26 = vstv %s3725_s28  ;;  %s4360_s28 = sld [smem:[#allocation2 + $0x20]] }
  0x58   : > { %3348 = vrcp.f32 %v308_v28  ;;  %v310_v31 = vadd.f32 1.0, %v3337_v29  ;;  %v3776_v29 = vstv %s3730_s29  ;;  %s4362_s29 = sld [smem:[#allocation2 + $0x3b]] }
  0x59   : > { %3350 = vrcp.f32 %v311_v30 }
  0x5a   : > { %3352 = vrcp.f32 %v310_v31 }
  0x5b   : > { %3354 = vpow2.f32 %v3135_v35 }
  0x5c   : > { %3356 = vpow2.f32 %v3137_v36 }
  0x5d   : > { %v3660_v37 = vpop.eup %3338  ;;  %3358 = vpow2.f32 %v3136_v38 }
  0x5e   : > { %v3663_v40 = vpop.eup %3340  ;;  %443 = vrot.lane.b32.xlu1 %v3660_v37, %s3534_s20  ;;  %v1076_v42 = vrot.slane %v3660_v37, 2  ;;  %3360 = vpow2.f32 %v3139_v47  ;;  %v751_v22 = vrot.slane %v3660_v37, 1  ;;  %v3769_v27 = vmul.f32 %v3660_v37, %v3760_v25 }
  0x5f   : > { %v3667_v41 = vpop.eup %3342  ;;  %439 = vrot.lane.b32.xlu0 %v3663_v40, %s3534_s20  ;;  %v1073_v45 = vrot.slane %v3663_v40, 2  ;;  %3362 = vpow2.f32 %v3138_v53  ;;  %v3773_v28 = vmul.f32 %v3660_v37, %v3763_v26  ;;  %v748_v30 = vrot.slane %v3663_v40, 1 }
  0x60   : > { %v3673_v44 = vpop.eup %3344  ;;  %v1078_v46 = vrot.slane %v3667_v41, 2  ;;  %v3785_v32 = vmul.f32 %v3660_v37, %v3776_v29  ;;  %v753_v34 = vrot.slane %v3667_v41, 1  ;;  %v603_v36 = vrot.slane %v3769_v27, 1 }
  0x61   : > { %v3677_v48 = vpop.eup %3346  ;;  %v1074_v49 = vrot.slane %v3673_v44, 2  ;;  %v749_v21 = vrot.slane %v3673_v44, 1  ;;  %v656_v38 = vrot.slane %v3773_v28, 1  ;;  %v582_v39 = vmul.f32 %v3673_v44, %v3760_v25 }
  0x62   : > { %v3680_v50 = vpop.eup %3348  ;;  %445 = vrot.lane.b32.xlu1 %v3667_v41, %s3534_s20  ;;  %v3685_v51 = vsel %vm933_vm0, %v1076_v42, %v1078_v46  ;;  %v1082_v52 = vrot.slane %v3677_v48, 2  ;;  %v757_v35 = vrot.slane %v3677_v48, 1  ;;  %v709_v43 = vrot.slane %v3785_v32, 1 }
  0x63   : > { %v3688_v54 = vpop.eup %3350  ;;  %441 = vrot.lane.b32.xlu0 %v3673_v44, %s3534_s20  ;;  %v3693_v55 = vsel %vm933_vm0, %v1074_v49, %v1076_v42  ;;  %v3698_v57 = vsel %vm933_vm0, %v1073_v45, %v1074_v49  ;;  %v1080_v58 = vrot.slane %v3680_v50, 2  ;;  %v3790_v33 = vsel %vm599_vm1, %v749_v21, %v751_v22 }
  0x64   : > { %v3695_v56 = vpop.eup %3352  ;;  %v7277_v59 = vrot.slane %v3688_v54, 2  ;;  %v636_v42 = vmul.f32 %v3673_v44, %v3763_v26  ;;  %v689_v45 = vmul.f32 %v3673_v44, %v3776_v29  ;;  %v635_v47 = vmul.f32 %v3663_v40, %v3763_v26 }
  0x65   : > { %v1084_v60 = vrot.slane %v3695_v56, 2  ;;  %v3706_v61 = vsel %vm933_vm0, %v1078_v46, %v1080_v58  ;;  %v3709_v62 = vsel %vm933_vm0, %v1080_v58, %v1082_v52  ;;  %v3355_v1 = vpop.eup %3354  ;;  %v581_v46 = vmul.f32 %v3663_v40, %v3760_v25 }
  0x66   : > { %449 = vrot.lane.b32.xlu1 %v3677_v48, %s3534_s20  ;;  %v3357_v2 = vpop.eup %3356  ;;  %v312_v7 = vadd.f32 1.0, %v3355_v1  ;;  %v755_v49 = vrot.slane %v3680_v50, 1  ;;  %v654_v53 = vrot.slane %v636_v42, 1  ;;  %v688_v58 = vmul.f32 %v3663_v40, %v3776_v29 }
  0x67   : > { %447 = vrot.lane.b32.xlu0 %v3680_v50, %s3534_s20  ;;  %v3714_v63 = vsel %vm933_vm0, %v1082_v52, %v1084_v60  ;;  %v3719_v0 = vsel %vm933_vm0, %v1084_v60, %v7277_v59  ;;  %v3359_v4 = vpop.eup %3358  ;;  %v314_v10 = vadd.f32 1.0, %v3357_v2  ;;  %v601_v52 = vrot.slane %v582_v39, 1 }
  0x68   : > { %v3361_v12 = vpop.eup %3360  ;;  %v313_v13 = vadd.f32 1.0, %v3359_v4  ;;  %3364 = vrcp.f32 %v312_v7  ;;  %v707_v60 = vrot.slane %v689_v45, 1  ;;  %v600_v1 = vrot.slane %v581_v46, 1 }
  0x69   : > { %v3363_v20 = vpop.eup %3362  ;;  %3366 = vrcp.f32 %v314_v10  ;;  %v3757_v24 = vadd.f32 1.0, %v3361_v12  ;;  %v653_v2 = vrot.slane %v635_v47, 1  ;;  %v584_v3 = vmul.f32 %v3667_v41, %v3760_v25 }
  0x6a   : > { %453 = vrot.lane.b32.xlu1 %v3688_v54, %s3534_s20  ;;  %3368 = vrcp.f32 %v313_v13  ;;  %v3781_v31 = vadd.f32 1.0, %v3363_v20  ;;  %v3817_v4 = vsel %vm599_vm1, %v748_v30, %v749_v21  ;;  %v3820_v5 = vsel %vm599_vm1, %v601_v52, %v603_v36 }
  0x6b   : > { %451 = vrot.lane.b32.xlu0 %v3695_v56, %s3534_s20  ;;  %3370 = vpow2.f32 %v3141_v11  ;;  %7399 = vst [vmem:[#allocation11_spill] sm:$0xff] %v3820_v5  ;;  %v3823_v6 = vsel %vm599_vm1, %v654_v53, %v656_v38  ;;  %v706_v7 = vrot.slane %v688_v58, 1  ;;  %v3830_v9 = vsel %vm599_vm1, %v707_v60, %v709_v43 }
  0x6c   : > { %3372 = vpow2.f32 %v3140_v14  ;;  %7400 = vst [vmem:[#allocation12_spill] sm:$0xff] %v3823_v6  ;;  %7401 = vst [vmem:[#allocation13_spill] sm:$0xff] %v3830_v9  ;;  %v3833_v10 = vsel %vm599_vm1, %v600_v1, %v601_v52  ;;  %v3836_v11 = vsel %vm599_vm1, %v653_v2, %v654_v53  ;;  %v585_v12 = vmul.f32 %v3680_v50, %v3760_v25 }
  0x6d   : > { %7402 = vst [vmem:[#allocation14_spill] sm:$0xff] %v3833_v10  ;;  %7403 = vst [vmem:[#allocation15_spill] sm:$0xff] %v3836_v11  ;;  %v3845_v14 = vsel %vm599_vm1, %v753_v34, %v755_v49  ;;  %v3850_v27 = vsel %vm599_vm1, %v706_v7, %v707_v60  ;;  %v605_v30 = vrot.slane %v584_v3, 1  ;;  %v638_v39 = vmul.f32 %v3667_v41, %v3763_v26 }
  0x6e   : > { %511 = vrot.lane.b32.xlu1 %v3673_v44, %s3535_s30  ;;  %7405 = vst [vmem:[#allocation17_spill] sm:$0xff] %v3850_v27  ;;  %v607_v32 = vrot.slane %v585_v12, 1  ;;  %v639_v42 = vmul.f32 %v3680_v50, %v3763_v26  ;;  %v691_v47 = vmul.f32 %v3667_v41, %v3776_v29  ;;  %v692_v52 = vmul.f32 %v3680_v50, %v3776_v29 }
  0x6f   : > { %509 = vrot.lane.b32.xlu0 %v3663_v40, %s3535_s30  ;;  %v586_v53 = vmul.f32 %v3677_v48, %v3760_v25  ;;  %v658_v1 = vrot.slane %v638_v39, 1  ;;  %v3875_v3 = vsel %vm599_vm1, %v603_v36, %v605_v30  ;;  %v587_v59 = vmul.f32 %v3695_v56, %v3760_v25 }
  0x70   : > { %v3872_v60 = vsel %vm599_vm1, %v605_v30, %v607_v32  ;;  %v660_v2 = vrot.slane %v639_v42, 1  ;;  %7408 = vst [vmem:[#allocation20_spill] sm:$0xff] %v3875_v3  ;;  %v711_v7 = vrot.slane %v691_v47, 1  ;;  %v713_v12 = vrot.slane %v692_v52, 1 }
  0x71   : > { %7407 = vst [vmem:[#allocation19_spill] sm:$0xff] %v3872_v60  ;;  %v609_v21 = vrot.slane %v586_v53, 1  ;;  %v3884_v20 = vsel %vm599_vm1, %v751_v22, %v753_v34  ;;  %v3890_v36 = vsel %vm599_vm1, %v656_v38, %v658_v1  ;;  %v640_v30 = vmul.f32 %v3677_v48, %v3763_v26 }
  0x72   : > { %515 = vrot.lane.b32.xlu1 %v3667_v41, %s3535_s30  ;;  %v3825_v8 = vpop.eup %3364  ;;  %v3887_v39 = vsel %vm599_vm1, %v658_v1, %v660_v2  ;;  %7410 = vst [vmem:[#allocation22_spill] sm:$0xff] %v3890_v36  ;;  %v3897_v42 = vsel %vm599_vm1, %v755_v49, %v757_v35  ;;  %v3900_v47 = vsel %vm599_vm1, %v711_v7, %v713_v12  ;;  %v611_v34 = vrot.slane %v587_v59, 1 }
  0x73   : > { %513 = vrot.lane.b32.xlu0 %v3660_v37, %s3535_s30  ;;  %v3840_v13 = vpop.eup %3366  ;;  %v763_v46 = vrot.slane %v3825_v8, 1  ;;  %7409 = vst [vmem:[#allocation21_spill] sm:$0xff] %v3887_v39  ;;  %7411 = vst [vmem:[#allocation23_spill] sm:$0xff] %v3900_v47  ;;  %v3903_v22 = vsel %vm599_vm1, %v709_v43, %v711_v7  ;;  %v641_v38 = vmul.f32 %v3695_v56, %v3763_v26  ;;  %v662_v52 = vrot.slane %v640_v30, 1 }
  0x74   : > { %7404 = vst [vmem:[#allocation16_spill] sm:$0xff] %v3840_v13  ;;  %v3852_v28 = vpop.eup %3368  ;;  %7412 = vst [vmem:[#allocation24_spill] sm:$0xff] %v3903_v22  ;;  %v693_v49 = vmul.f32 %v3677_v48, %v3776_v29  ;;  %v694_v53 = vmul.f32 %v3695_v56, %v3776_v29  ;;  %v7413_v59 = vrot.slane %v3695_v56, 1  ;;  %v7414_v1 = vrot.slane %v3688_v54, 1 }
  0x75   : > { %7406 = vst [vmem:[#allocation18_spill] sm:$0xff] %v3852_v28  ;;  %v3858_v45 = vpop.eup %3370  ;;  %v3934_v30 = vsel %vm599_vm1, %v609_v21, %v611_v34  ;;  %v3937_v22 = vsel %vm599_vm1, %v607_v32, %v609_v21  ;;  %v664_v36 = vrot.slane %v641_v38, 1  ;;  %3374 = vpow2.f32 %v3740_v15 }
  0x76   : > { %519 = vrot.lane.b32.xlu1 %v3677_v48, %s3535_s30  ;;  %v3867_v58 = vpop.eup %3372  ;;  %v3922_v43 = vsel %vm599_vm1, %v757_v35, %v7413_v59  ;;  %v3927_v7 = vsel %vm599_vm1, %v7414_v1, %v763_v46  ;;  %7415 = vst [vmem:[#allocation25_spill] sm:$0xff] %v3934_v30  ;;  %7416 = vst [vmem:[#allocation26_spill] sm:$0xff] %v3937_v22  ;;  %v715_v3 = vrot.slane %v693_v49, 1  ;;  %v717_v47 = vrot.slane %v694_v53, 1 }
  0x77   : > { %517 = vrot.lane.b32.xlu0 %v3680_v50, %s3535_s30  ;;  %v3940_v35 = vsel %vm599_vm1, %v660_v2, %v662_v52  ;;  %v588_v46 = vmul.f32 %v3688_v54, %v3760_v25  ;;  %v589_v59 = vmul.f32 %v3825_v8, %v3760_v25  ;;  %v642_v1 = vmul.f32 %v3688_v54, %v3763_v26 }
  0x78   : > { %7417 = vst [vmem:[#allocation27_spill] sm:$0xff] %v3940_v35  ;;  %v643_v30 = vmul.f32 %v3825_v8, %v3763_v26  ;;  %v3953_v21 = vsel %vm599_vm1, %v662_v52, %v664_v36  ;;  %v3956_v32 = vsel %vm599_vm1, %v715_v3, %v717_v47  ;;  %v3959_v2 = vsel %vm599_vm1, %v713_v12, %v715_v3 }
  0x79   : > { %7418 = vst [vmem:[#allocation28_spill] sm:$0xff] %v3953_v21  ;;  %7419 = vst [vmem:[#allocation29_spill] sm:$0xff] %v3956_v32  ;;  %v695_v25 = vmul.f32 %v3688_v54, %v3776_v29  ;;  %v613_v26 = vrot.slane %v588_v46, 1  ;;  %v615_v38 = vrot.slane %v589_v59, 1  ;;  %v666_v49 = vrot.slane %v642_v1, 1 }
  0x7a   : > { %523 = vrot.lane.b32.xlu1 %v3688_v54, %s3535_s30  ;;  %7420 = vst [vmem:[#allocation30_spill] sm:$0xff] %v3959_v2  ;;  %v668_v52 = vrot.slane %v643_v30, 1  ;;  %v7421_v53 = vrot.slane %v3688_v54, 1  ;;  %v7422_v35 = vrot.slane %v3695_v56, 1  ;;  %v1088_v12 = vrot.slane %v3825_v8, 2 }
  0x7b   : > { %521 = vrot.lane.b32.xlu0 %v3695_v56, %s3535_s30  ;;  %v696_v2 = vmul.f32 %v3825_v8, %v3776_v29  ;;  %v719_v22 = vrot.slane %v695_v25, 1  ;;  %v3982_v30 = vsel %vm599_vm1, %v613_v26, %v615_v38  ;;  %v3991_v59 = vsel %vm599_vm1, %v664_v36, %v666_v49 }
  0x7c   : > { %v3972_v3 = vsel %vm599_vm1, %v7422_v35, %v7421_v53  ;;  %7423 = vst [vmem:[#allocation31_spill] sm:$0xff] %v3982_v30  ;;  %v3985_v46 = vsel %vm599_vm1, %v666_v49, %v668_v52  ;;  %v3988_v35 = vsel %vm599_vm1, %v611_v34, %v613_v26  ;;  %7426 = vst [vmem:[#allocation34_spill] sm:$0xff] %v3991_v59  ;;  %v3997_v29 = vstv %s3907_s4  ;;  %s4382_s4 = sld [smem:[#allocation2 + $0x7]] }
  0x7d   : > { %7424 = vst [vmem:[#allocation32_spill] sm:$0xff] %v3985_v46  ;;  %7425 = vst [vmem:[#allocation33_spill] sm:$0xff] %v3988_v35  ;;  %v721_v1 = vrot.slane %v696_v2, 1  ;;  %v4000_v25 = vsel %vm599_vm1, %v717_v47, %v719_v22  ;;  %3376 = vrcp.f32 %v3757_v24  ;;  %v4006_v34 = vstv %s3929_s5  ;;  %s4393_s5 = sld [smem:[#allocation2 + $0x22]] }
  0x7e   : > { %775 = vrot.lane.b32.xlu1 %v3790_v33, %s3534_s20  ;;  %7427 = vst [vmem:[#allocation35_spill] sm:$0xff] %v4000_v25  ;;  %v4009_v36 = vstv %s3931_s6  ;;  %v4013_v26 = vmul.f32 %v3660_v37, %v3746_v17  ;;  %3378 = vrcp.f32 %v3781_v31  ;;  %v4018_v15 = vmul.f32 %v3660_v37, %v3748_v18  ;;  %s4395_s6 = sld [smem:[#allocation2 + $0x9]] }
  0x7f   : > { %773 = vrot.lane.b32.xlu0 %v3817_v4, %s3534_s20  ;;  %v4022_v47 = vmul.f32 %v3660_v37, %v3755_v23  ;;  %v4025_v24 = vsel %vm599_vm1, %v719_v22, %v721_v1  ;;  %v7429_v2 = vrot.slane %v3688_v54, 2  ;;  %3380 = vpow2.f32 %v3744_v16 }
  0x80   : > { %7428 = vst [vmem:[#allocation36_spill] sm:$0xff] %v4025_v24  ;;  %v4035_v31 = vmul.f32 %v3663_v40, %v3746_v17  ;;  %v4039_v49 = vmul.f32 %v3663_v40, %v3748_v18  ;;  %v4045_v22 = vmul.f32 %v3663_v40, %v3755_v23  ;;  %v4049_v52 = vmul.f32 %v3667_v41, %v3746_v17 }
  0x81   : > { %v4030_v38 = vsel %vm933_vm0, %v7429_v2, %v1088_v12  ;;  %v4053_v16 = vmul.f32 %v3667_v41, %v3748_v18  ;;  %v4056_v53 = vstv %s3963_s7  ;;  %v318_v12 = vadd.f32 1.0, %v3858_v45  ;;  %s4404_s7 = sld [smem:[#allocation2 + $0x24]] }
  0x82   : > { %779 = vrot.lane.b32.xlu1 %v3845_v14, %s3534_s20  ;;  %v4067_v1 = vmul.f32 %v3673_v44, %v3746_v17  ;;  %v916_v2 = vmul.f32 %v3673_v44, %v4056_v53  ;;  %3382 = vpow2.f32 %v3750_v19  ;;  %v917_v25 = vmul.f32 %v3660_v37, %v4056_v53 }
  0x83   : > { %777 = vrot.lane.b32.xlu0 %v3884_v20, %s3534_s20  ;;  %v4075_v59 = vstv %s3977_s8  ;;  %v915_v32 = vmul.f32 %v3663_v40, %v4056_v53  ;;  %3384 = vrcp.f32 %v318_v12  ;;  %s4406_s8 = sld [smem:[#allocation2 + $0x3f]] }
  0x84   : > { %v935_v45 = vrot.slane %v916_v2, 2  ;;  %v970_v35 = vmul.f32 %v3673_v44, %v4075_v59  ;;  %v971_v24 = vmul.f32 %v3660_v37, %v4075_v59  ;;  %v937_v19 = vrot.slane %v917_v25, 2 }
  0x85   : > { %v969_v2 = vmul.f32 %v3663_v40, %v4075_v59  ;;  %v934_v11 = vrot.slane %v915_v32, 2  ;;  %v317_v32 = vadd.f32 1.0, %v3867_v58  ;;  %v972_v58 = vmul.f32 %v3667_v41, %v4075_v59 }
  0x86   : > { %783 = vrot.lane.b32.xlu1 %v3922_v43, %s3534_s20  ;;  %v988_v21 = vrot.slane %v970_v35, 2  ;;  %v990_v39 = vrot.slane %v971_v24, 2  ;;  %v4099_v25 = vsel %vm933_vm0, %v935_v45, %v937_v19 }
  0x87   : > { %781 = vrot.lane.b32.xlu0 %v3897_v42, %s3534_s20  ;;  %7430 = vst [vmem:[#allocation37_spill] sm:$0xff] %v4099_v25  ;;  %v987_v10 = vrot.slane %v969_v2, 2  ;;  %v4119_v35 = vsel %vm933_vm0, %v934_v11, %v935_v45  ;;  %v973_v11 = vmul.f32 %v3680_v50, %v4075_v59  ;;  %3386 = vrcp.f32 %v317_v32  ;;  %v217_v32 = vld [vmem:[%s3647_s19 + $0xa8] sm:$0xff] }
  0x88   : > { %v4104_v6 = vsel %vm933_vm0, %v988_v21, %v990_v39  ;;  %7435 = vst [vmem:[#allocation42_spill] sm:$0xff] %v4119_v35 }
  0x89   : > { %7432 = vst [vmem:[#allocation39_spill] sm:$0xff] %v4104_v6  ;;  %v4124_v2 = vsel %vm933_vm0, %v987_v10, %v988_v21 }
  0x8a   : > { %787 = vrot.lane.b32.xlu1 %v3927_v7, %s3534_s20  ;;  %7436 = vst [vmem:[#allocation43_spill] sm:$0xff] %v4124_v2  ;;  %v974_v2 = vmul.f32 %v3677_v48, %v4075_v59 }
  0x8b   : > { %785 = vrot.lane.b32.xlu0 %v3972_v3, %s3534_s20 }
  0x8e   : > { %845 = vrot.lane.b32.xlu1 %v3790_v33, %s3535_s30  ;;  %v4063_v33 = vmul.f32 %v3667_v41, %v3755_v23 }
  0x8f   : > { %843 = vrot.lane.b32.xlu0 %v3817_v4, %s3535_s30  ;;  %v4078_v4 = vstv %s3979_s9  ;;  %s4415_s9 = sld [smem:[#allocation2 + $0x3d]] }
  0x90   : > { %v1023_v46 = vmul.f32 %v3673_v44, %v4078_v4  ;;  %v1024_v30 = vmul.f32 %v3660_v37, %v4078_v4  ;;  %v1022_v27 = vmul.f32 %v3663_v40, %v4078_v4  ;;  %v1025_v45 = vmul.f32 %v3667_v41, %v4078_v4 }
  0x92   : > { %849 = vrot.lane.b32.xlu1 %v3845_v14, %s3535_s30  ;;  %v1041_v60 = vrot.slane %v1023_v46, 2  ;;  %v3375_v14 = vpop.eup %3374  ;;  %v1043_v37 = vrot.slane %v1024_v30, 2  ;;  %v1040_v5 = vrot.slane %v1022_v27, 2  ;;  %v919_v46 = vmul.f32 %v3680_v50, %v4056_v53 }
  0x93   : > { %847 = vrot.lane.b32.xlu0 %v3884_v20, %s3535_s30  ;;  %v4101_v9 = vpop.eup %3376  ;;  %v918_v20 = vmul.f32 %v3667_v41, %v4056_v53  ;;  %v320_v24 = vadd.f32 1.0, %v3375_v14  ;;  %v992_v41 = vrot.slane %v972_v58, 2 }
  0x94   : > { %7431 = vst [vmem:[#allocation38_spill] sm:$0xff] %v4101_v9  ;;  %v4110_v40 = vpop.eup %3378  ;;  %v4116_v30 = vsel %vm933_vm0, %v1041_v60, %v1043_v37  ;;  %v4127_v6 = vsel %vm933_vm0, %v1040_v5, %v1041_v60  ;;  %v941_v12 = vrot.slane %v919_v46, 2  ;;  %v920_v5 = vmul.f32 %v3677_v48, %v4056_v53 }
  0x95   : > { %7433 = vst [vmem:[#allocation40_spill] sm:$0xff] %v4110_v40  ;;  %7434 = vst [vmem:[#allocation41_spill] sm:$0xff] %v4116_v30  ;;  %v3381_v27 = vpop.eup %3380  ;;  %v4144_v60 = vmul.f32 %v3695_v56, %v4056_v53  ;;  %v1045_v46 = vrot.slane %v1025_v45, 2  ;;  %v996_v45 = vrot.slane %v974_v2, 2  ;;  %3388 = vrcp.f32 %v320_v24 }
  0x96   : > { %853 = vrot.lane.b32.xlu1 %v3922_v43, %s3535_s30  ;;  %7437 = vst [vmem:[#allocation44_spill] sm:$0xff] %v4127_v6  ;;  %v939_v43 = vrot.slane %v918_v20, 2  ;;  %v3383_v21 = vpop.eup %3382  ;;  %v994_v20 = vrot.slane %v973_v11, 2  ;;  %v1927_v30 = vrot.slane %v4110_v40, 2 }
  0x97   : > { %851 = vrot.lane.b32.xlu0 %v3897_v42, %s3535_s30  ;;  %v1026_v42 = vmul.f32 %v3680_v50, %v4078_v4  ;;  %v7278_v6 = vrot.slane %v4144_v60, 2  ;;  %v321_v2 = vadd.f32 1.0, %v3383_v21  ;;  %v923_v21 = vmul.f32 %v3825_v8, %v4056_v53 }
  0x98   : > { %v4138_v10 = vsel %vm933_vm0, %v937_v19, %v939_v43  ;;  %v4149_v14 = vsel %vm933_vm0, %v939_v43, %v941_v12  ;;  %v4157_v35 = vsel %vm933_vm0, %v992_v41, %v994_v20  ;;  %v4163_v43 = vsel %vm933_vm0, %v1043_v37, %v1045_v46 }
  0x99   : > { %7438 = vst [vmem:[#allocation45_spill] sm:$0xff] %v4138_v10  ;;  %7439 = vst [vmem:[#allocation46_spill] sm:$0xff] %v4149_v14  ;;  %v1047_v19 = vrot.slane %v1026_v42, 2  ;;  %v943_v10 = vrot.slane %v920_v5, 2  ;;  %v319_v37 = vadd.f32 1.0, %v3381_v27  ;;  %v4184_v5 = vmul.f32 %v3695_v56, %v4078_v4  ;;  %v214_v27 = vld [vmem:[%s3647_s19 + $0x90] sm:$0xff] }
  0x9a   : > { %857 = vrot.lane.b32.xlu1 %v3927_v7, %s3535_s30  ;;  %7440 = vst [vmem:[#allocation47_spill] sm:$0xff] %v4157_v35  ;;  %v4160_v7 = vsel %vm933_vm0, %v990_v39, %v992_v41  ;;  %7442 = vst [vmem:[#allocation49_spill] sm:$0xff] %v4163_v43  ;;  %v1027_v39 = vmul.f32 %v3677_v48, %v4078_v4  ;;  %v4198_v43 = vpop.eup %3384  ;;  %v3145_v24 = vmul.f32 -1.442695, %v214_v27  ;;  %v4375_v35 = vstv %s4264_s25  ;;  %s4479_s25 = sld [smem:[#allocation2 + $0x40]] }
  0x9b   : > { %855 = vrot.lane.b32.xlu0 %v3972_v3, %s3535_s30  ;;  %7441 = vst [vmem:[#allocation48_spill] sm:$0xff] %v4160_v7  ;;  %v4167_v3 = vmul.f32 %v3695_v56, %v4075_v59  ;;  %v4170_v58 = vsel %vm933_vm0, %v1045_v46, %v1047_v19  ;;  %v4175_v11 = vsel %vm933_vm0, %v943_v10, %v7278_v6  ;;  %v215_v46 = vld [vmem:[%s3647_s19 + $0x98] sm:$0xff]  ;;  %7447 = vst [vmem:[#allocation54_spill] sm:$0xff] %v4198_v43 }
  0x9c   : > { %7443 = vst [vmem:[#allocation50_spill] sm:$0xff] %v4170_v58  ;;  %7444 = vst [vmem:[#allocation51_spill] sm:$0xff] %v4175_v11  ;;  %v4187_v41 = vsel %vm933_vm0, %v941_v12, %v943_v10  ;;  %v1049_v6 = vrot.slane %v1027_v39, 2  ;;  %v4193_v11 = vsel %vm933_vm0, %v994_v20, %v996_v45  ;;  %v1051_v10 = vrot.slane %v4184_v5, 2  ;;  %v218_v5 = vld [vmem:[%s3647_s19 + $0xb0] sm:$0xff] }
  0x9d   : > { %v998_v42 = vrot.slane %v4167_v3, 2  ;;  %7445 = vst [vmem:[#allocation52_spill] sm:$0xff] %v4187_v41  ;;  %7446 = vst [vmem:[#allocation53_spill] sm:$0xff] %v4193_v11  ;;  %v922_v3 = vmul.f32 %v3688_v54, %v4056_v53  ;;  %v216_v41 = vld [vmem:[%s3647_s19 + $0xa0] sm:$0xff]  ;;  %v4209_v20 = vmul.f32 %v3673_v44, %v3748_v18  ;;  %v3146_v11 = vmul.f32 -1.442695, %v215_v46 }
  0x9e   : > { %1100 = vrot.lane.b32.xlu1 %v3693_v55, %s3534_s20  ;;  %v4212_v39 = vsel %vm933_vm0, %v1047_v19, %v1049_v6  ;;  %3390 = vrcp.f32 %v319_v37  ;;  %v4222_v53 = vsel %vm933_vm0, %v1049_v6, %v1051_v10  ;;  %v3147_v19 = vmul.f32 -1.442695, %v216_v41  ;;  %v219_v46 = vld [vmem:[%s3647_s19 + $0xb8] sm:$0xff]  ;;  %7466 = vst [vmem:[#allocation72_spill] sm:$0xff] %v4375_v35 }
  0x9f   : > { %1098 = vrot.lane.b32.xlu0 %v3698_v57, %s3534_s20  ;;  %v4201_v12 = vsel %vm933_vm0, %v996_v45, %v998_v42  ;;  %7449 = vst [vmem:[#allocation56_spill] sm:$0xff] %v4212_v39  ;;  %v4219_v45 = vmul.f32 %v3673_v44, %v3755_v23  ;;  %7450 = vst [vmem:[#allocation57_spill] sm:$0xff] %v4222_v53  ;;  %3392 = vrcp.f32 %v321_v2  ;;  %v947_v39 = vrot.slane %v922_v3, 2  ;;  %v220_v53 = vld [vmem:[%s3647_s19 + $0xc0] sm:$0xff] }
  0xa0   : > { %7448 = vst [vmem:[#allocation55_spill] sm:$0xff] %v4201_v12  ;;  %v949_v12 = vrot.slane %v923_v21, 2  ;;  %v3148_v7 = vmul.f32 -1.442695, %v217_v32  ;;  %v976_v37 = vmul.f32 %v3688_v54, %v4075_v59  ;;  %v977_v44 = vmul.f32 %v3825_v8, %v4075_v59 }
  0xa1   : > { %v1029_v6 = vmul.f32 %v3688_v54, %v4078_v4  ;;  %3394 = vpow2.f32 %v3146_v11  ;;  %v3149_v27 = vmul.f32 -1.442695, %v218_v5  ;;  %v1030_v2 = vmul.f32 %v3825_v8, %v4078_v4 }
  0xa2   : > { %1104 = vrot.lane.b32.xlu1 %v3706_v61, %s3534_s20  ;;  %v4238_v41 = vsel %vm933_vm0, %v947_v39, %v949_v12  ;;  %v4246_v59 = vmul.f32 %v3677_v48, %v3746_v17  ;;  %3396 = vpow2.f32 %v3145_v24  ;;  %v3150_v11 = vmul.f32 -1.442695, %v219_v46  ;;  %v221_v46 = vld [vmem:[%s3647_s19 + $0xc8] sm:$0xff] }
  0xa3   : > { %1102 = vrot.lane.b32.xlu0 %v3685_v51, %s3534_s20  ;;  %7451 = vst [vmem:[#allocation58_spill] sm:$0xff] %v4238_v41  ;;  %v1000_v3 = vrot.slane %v976_v37, 2  ;;  %3398 = vpow2.f32 %v3147_v19  ;;  %v1002_v8 = vrot.slane %v977_v44, 2  ;;  %v1053_v4 = vrot.slane %v1029_v6, 2 }
  0xa4   : > { %v1055_v12 = vrot.slane %v1030_v2, 2  ;;  %3400 = vpow2.f32 %v3148_v7  ;;  %v3151_v21 = vmul.f32 -1.442695, %v220_v53  ;;  %v7452_v32 = vrot.slane %v4144_v60, 2 }
  0xa5   : > { %v4260_v24 = vsel %vm933_vm0, %v998_v42, %v1000_v3  ;;  %3402 = vpow2.f32 %v3149_v27  ;;  %v4268_v19 = vsel %vm933_vm0, %v1000_v3, %v1002_v8  ;;  %v4274_v60 = vsel %vm933_vm0, %v1051_v10, %v1053_v4 }
  0xa6   : > { %1108 = vrot.lane.b32.xlu1 %v3714_v63, %s3534_s20  ;;  %v4257_v5 = vsel %vm933_vm0, %v7452_v32, %v947_v39  ;;  %7454 = vst [vmem:[#allocation60_spill] sm:$0xff] %v4260_v24  ;;  %7455 = vst [vmem:[#allocation61_spill] sm:$0xff] %v4268_v19  ;;  %v4271_v7 = vsel %vm933_vm0, %v1053_v4, %v1055_v12  ;;  %v4276_v39 = vpop.eup %3386  ;;  %v4282_v42 = vmul.f32 %v3677_v48, %v3748_v18 }
  0xa7   : > { %1106 = vrot.lane.b32.xlu0 %v3709_v62, %s3534_s20  ;;  %7453 = vst [vmem:[#allocation59_spill] sm:$0xff] %v4257_v5  ;;  %7456 = vst [vmem:[#allocation62_spill] sm:$0xff] %v4271_v7  ;;  %v4286_v53 = vmul.f32 %v3677_v48, %v3755_v23  ;;  %v4290_v37 = vmul.f32 %v3680_v50, %v3746_v17  ;;  %v4294_v10 = vmul.f32 %v3680_v50, %v3748_v18  ;;  %v4296_v44 = vpop.eup %3388 }
  0xa8   : > { %7457 = vst [vmem:[#allocation63_spill] sm:$0xff] %v4274_v60  ;;  %7458 = vst [vmem:[#allocation64_spill] sm:$0xff] %v4276_v39  ;;  %v1601_v6 = vrot.slane %v3840_v13, 1  ;;  %v1603_v27 = vrot.slane %v4110_v40, 1  ;;  %v1600_v48 = vrot.slane %v3852_v28, 1  ;;  %3404 = vpow2.f32 %v3150_v11  ;;  %v4305_v2 = vpop.eup %3390 }
  0xa9   : > { %7459 = vst [vmem:[#allocation65_spill] sm:$0xff] %v4296_v44  ;;  %7460 = vst [vmem:[#allocation66_spill] sm:$0xff] %v4305_v2  ;;  %v4309_v3 = vmul.f32 %v3680_v50, %v3755_v23  ;;  %v1605_v8 = vrot.slane %v4101_v9, 1  ;;  %v3152_v4 = vmul.f32 -1.442695, %v221_v46  ;;  %3406 = vpow2.f32 %v3151_v21  ;;  %v4312_v12 = vpop.eup %3392 }
  0xaa   : > { %1112 = vrot.lane.b32.xlu1 %v4030_v38, %s3534_s20  ;;  %7461 = vst [vmem:[#allocation67_spill] sm:$0xff] %v4312_v12  ;;  %v4316_v32 = vmul.f32 %v3688_v54, %v3746_v17  ;;  %v4320_v11 = vmul.f32 %v3688_v54, %v3748_v18  ;;  %v4324_v60 = vmul.f32 %v3688_v54, %v3755_v23  ;;  %v4341_v24 = vstv %s4234_s10  ;;  %s4417_s10 = sld [smem:[#allocation2 + $0x8]] }
  0xab   : > { %1110 = vrot.lane.b32.xlu0 %v3719_v0, %s3534_s20  ;;  %v4328_v50 = vmul.f32 %v3695_v56, %v3746_v17  ;;  %v4334_v21 = vmul.f32 %v3695_v56, %v3748_v18  ;;  %v4338_v46 = vmul.f32 %v3695_v56, %v3755_v23  ;;  %v4344_v5 = vstv %s4248_s11  ;;  %v3395_v54 = vpop.eup %3394  ;;  %s4425_s11 = sld [smem:[#allocation2 + $0x23]] }
  0xac   : > { %7462 = vst [vmem:[#allocation68_spill] sm:$0xff] %v4344_v5  ;;  %v4354_v17 = vsel %vm599_vm1, %v1600_v48, %v1601_v6  ;;  %v4357_v56 = vstv %s4252_s17  ;;  %v1607_v18 = vrot.slane %v4276_v39, 1  ;;  %v3397_v23 = vpop.eup %3396  ;;  %v4365_v7 = vsel %vm599_vm1, %v1603_v27, %v1605_v8  ;;  %s4427_s17 = sld [smem:[#allocation2 + $0x3e]] }
  0xad   : > { %7463 = vst [vmem:[#allocation69_spill] sm:$0xff] %v4357_v56  ;;  %7464 = vst [vmem:[#allocation70_spill] sm:$0xff] %v4365_v7  ;;  %v1611_v19 = vrot.slane %v4305_v2, 1  ;;  %3408 = vpow2.f32 %v3152_v4  ;;  %v1613_v48 = vrot.slane %v4296_v44, 1  ;;  %v1615_v41 = vrot.slane %v4312_v12, 1 }
  0xae   : > { %1170 = vrot.lane.b32.xlu1 %v3693_v55, %s3535_s30  ;;  %v4351_v55 = vsel %vm599_vm1, %v1601_v6, %v1603_v27  ;;  %v3399_v6 = vpop.eup %3398  ;;  %v4372_v58 = vstv %s4262_s24  ;;  %v1925_v27 = vrot.slane %v3840_v13, 2  ;;  %v1924_v4 = vrot.slane %v3852_v28, 2  ;;  %s4459_s24 = sld [smem:[#allocation2 + $0x25]] }
  0xaf   : > { %1168 = vrot.lane.b32.xlu0 %v3698_v57, %s3535_s30  ;;  %v1609_v57 = vrot.slane %v4198_v43, 1  ;;  %7465 = vst [vmem:[#allocation71_spill] sm:$0xff] %v4372_v58  ;;  %v3401_v14 = vpop.eup %3400  ;;  %v323_v25 = vadd.f32 1.0, %v3395_v54  ;;  %v4387_v58 = vsel %vm599_vm1, %v1605_v8, %v1607_v18  ;;  %v4390_v35 = vstv %s4303_s26  ;;  %s4534_s26 = sld [smem:[#allocation2 + $0xb]] }
  0xb0   : > { %v3403_v7 = vpop.eup %3402  ;;  %7467 = vst [vmem:[#allocation73_spill] sm:$0xff] %v4387_v58  ;;  %7468 = vst [vmem:[#allocation74_spill] sm:$0xff] %v4390_v35  ;;  %v322_v56 = vadd.f32 1.0, %v3397_v23  ;;  %v324_v8 = vadd.f32 1.0, %v3399_v6  ;;  %v4409_v23 = vsel %vm599_vm1, %v1613_v48, %v1615_v41  ;;  %v4412_v58 = vsel %vm599_vm1, %v1611_v19, %v1613_v48 }
  0xb1   : > { %v4398_v5 = vsel %vm599_vm1, %v1609_v57, %v1611_v19  ;;  %v4401_v54 = vsel %vm599_vm1, %v1607_v18, %v1609_v57  ;;  %7470 = vst [vmem:[#allocation76_spill] sm:$0xff] %v4409_v23  ;;  %7471 = vst [vmem:[#allocation77_spill] sm:$0xff] %v4412_v58  ;;  %v325_v18 = vadd.f32 1.0, %v3401_v14  ;;  %v4422_v6 = vstv %s4346_s27  ;;  %s4549_s27 = sld [smem:[#allocation2 + $0x26]] }
  0xb2   : > { %1174 = vrot.lane.b32.xlu1 %v3706_v61, %s3535_s30  ;;  %v1929_v61 = vrot.slane %v4101_v9, 2  ;;  %7469 = vst [vmem:[#allocation75_spill] sm:$0xff] %v4398_v5  ;;  %v3405_v35 = vpop.eup %3404  ;;  %v1933_v5 = vrot.slane %v4198_v43, 2  ;;  %7472 = vst [vmem:[#allocation78_spill] sm:$0xff] %v4422_v6  ;;  %v1935_v41 = vrot.slane %v4305_v2, 2  ;;  %3410 = vrcp.f32 %v323_v25 }
  0xb3   : > { %1172 = vrot.lane.b32.xlu0 %v3685_v51, %s3535_s30  ;;  %v1931_v51 = vrot.slane %v4276_v39, 2  ;;  %v3407_v57 = vpop.eup %3406  ;;  %v326_v19 = vadd.f32 1.0, %v3403_v7  ;;  %v4432_v48 = vstv %s4360_s28  ;;  %v4435_v14 = vstv %s4362_s29  ;;  %s4551_s28 = sld [smem:[#allocation2 + $0x41]]  ;;  %s4597_s29 = sld [smem:[#allocation2 + $0xc]] }
  0xb4   : > { %7473 = vst [vmem:[#allocation79_spill] sm:$0xff] %v4432_v48  ;;  %7474 = vst [vmem:[#allocation80_spill] sm:$0xff] %v4435_v14  ;;  %v1937_v58 = vrot.slane %v4296_v44, 2  ;;  %3412 = vrcp.f32 %v322_v56  ;;  %v4440_v6 = vsel %vm933_vm0, %v1925_v27, %v1927_v30  ;;  %v327_v25 = vadd.f32 1.0, %v3405_v35 }
  0xb5   : > { %3414 = vrcp.f32 %v324_v8  ;;  %v4443_v7 = vsel %vm933_vm0, %v1924_v4, %v1925_v27  ;;  %v328_v14 = vadd.f32 1.0, %v3407_v57  ;;  %v4451_v56 = vsel %vm933_vm0, %v1927_v30, %v1929_v61 }
  0xb6   : > { %1178 = vrot.lane.b32.xlu1 %v3714_v63, %s3535_s30  ;;  %v222_v63 = vld [vmem:[%s3647_s19 + $0xd0] sm:$0x3]  ;;  %3416 = vrcp.f32 %v325_v18  ;;  %7475 = vst [vmem:[#allocation81_spill] sm:$0xff] %v4451_v56  ;;  %v4454_v35 = vsel %vm933_vm0, %v1933_v5, %v1935_v41  ;;  %v1939_v27 = vrot.slane %v4312_v12, 2  ;;  %s4457_s19 = sld [smem:[#allocation2 + $0xa]]  ;;  %v4467_v30 = vsel %vm933_vm0, %v1935_v41, %v1937_v58 }
  0xb7   : > { %1176 = vrot.lane.b32.xlu0 %v3709_v62, %s3535_s30  ;;  %v3153_v23 = vmul.f32 -1.442695, %v222_v63  ;;  %v4446_v62 = vsel %vm933_vm0, %v1929_v61, %v1931_v51  ;;  %v3409_v48 = vpop.eup %3408  ;;  %7476 = vst [vmem:[#allocation82_spill] sm:$0xff] %v4454_v35  ;;  %3418 = vrcp.f32 %v326_v19  ;;  %7478 = vst [vmem:[#allocation84_spill] sm:$0xff] %v4467_v30  ;;  %v4470_v4 = vstv %s4382_s4  ;;  %s4599_s4 = sld [smem:[#allocation2 + $0x27]] }
  0xb8   : > { %7479 = vst [vmem:[#allocation85_spill] sm:$0xff] %v4470_v4  ;;  %v1239_v61 = vstv %s4395_s6  ;;  %v4474_v8 = vstv %s4404_s7  ;;  %v4477_v18 = vstv %s4406_s8  ;;  %v4490_v57 = vsel %vm933_vm0, %v1937_v58, %v1939_v27  ;;  %s4731_s6 = sld [smem:[#allocation2 + $0xd]]  ;;  %s4733_s7 = sld [smem:[#allocation2 + $0x28]] }
  0xb9   : > { %3420 = vpow2.f32 %v3153_v23  ;;  %7482 = vst [vmem:[#allocation88_spill] sm:$0xff] %v4490_v57  ;;  %v4493_v23 = vstv %s4417_s10  ;;  %v4496_v41 = vstv %s4425_s11  ;;  %v4499_v19 = vstv %s4427_s17  ;;  %s4745_s8 = sld [smem:[#allocation2 + $0x43]]  ;;  %s5719_s10 = sld [smem:[#allocation2 + $0x29]] }
  0xba   : > { %1182 = vrot.lane.b32.xlu1 %v4030_v38, %s3535_s30  ;;  %v4464_v38 = vsel %vm933_vm0, %v1931_v51, %v1933_v5  ;;  %3422 = vrcp.f32 %v327_v25  ;;  %v4485_v5 = vstv %s4415_s9  ;;  %v329_v51 = vadd.f32 1.0, %v3409_v48  ;;  %7483 = vst [vmem:[#allocation89_spill] sm:$0xff] %v4493_v23  ;;  %7484 = vst [vmem:[#allocation90_spill] sm:$0xff] %v4496_v41  ;;  %s5712_s9 = sld [smem:[#allocation2 + $0xe]]  ;;  %s5721_s11 = sld [smem:[#allocation2 + $0x44]] }
  0xbb   : > { %1180 = vrot.lane.b32.xlu0 %v3719_v0, %s3535_s30  ;;  %7477 = vst [vmem:[#allocation83_spill] sm:$0xff] %v4464_v38  ;;  %v4482_v0 = vstv %s4393_s5  ;;  %7481 = vst [vmem:[#allocation87_spill] sm:$0xff] %v4485_v5  ;;  %3424 = vrcp.f32 %v328_v14  ;;  %v4504_v63 = vmul.f32 %v3840_v13, %v1239_v61  ;;  %v4508_v48 = vmul.f32 %v3840_v13, %v4474_v8  ;;  %s4610_s5 = sld [smem:[#allocation2 + $0x42]]  ;;  %s5823_s17 = sld [smem:[#allocation2 + $0xf]] }
  0xbc   : > { %7480 = vst [vmem:[#allocation86_spill] sm:$0xff] %v4482_v0  ;;  %7485 = vst [vmem:[#allocation91_spill] sm:$0xff] %v4499_v19  ;;  %v4512_v58 = vmul.f32 %v3840_v13, %v4477_v18  ;;  %v4515_v14 = vmul.f32 %v3852_v28, %v1239_v61  ;;  %v4517_v25 = vpop.eup %3410  ;;  %v4521_v27 = vmul.f32 %v3852_v28, %v4474_v8  ;;  %3426 = vrcp.f32 %v329_v51 }
  0xbd   : > { %7486 = vst [vmem:[#allocation92_spill] sm:$0xff] %v4504_v63  ;;  %7487 = vst [vmem:[#allocation93_spill] sm:$0xff] %v4508_v48  ;;  %v4525_v12 = vmul.f32 %v3852_v28, %v4477_v18  ;;  %v4528_v48 = vmul.f32 %v4101_v9, %v1239_v61  ;;  %v4540_v63 = vmul.f32 %v4101_v9, %v4477_v18  ;;  %v4558_v51 = vstv %s4457_s19  ;;  %s5853_s19 = sld [smem:[#allocation2 + $0x2a]] }
  0xbe   : > { %1294 = vrot.lane.b32.xlu1 %v3840_v13, %s3534_s20  ;;  %7488 = vst [vmem:[#allocation94_spill] sm:$0xff] %v4512_v58  ;;  %7489 = vst [vmem:[#allocation95_spill] sm:$0xff] %v4515_v14  ;;  %v4532_v58 = vmul.f32 %v4101_v9, %v4474_v8  ;;  %v4536_v14 = vpop.eup %3412  ;;  %v4576_v19 = vmul.f32 %v4198_v43, %v4474_v8  ;;  %v4591_v5 = vmul.f32 %v4276_v39, %v1239_v61 }
  0xbf   : > { %1292 = vrot.lane.b32.xlu0 %v3852_v28, %s3534_s20  ;;  %7490 = vst [vmem:[#allocation96_spill] sm:$0xff] %v4517_v25  ;;  %7491 = vst [vmem:[#allocation97_spill] sm:$0xff] %v4521_v27  ;;  %v4543_v27 = vmul.f32 %v4110_v40, %v1239_v61  ;;  %v2451_v41 = vrot.slane %v4536_v14, 1  ;;  %v4633_v0 = vmul.f32 %v4305_v2, %v4474_v8 }
  0xc0   : > { %7492 = vst [vmem:[#allocation98_spill] sm:$0xff] %v4525_v12  ;;  %7493 = vst [vmem:[#allocation99_spill] sm:$0xff] %v4528_v48  ;;  %v4547_v12 = vmul.f32 %v4110_v40, %v4474_v8 }
  0xc1   : > { %7494 = vst [vmem:[#allocation100_spill] sm:$0xff] %v4532_v58  ;;  %7495 = vst [vmem:[#allocation101_spill] sm:$0xff] %v4536_v14  ;;  %v4553_v58 = vpop.eup %3414  ;;  %v4603_v14 = vmul.f32 %v4276_v39, %v4477_v18 }
  0xc2   : > { %7496 = vst [vmem:[#allocation102_spill] sm:$0xff] %v4540_v63  ;;  %7497 = vst [vmem:[#allocation103_spill] sm:$0xff] %v4543_v27  ;;  %1298 = vrot.lane.b32.xlu1 %v4101_v9, %s3534_s20  ;;  %v4561_v63 = vstv %s4459_s24  ;;  %v4565_v27 = vmul.f32 %v4110_v40, %v4477_v18  ;;  %v4570_v48 = vpop.eup %3416  ;;  %s5855_s24 = sld [smem:[#allocation2 + $0x45]] }
  0xc3   : > { %7498 = vst [vmem:[#allocation104_spill] sm:$0xff] %v4547_v12  ;;  %7499 = vst [vmem:[#allocation105_spill] sm:$0xff] %v4553_v58  ;;  %v4568_v12 = vmul.f32 %v4198_v43, %v1239_v61  ;;  %1296 = vrot.lane.b32.xlu0 %v4110_v40, %s3534_s20  ;;  %v4581_v23 = vpop.eup %3418 }
  0xc4   : > { %7500 = vst [vmem:[#allocation106_spill] sm:$0xff] %v4558_v51  ;;  %7501 = vst [vmem:[#allocation107_spill] sm:$0xff] %v4561_v63  ;;  %v2452_v51 = vrot.slane %v4517_v25, 1  ;;  %v2454_v63 = vrot.slane %v4553_v58, 1  ;;  %v3421_v58 = vpop.eup %3420 }
  0xc5   : > { %7502 = vst [vmem:[#allocation108_spill] sm:$0xff] %v4565_v27  ;;  %7503 = vst [vmem:[#allocation109_spill] sm:$0xff] %v4568_v12  ;;  %v4584_v27 = vstv %s4479_s25  ;;  %v4588_v12 = vmul.f32 %v4198_v43, %v4477_v18  ;;  %s5865_s25 = sld [smem:[#allocation2 + $0x10]] }
  0xc6   : > { %7504 = vst [vmem:[#allocation110_spill] sm:$0xff] %v4570_v48  ;;  %7505 = vst [vmem:[#allocation111_spill] sm:$0xff] %v4576_v19  ;;  %v4595_v19 = vmul.f32 %v4276_v39, %v4474_v8  ;;  %1302 = vrot.lane.b32.xlu1 %v4198_v43, %s3534_s20 }
  0xc7   : > { %7506 = vst [vmem:[#allocation112_spill] sm:$0xff] %v4581_v23  ;;  %7507 = vst [vmem:[#allocation113_spill] sm:$0xff] %v4584_v27  ;;  %v4606_v27 = vmul.f32 %v4296_v44, %v1239_v61  ;;  %1300 = vrot.lane.b32.xlu0 %v4276_v39, %s3534_s20 }
  0xc8   : > { %7508 = vst [vmem:[#allocation114_spill] sm:$0xff] %v4588_v12  ;;  %7509 = vst [vmem:[#allocation115_spill] sm:$0xff] %v4591_v5  ;;  %v2456_v12 = vrot.slane %v4570_v48, 1  ;;  %v2458_v5 = vrot.slane %v4581_v23, 1  ;;  %v4625_v48 = vmul.f32 %v4305_v2, %v1239_v61  ;;  %v330_v23 = vadd.f32 1.0, %v3421_v58 }
  0xc9   : > { %7510 = vst [vmem:[#allocation116_spill] sm:$0xff] %v4595_v19  ;;  %7511 = vst [vmem:[#allocation117_spill] sm:$0xff] %v4603_v14  ;;  %v4612_v19 = vpop.eup %3422  ;;  %v4618_v14 = vmul.f32 %v4296_v44, %v4474_v8  ;;  %v4643_v61 = vsel %vm599_vm1, %v2451_v41, %v2452_v51  ;;  %v4646_v58 = vstv %s4534_s26  ;;  %v4651_v8 = vstv %s4549_s27  ;;  %s5875_s26 = sld [smem:[#allocation2 + $0x2b]]  ;;  %s5877_s27 = sld [smem:[#allocation2 + $0x46]] }
  0xca   : > { %7512 = vst [vmem:[#allocation118_spill] sm:$0xff] %v4606_v27  ;;  %7513 = vst [vmem:[#allocation119_spill] sm:$0xff] %v4612_v19  ;;  %v4622_v27 = vmul.f32 %v4296_v44, %v4477_v18  ;;  %v4627_v25 = vpop.eup %3424  ;;  %3428 = vrcp.f32 %v330_v23  ;;  %1306 = vrot.lane.b32.xlu1 %v4296_v44, %s3534_s20  ;;  %v4671_v23 = vstv %s4597_s29  ;;  %s6236_s29 = sld [smem:[#allocation2 + $0x12]] }
  0xcb   : > { %7514 = vst [vmem:[#allocation120_spill] sm:$0xff] %v4618_v14  ;;  %7516 = vst [vmem:[#allocation122_spill] sm:$0xff] %v4625_v48  ;;  %v4637_v14 = vmul.f32 %v4305_v2, %v4477_v18  ;;  %v2460_v48 = vrot.slane %v4612_v19, 1  ;;  %v2462_v4 = vrot.slane %v4627_v25, 1  ;;  %v4657_v18 = vsel %vm599_vm1, %v2456_v12, %v2458_v5  ;;  %1304 = vrot.lane.b32.xlu0 %v4305_v2, %s3534_s20 }
  0xcc   : > { %7515 = vst [vmem:[#allocation121_spill] sm:$0xff] %v4622_v27  ;;  %7517 = vst [vmem:[#allocation123_spill] sm:$0xff] %v4627_v25  ;;  %v4640_v27 = vsel %vm599_vm1, %v2452_v51, %v2454_v63 }
  0xcd   : > { %7518 = vst [vmem:[#allocation124_spill] sm:$0xff] %v4633_v0  ;;  %7519 = vst [vmem:[#allocation125_spill] sm:$0xff] %v4637_v14  ;;  %v4654_v0 = vstv %s4551_s28  ;;  %v4665_v41 = vsel %vm599_vm1, %v2460_v48, %v2462_v4  ;;  %v4668_v51 = vsel %vm599_vm1, %v2458_v5, %v2460_v48  ;;  %s6168_s28 = sld [smem:[#allocation2 + $0x47]] }
  0xce   : > { %7520 = vst [vmem:[#allocation126_spill] sm:$0xff] %v4640_v27  ;;  %7521 = vst [vmem:[#allocation127_spill] sm:$0xff] %v4643_v61  ;;  %v4660_v27 = vsel %vm599_vm1, %v2454_v63, %v2456_v12  ;;  %v1435_v12 = vmul.f32 %v3840_v13, %v4671_v23  ;;  %v4684_v63 = vmul.f32 %v4110_v40, %v4671_v23  ;;  %1364 = vrot.lane.b32.xlu1 %v3840_v13, %s3535_s30 }
  0xcf   : > { %7522 = vst [vmem:[#allocation128_spill] sm:$0xff] %v4646_v58  ;;  %7523 = vst [vmem:[#allocation129_spill] sm:$0xff] %v4651_v8  ;;  %v4674_v8 = vstv %s4599_s4  ;;  %1362 = vrot.lane.b32.xlu0 %v3852_v28, %s3535_s30  ;;  %s6246_s4 = sld [smem:[#allocation2 + $0x2d]] }
  0xd0   : > { %7524 = vst [vmem:[#allocation130_spill] sm:$0xff] %v4654_v0  ;;  %7525 = vst [vmem:[#allocation131_spill] sm:$0xff] %v4657_v18  ;;  %v4676_v0 = vpop.eup %3426  ;;  %v1488_v5 = vmul.f32 %v3840_v13, %v4674_v8  ;;  %v4690_v48 = vmul.f32 %v4110_v40, %v4674_v8  ;;  %v1487_v18 = vmul.f32 %v3852_v28, %v4674_v8  ;;  %v1453_v58 = vrot.slane %v1435_v12, 1  ;;  %v444_v57 = vpop.permute.xlu1 %443 }
  0xd1   : > { %7526 = vst [vmem:[#allocation132_spill] sm:$0xff] %v4660_v27  ;;  %7527 = vst [vmem:[#allocation133_spill] sm:$0xff] %v4665_v41  ;;  %v4694_v41 = vstv %s4610_s5  ;;  %v1434_v27 = vmul.f32 %v3852_v28, %v4671_v23  ;;  %v7334_v61 = vrot.slane %v4684_v63, 1  ;;  %s6248_s5 = sld [smem:[#allocation2 + $0x48]] }
  0xd2   : > { %7528 = vst [vmem:[#allocation134_spill] sm:$0xff] %v4668_v51  ;;  %7529 = vst [vmem:[#allocation135_spill] sm:$0xff] %v4671_v23  ;;  %v2464_v51 = vrot.slane %v4676_v0, 1  ;;  %v1506_v14 = vrot.slane %v1488_v5, 1  ;;  %v7335_v25 = vrot.slane %v4690_v48, 1  ;;  %v4713_v30 = vmul.f32 %v4110_v40, %v4694_v41  ;;  %1368 = vrot.lane.b32.xlu1 %v4101_v9, %s3535_s30 }
  0xd3   : > { %7530 = vst [vmem:[#allocation136_spill] sm:$0xff] %v4674_v8  ;;  %7531 = vst [vmem:[#allocation137_spill] sm:$0xff] %v4676_v0  ;;  %v4709_v0 = vmul.f32 %v3840_v13, %v4694_v41  ;;  %v1452_v12 = vrot.slane %v1434_v27, 1  ;;  %v4720_v5 = vsel %vm599_vm1, %v1453_v58, %v7334_v61  ;;  %v1505_v13 = vrot.slane %v1487_v18, 1  ;;  %1366 = vrot.lane.b32.xlu0 %v4110_v40, %s3535_s30 }
  0xd4   : > { %7532 = vst [vmem:[#allocation138_spill] sm:$0xff] %v4694_v41  ;;  %v4705_v19 = vsel %vm599_vm1, %v2462_v4, %v2464_v51  ;;  %7534 = vst [vmem:[#allocation140_spill] sm:$0xff] %v4720_v5  ;;  %v4725_v4 = vsel %vm599_vm1, %v1506_v14, %v7335_v25  ;;  %v4740_v25 = vmul.f32 %v4101_v9, %v4671_v23  ;;  %v4750_v5 = vpop.eup %3428  ;;  %v7539_v35 = vrot.slane %v4713_v30, 1 }
  0xd5   : > { %7533 = vst [vmem:[#allocation139_spill] sm:$0xff] %v4705_v19  ;;  %7535 = vst [vmem:[#allocation141_spill] sm:$0xff] %v4725_v4  ;;  %v1540_v19 = vmul.f32 %v3852_v28, %v4694_v41  ;;  %v1559_v27 = vrot.slane %v4709_v0, 1  ;;  %v4736_v61 = vsel %vm599_vm1, %v1452_v12, %v1453_v58  ;;  %v459_v18 = vmul.f32 %v3997_v29, %v444_v57  ;;  %v440_v0 = vpop.permute.xlu0 %439 }
  0xd6   : > { %7536 = vst [vmem:[#allocation142_spill] sm:$0xff] %v4736_v61  ;;  %v477_v28 = vmul.f32 %v4006_v34, %v444_v57  ;;  %v495_v4 = vmul.f32 %v4009_v36, %v444_v57  ;;  %v4748_v38 = vsel %vm599_vm1, %v1505_v13, %v1506_v14  ;;  %7538 = vst [vmem:[#allocation144_spill] sm:$0xff] %v4750_v5  ;;  %1372 = vrot.lane.b32.xlu1 %v4198_v43, %s3535_s30  ;;  %v7565_v43 = vld [vmem:[#allocation21_spill] sm:$0xff] }
  0xd7   : > { %7537 = vst [vmem:[#allocation143_spill] sm:$0xff] %v4748_v38  ;;  %v457_v58 = vmul.f32 %v3997_v29, %v440_v0  ;;  %v475_v12 = vmul.f32 %v4006_v34, %v440_v0  ;;  %v493_v61 = vmul.f32 %v4009_v36, %v440_v0  ;;  %v4760_v57 = vsel %vm599_vm1, %v1559_v27, %v7539_v35 }
  0xd8   : > { %7540 = vst [vmem:[#allocation145_spill] sm:$0xff] %v4760_v57  ;;  %v4763_v56 = vadd.f32 %v459_v18, %v4013_v26  ;;  %v4766_v13 = vadd.f32 %v477_v28, %v4018_v15  ;;  %v4769_v14 = vadd.f32 %v495_v4, %v4022_v47  ;;  %v2466_v0 = vrot.slane %v4750_v5, 1  ;;  %v446_v28 = vpop.permute.xlu1 %445  ;;  %1370 = vrot.lane.b32.xlu0 %v4276_v39, %s3535_s30 }
  0xd9   : > { %v4775_v38 = vadd.f32 %v457_v58, %v4035_v31  ;;  %v4778_v35 = vadd.f32 %v475_v12, %v4039_v49  ;;  %v4781_v26 = vadd.f32 %v493_v61, %v4045_v22  ;;  %v1558_v15 = vrot.slane %v1540_v19, 1  ;;  %v442_v40 = vpop.permute.xlu0 %441 }
  0xda   : > { %v460_v47 = vmul.f32 %v3997_v29, %v446_v28  ;;  %v478_v4 = vmul.f32 %v4006_v34, %v446_v28  ;;  %v496_v18 = vmul.f32 %v4009_v36, %v446_v28  ;;  %v4787_v31 = vsel %vm599_vm1, %v2464_v51, %v2466_v0  ;;  %1376 = vrot.lane.b32.xlu1 %v4296_v44, %s3535_s30 }
  0xdb   : > { %7541 = vst [vmem:[#allocation146_spill] sm:$0xff] %v4787_v31  ;;  %v458_v49 = vmul.f32 %v3997_v29, %v442_v40  ;;  %v476_v58 = vmul.f32 %v4006_v34, %v442_v40  ;;  %v494_v22 = vmul.f32 %v4009_v36, %v442_v40  ;;  %v4795_v19 = vstv %s4731_s6  ;;  %s6254_s6 = sld [smem:[#allocation2 + $0x13]] }
  0xdc   : > { %7542 = vst [vmem:[#allocation147_spill] sm:$0xff] %v4795_v19  ;;  %v4798_v61 = vadd.f32 %v460_v47, %v4049_v52  ;;  %v4801_v12 = vadd.f32 %v478_v4, %v4053_v16  ;;  %v4804_v51 = vadd.f32 %v496_v18, %v4063_v33  ;;  %v4809_v0 = vstv %s4733_s7  ;;  %v450_v19 = vpop.permute.xlu1 %449  ;;  %1374 = vrot.lane.b32.xlu0 %v4305_v2, %s3535_s30  ;;  %s6266_s7 = sld [smem:[#allocation2 + $0x2e]] }
  0xdd   : > { %7543 = vst [vmem:[#allocation148_spill] sm:$0xff] %v4809_v0  ;;  %v466_v40 = vadd.f32 %v458_v49, %v4067_v1  ;;  %v484_v28 = vadd.f32 %v476_v58, %v4209_v20  ;;  %v502_v5 = vadd.f32 %v494_v22, %v4219_v45  ;;  %v4815_v52 = vstv %s4745_s8  ;;  %v448_v4 = vpop.permute.xlu0 %447  ;;  %s6268_s8 = sld [smem:[#allocation2 + $0x49]] }
  0xde   : > { %7544 = vst [vmem:[#allocation149_spill] sm:$0xff] %v4815_v52  ;;  %v462_v16 = vmul.f32 %v3997_v29, %v450_v19  ;;  %v480_v47 = vmul.f32 %v4006_v34, %v450_v19  ;;  %v498_v33 = vmul.f32 %v4009_v36, %v450_v19  ;;  %v4821_v18 = vsel %vm599_vm1, %v1558_v15, %v1559_v27 }
  0xdf   : > { %7545 = vst [vmem:[#allocation150_spill] sm:$0xff] %v4821_v18  ;;  %v461_v0 = vmul.f32 %v3997_v29, %v448_v4  ;;  %v479_v1 = vmul.f32 %v4006_v34, %v448_v4  ;;  %v497_v20 = vmul.f32 %v4009_v36, %v448_v4  ;;  %v4830_v45 = vmul.f32 %v4276_v39, %v4671_v23 }
  0xe0   : > { %v4833_v49 = vadd.f32 %v462_v16, %v4246_v59  ;;  %v4836_v58 = vadd.f32 %v480_v47, %v4282_v42  ;;  %v4839_v27 = vadd.f32 %v498_v33, %v4286_v53  ;;  %v7347_v15 = vrot.slane %v4740_v25, 1  ;;  %v454_v16 = vpop.permute.xlu1 %453  ;;  %1627 = vrot.lane.b32.xlu1 %v4351_v55, %s3534_s20  ;;  %1625 = vrot.lane.b32.xlu0 %v4354_v17, %s3534_s20 }
  0xe1   : > { %7546 = vst [vmem:[#allocation151_spill] sm:$0xff] %v4830_v45  ;;  %v4845_v22 = vadd.f32 %v461_v0, %v4290_v37  ;;  %v4848_v19 = vadd.f32 %v479_v1, %v4294_v10  ;;  %v4851_v59 = vadd.f32 %v497_v20, %v4309_v3  ;;  %v7346_v42 = vrot.slane %v4830_v45, 1  ;;  %v452_v4 = vpop.permute.xlu0 %451 }
  0xe2   : > { %v464_v53 = vmul.f32 %v3997_v29, %v454_v16  ;;  %v482_v47 = vmul.f32 %v4006_v34, %v454_v16  ;;  %v500_v33 = vmul.f32 %v4009_v36, %v454_v16  ;;  %v4859_v37 = vmul.f32 %v4101_v9, %v4674_v8 }
  0xe3   : > { %v463_v10 = vmul.f32 %v3997_v29, %v452_v4  ;;  %v481_v0 = vmul.f32 %v4006_v34, %v452_v4  ;;  %v499_v3 = vmul.f32 %v4009_v36, %v452_v4  ;;  %v4871_v1 = vsel %vm599_vm1, %v7347_v15, %v7346_v42  ;;  %v7550_v42 = vld [vmem:[#allocation69_spill] sm:$0xff] }
  0xe4   : > { %7547 = vst [vmem:[#allocation152_spill] sm:$0xff] %v4871_v1  ;;  %v4874_v20 = vadd.f32 %v464_v53, %v4316_v32  ;;  %v4877_v16 = vadd.f32 %v482_v47, %v4320_v11  ;;  %v4880_v29 = vadd.f32 %v500_v33, %v4324_v60  ;;  %v4886_v34 = vmul.f32 %v4276_v39, %v4674_v8  ;;  %v512_v11 = vpop.permute.xlu1 %511  ;;  %v7549_v47 = vld [vmem:[#allocation68_spill] sm:$0xff]  ;;  %v7559_v8 = vld [vmem:[#allocation14_spill] sm:$0xff] }
  0xe5   : > { %v4889_v36 = vadd.f32 %v463_v10, %v4328_v50  ;;  %v4892_v4 = vadd.f32 %v481_v0, %v4334_v21  ;;  %v4895_v32 = vadd.f32 %v499_v3, %v4338_v46  ;;  %v528_v53 = vmul.f32 %v4341_v24, %v512_v11  ;;  %v510_v44 = vpop.permute.xlu0 %509  ;;  %v7551_v46 = vld [vmem:[#allocation73_spill] sm:$0xff] }
  0xe6   : > { %7548 = vst [vmem:[#allocation153_spill] sm:$0xff] %v4886_v34  ;;  %v546_v33 = vmul.f32 %v7549_v47, %v512_v11  ;;  %v564_v15 = vmul.f32 %v7550_v42, %v512_v11  ;;  %v7355_v52 = vrot.slane %v4886_v34, 1  ;;  %v527_v50 = vmul.f32 %v4341_v24, %v510_v44  ;;  %1631 = vrot.lane.b32.xlu1 %v7551_v46, %s3534_s20  ;;  %v7552_v11 = vld [vmem:[#allocation70_spill] sm:$0xff] }
  0xe7   : > { %v545_v21 = vmul.f32 %v7549_v47, %v510_v44  ;;  %v563_v10 = vmul.f32 %v7550_v42, %v510_v44  ;;  %v4909_v0 = vmul.f32 %v4101_v9, %v4694_v41  ;;  %v536_v3 = vadd.f32 %v528_v53, %v466_v40  ;;  %1629 = vrot.lane.b32.xlu0 %v7552_v11, %s3534_s20 }
  0xe8   : > { %v554_v60 = vadd.f32 %v546_v33, %v484_v28  ;;  %v572_v1 = vadd.f32 %v564_v15, %v502_v5  ;;  %v7553_v18 = vrot.slane %v4859_v37, 1  ;;  %v535_v44 = vadd.f32 %v527_v50, %v4775_v38  ;;  %v516_v45 = vpop.permute.xlu1 %515  ;;  %v7556_v50 = vld [vmem:[#allocation75_spill] sm:$0xff] }
  0xe9   : > { %v553_v57 = vadd.f32 %v545_v21, %v4778_v35  ;;  %v571_v9 = vadd.f32 %v563_v10, %v4781_v26  ;;  %v4925_v5 = vmul.f32 %v4276_v39, %v4694_v41  ;;  %v530_v40 = vmul.f32 %v4341_v24, %v516_v45  ;;  %v514_v53 = vpop.permute.xlu0 %513  ;;  %v7557_v21 = vld [vmem:[#allocation12_spill] sm:$0xff] }
  0xea   : > { %v4918_v31 = vsel %vm599_vm1, %v7553_v18, %v7355_v52  ;;  %v548_v28 = vmul.f32 %v7549_v47, %v516_v45  ;;  %v566_v15 = vmul.f32 %v7550_v42, %v516_v45  ;;  %v7555_v18 = vld [vmem:[#allocation11_spill] sm:$0xff]  ;;  %v529_v38 = vmul.f32 %v4341_v24, %v514_v53  ;;  %1635 = vrot.lane.b32.xlu1 %v7556_v50, %s3534_s20 }
  0xeb   : > { %7554 = vst [vmem:[#allocation68_spill] sm:$0xff] %v4918_v31  ;;  %v4931_v33 = vadd.f32 %v7555_v18, %v536_v3  ;;  %v547_v35 = vmul.f32 %v7549_v47, %v514_v53  ;;  %v565_v26 = vmul.f32 %v7550_v42, %v514_v53  ;;  %v679_v10 = vadd.f32 %v7557_v21, %v554_v60  ;;  %v7558_v3 = vld [vmem:[#allocation13_spill] sm:$0xff] }
  0xec   : > { %v538_v52 = vadd.f32 %v530_v40, %v4798_v61  ;;  %v556_v39 = vadd.f32 %v548_v28, %v4801_v12  ;;  %v574_v45 = vadd.f32 %v566_v15, %v4804_v51  ;;  %1633 = vrot.lane.b32.xlu0 %v4401_v54, %s3534_s20  ;;  %v732_v18 = vadd.f32 %v7558_v3, %v572_v1  ;;  %v520_v41 = vpop.permute.xlu1 %519  ;;  %v7560_v28 = vld [vmem:[#allocation15_spill] sm:$0xff] }
  0xed   : > { %v537_v31 = vadd.f32 %v529_v38, %v4763_v56  ;;  %v555_v53 = vadd.f32 %v547_v35, %v4766_v13  ;;  %v573_v34 = vadd.f32 %v565_v26, %v4769_v14  ;;  %v625_v60 = vadd.f32 %v7559_v8, %v535_v44  ;;  %v518_v40 = vpop.permute.xlu0 %517  ;;  %v7561_v14 = vld [vmem:[#allocation76_spill] sm:$0xff]  ;;  %v7562_v38 = vld [vmem:[#allocation17_spill] sm:$0xff] }
  0xee   : > { %v532_v61 = vmul.f32 %v4341_v24, %v520_v41  ;;  %v550_v12 = vmul.f32 %v7549_v47, %v520_v41  ;;  %v568_v51 = vmul.f32 %v7550_v42, %v520_v41  ;;  %v678_v15 = vadd.f32 %v7560_v28, %v553_v57  ;;  %1639 = vrot.lane.b32.xlu1 %v7561_v14, %s3534_s20  ;;  %v7563_v26 = vld [vmem:[#allocation77_spill] sm:$0xff]  ;;  %v7564_v57 = vld [vmem:[#allocation19_spill] sm:$0xff] }
  0xef   : > { %v531_v1 = vmul.f32 %v4341_v24, %v518_v40  ;;  %v549_v56 = vmul.f32 %v7549_v47, %v518_v40  ;;  %v567_v13 = vmul.f32 %v7550_v42, %v518_v40  ;;  %v731_v8 = vadd.f32 %v7562_v38, %v571_v9  ;;  %v7570_v38 = vld [vmem:[#allocation71_spill] sm:$0xff] }
  0xf0   : > { %v540_v44 = vadd.f32 %v532_v61, %v4833_v49  ;;  %v558_v35 = vadd.f32 %v550_v12, %v4836_v58  ;;  %v576_v41 = vadd.f32 %v568_v51, %v4839_v27  ;;  %1637 = vrot.lane.b32.xlu0 %v7563_v26, %s3534_s20  ;;  %v628_v21 = vadd.f32 %v7564_v57, %v538_v52  ;;  %v524_v2 = vpop.permute.xlu1 %523  ;;  %v7566_v12 = vld [vmem:[#allocation23_spill] sm:$0xff]  ;;  %v7571_v57 = vld [vmem:[#allocation72_spill] sm:$0xff] }
  0xf1   : > { %v539_v3 = vadd.f32 %v531_v1, %v4845_v22  ;;  %v557_v40 = vadd.f32 %v549_v56, %v4848_v19  ;;  %v575_v28 = vadd.f32 %v567_v13, %v4851_v59  ;;  %v681_v9 = vadd.f32 %v7565_v43, %v556_v39  ;;  %v522_v61 = vpop.permute.xlu0 %521  ;;  %v7567_v59 = vld [vmem:[#allocation20_spill] sm:$0xff] }
  0xf2   : > { %v534_v49 = vmul.f32 %v4341_v24, %v524_v2  ;;  %v552_v58 = vmul.f32 %v7549_v47, %v524_v2  ;;  %v570_v27 = vmul.f32 %v7550_v42, %v524_v2  ;;  %v734_v51 = vadd.f32 %v7566_v12, %v574_v45  ;;  %1697 = vrot.lane.b32.xlu1 %v4351_v55, %s3535_s30  ;;  %v7568_v45 = vld [vmem:[#allocation22_spill] sm:$0xff]  ;;  %v7569_v13 = vld [vmem:[#allocation24_spill] sm:$0xff] }
  0xf3   : > { %v533_v52 = vmul.f32 %v4341_v24, %v522_v61  ;;  %v551_v22 = vmul.f32 %v7549_v47, %v522_v61  ;;  %v569_v19 = vmul.f32 %v7550_v42, %v522_v61  ;;  %v627_v43 = vadd.f32 %v7567_v59, %v537_v31 }
  0xf4   : > { %v542_v39 = vadd.f32 %v534_v49, %v4874_v20  ;;  %v560_v1 = vadd.f32 %v552_v58, %v4877_v16  ;;  %v578_v2 = vadd.f32 %v570_v27, %v4880_v29  ;;  %1695 = vrot.lane.b32.xlu0 %v4354_v17, %s3535_s30  ;;  %v680_v24 = vadd.f32 %v7568_v45, %v555_v53  ;;  %v776_v55 = vpop.permute.xlu1 %775  ;;  %v7572_v49 = vld [vmem:[#allocation74_spill] sm:$0xff]  ;;  %v7573_v27 = vld [vmem:[#allocation25_spill] sm:$0xff] }
  0xf5   : > { %v541_v47 = vadd.f32 %v533_v52, %v4889_v36  ;;  %v559_v42 = vadd.f32 %v551_v22, %v4892_v4  ;;  %v577_v56 = vadd.f32 %v569_v19, %v4895_v32  ;;  %v733_v31 = vadd.f32 %v7569_v13, %v573_v34  ;;  %v774_v58 = vpop.permute.xlu0 %773  ;;  %v7574_v32 = vld [vmem:[#allocation28_spill] sm:$0xff] }
  0xf6   : > { %v792_v20 = vmul.f32 %v7570_v38, %v776_v55  ;;  %v810_v16 = vmul.f32 %v7571_v57, %v776_v55  ;;  %v828_v29 = vmul.f32 %v7572_v49, %v776_v55  ;;  %v630_v17 = vadd.f32 %v7573_v27, %v540_v44  ;;  %1701 = vrot.lane.b32.xlu1 %v7551_v46, %s3535_s30  ;;  %v7575_v44 = vld [vmem:[#allocation29_spill] sm:$0xff] }
  0xf7   : > { %v791_v53 = vmul.f32 %v7570_v38, %v774_v58  ;;  %v809_v36 = vmul.f32 %v7571_v57, %v774_v58  ;;  %v827_v4 = vmul.f32 %v7572_v49, %v774_v58  ;;  %v683_v34 = vadd.f32 %v7574_v32, %v558_v35  ;;  %v7576_v35 = vld [vmem:[#allocation26_spill] sm:$0xff]  ;;  %v7580_v32 = vld [vmem:[#allocation32_spill] sm:$0xff] }
  0xf8   : > { %v5000_v61 = vadd.f32 %v792_v20, %v4931_v33  ;;  %v5002_v12 = vadd.f32 %v810_v16, %v679_v10  ;;  %v5004_v52 = vadd.f32 %v828_v29, %v732_v18  ;;  %1699 = vrot.lane.b32.xlu0 %v7552_v11, %s3535_s30  ;;  %v736_v22 = vadd.f32 %v7575_v44, %v576_v41  ;;  %v780_v46 = vpop.permute.xlu1 %779  ;;  %v7577_v20 = vld [vmem:[#allocation27_spill] sm:$0xff] }
  0xf9   : > { %v5009_v19 = vadd.f32 %v791_v53, %v625_v60  ;;  %v5011_v59 = vadd.f32 %v809_v36, %v678_v15  ;;  %v5013_v45 = vadd.f32 %v827_v4, %v731_v8  ;;  %v629_v55 = vadd.f32 %v7576_v35, %v539_v3  ;;  %v778_v13 = vpop.permute.xlu0 %777  ;;  %v7578_v8 = vld [vmem:[#allocation30_spill] sm:$0xff] }
  0xfa   : > { %v794_v33 = vmul.f32 %v7570_v38, %v780_v46  ;;  %v812_v10 = vmul.f32 %v7571_v57, %v780_v46  ;;  %v830_v18 = vmul.f32 %v7572_v49, %v780_v46  ;;  %v682_v11 = vadd.f32 %v7577_v20, %v557_v40  ;;  %1705 = vrot.lane.b32.xlu1 %v7556_v50, %s3535_s30  ;;  %v7579_v40 = vld [vmem:[#allocation31_spill] sm:$0xff]  ;;  %v7581_v46 = vld [vmem:[#allocation36_spill] sm:$0xff] }
  0xfb   : > { %v793_v41 = vmul.f32 %v7570_v38, %v778_v13  ;;  %v811_v60 = vmul.f32 %v7571_v57, %v778_v13  ;;  %v829_v15 = vmul.f32 %v7572_v49, %v778_v13  ;;  %v735_v3 = vadd.f32 %v7578_v8, %v575_v28 }
  0xfc   : > { %v5026_v16 = vadd.f32 %v794_v33, %v628_v21  ;;  %v5028_v29 = vadd.f32 %v812_v10, %v681_v9  ;;  %v5030_v58 = vadd.f32 %v830_v18, %v734_v51  ;;  %1703 = vrot.lane.b32.xlu0 %v4401_v54, %s3535_s30  ;;  %v632_v27 = vadd.f32 %v7579_v40, %v542_v39  ;;  %v784_v50 = vpop.permute.xlu1 %783 }
  0xfd   : > { %v5035_v53 = vadd.f32 %v793_v41, %v627_v43  ;;  %v5037_v36 = vadd.f32 %v811_v60, %v680_v24  ;;  %v5039_v4 = vadd.f32 %v829_v15, %v733_v31  ;;  %v685_v28 = vadd.f32 %v7580_v32, %v560_v1  ;;  %v782_v44 = vpop.permute.xlu0 %781  ;;  %v7582_v31 = vld [vmem:[#allocation33_spill] sm:$0xff]  ;;  %v7584_v60 = vld [vmem:[#allocation35_spill] sm:$0xff] }
  0xfe   : > { %v796_v21 = vmul.f32 %v7570_v38, %v784_v50  ;;  %v814_v9 = vmul.f32 %v7571_v57, %v784_v50  ;;  %v832_v51 = vmul.f32 %v7572_v49, %v784_v50  ;;  %v738_v54 = vadd.f32 %v7581_v46, %v578_v2  ;;  %1709 = vrot.lane.b32.xlu1 %v7561_v14, %s3535_s30  ;;  %v7583_v2 = vld [vmem:[#allocation34_spill] sm:$0xff] }
  0xff   : > { %v795_v39 = vmul.f32 %v7570_v38, %v782_v44  ;;  %v813_v43 = vmul.f32 %v7571_v57, %v782_v44  ;;  %v831_v24 = vmul.f32 %v7572_v49, %v782_v44  ;;  %v631_v1 = vadd.f32 %v7582_v31, %v541_v47 }
 0x100   : > { %v5052_v35 = vadd.f32 %v796_v21, %v630_v17  ;;  %v5054_v33 = vadd.f32 %v814_v9, %v683_v34  ;;  %v5056_v10 = vadd.f32 %v832_v51, %v736_v22  ;;  %1707 = vrot.lane.b32.xlu0 %v7563_v26, %s3535_s30  ;;  %v684_v18 = vadd.f32 %v7583_v2, %v559_v42  ;;  %v788_v14 = vpop.permute.xlu1 %787  ;;  %v7587_v21 = vld [vmem:[#allocation78_spill] sm:$0xff] }
 0x101   : > { %v5061_v13 = vadd.f32 %v795_v39, %v629_v55  ;;  %v5063_v20 = vadd.f32 %v813_v43, %v682_v11  ;;  %v5065_v41 = vadd.f32 %v831_v24, %v735_v3  ;;  %v737_v47 = vadd.f32 %v7584_v60, %v577_v56  ;;  %v786_v15 = vpop.permute.xlu0 %785  ;;  %v7593_v60 = vld [vmem:[#allocation81_spill] sm:$0xff] }
 0x102   : > { %v798_v17 = vmul.f32 %v7570_v38, %v788_v14  ;;  %v816_v34 = vmul.f32 %v7571_v57, %v788_v14  ;;  %v834_v22 = vmul.f32 %v7572_v49, %v788_v14  ;;  %v1563_v26 = vrot.slane %v4909_v0, 1  ;;  %1951 = vrot.lane.b32.xlu1 %v4440_v6, %s3534_s20 }
 0x103   : > { %v797_v42 = vmul.f32 %v7570_v38, %v786_v15  ;;  %v815_v55 = vmul.f32 %v7571_v57, %v786_v15  ;;  %v833_v11 = vmul.f32 %v7572_v49, %v786_v15  ;;  %v7368_v56 = vrot.slane %v4925_v5, 1 }
 0x104   : > { %v5078_v8 = vadd.f32 %v798_v17, %v632_v27  ;;  %v5080_v3 = vadd.f32 %v816_v34, %v685_v28  ;;  %v5082_v40 = vadd.f32 %v834_v22, %v738_v54  ;;  %1949 = vrot.lane.b32.xlu0 %v4443_v7, %s3534_s20  ;;  %v7585_v0 = vrot.slane %v4740_v25, 1  ;;  %v846_v32 = vpop.permute.xlu1 %845  ;;  %v7588_v25 = vld [vmem:[#allocation79_spill] sm:$0xff] }
 0x105   : > { %v7586_v38 = vrot.slane %v4684_v63, 1  ;;  %v5093_v49 = vadd.f32 %v797_v42, %v631_v1  ;;  %v5095_v50 = vadd.f32 %v815_v55, %v684_v18  ;;  %v5097_v27 = vadd.f32 %v833_v11, %v737_v47  ;;  %v7589_v63 = vld [vmem:[#allocation80_spill] sm:$0xff]  ;;  %v844_v46 = vpop.permute.xlu0 %843  ;;  %v7594_v47 = vld [vmem:[#allocation54_spill] sm:$0xff]  ;;  %v7597_v11 = vld [vmem:[#allocation37_spill] sm:$0xff] }
 0x106   : > { %v5102_v28 = vsel %vm599_vm1, %v1563_v26, %v7368_v56  ;;  %v862_v9 = vmul.f32 %v7587_v21, %v846_v32  ;;  %v880_v51 = vmul.f32 %v7588_v25, %v846_v32  ;;  %v898_v44 = vmul.f32 %v7589_v63, %v846_v32  ;;  %1955 = vrot.lane.b32.xlu1 %v4446_v62, %s3534_s20  ;;  %v7599_v32 = vld [vmem:[#allocation39_spill] sm:$0xff] }
 0x107   : > { %v5091_v57 = vsel %vm599_vm1, %v7586_v38, %v7585_v0  ;;  %v7590_v54 = vrot.slane %v4859_v37, 1  ;;  %v7591_v39 = vrot.slane %v4690_v48, 1  ;;  %v861_v24 = vmul.f32 %v7587_v21, %v844_v46  ;;  %v7598_v38 = vld [vmem:[#allocation82_spill] sm:$0xff] }
 0x108   : > { %v879_v31 = vmul.f32 %v7588_v25, %v844_v46  ;;  %v897_v1 = vmul.f32 %v7589_v63, %v844_v46  ;;  %v7592_v2 = vrot.slane %v4713_v30, 1  ;;  %v870_v37 = vadd.f32 %v862_v9, %v5000_v61  ;;  %1953 = vrot.lane.b32.xlu0 %v7593_v60, %s3534_s20  ;;  %v850_v15 = vpop.permute.xlu1 %849  ;;  %v7595_v61 = vld [vmem:[#allocation66_spill] sm:$0xff] }
 0x109   : > { %v5112_v43 = vsel %vm599_vm1, %v7591_v39, %v7590_v54  ;;  %v888_v48 = vadd.f32 %v880_v51, %v5002_v12  ;;  %v906_v14 = vadd.f32 %v898_v44, %v5004_v52  ;;  %v5131_v17 = vmul.f32 %v7594_v47, %v4671_v23  ;;  %v848_v55 = vpop.permute.xlu0 %847  ;;  %v7600_v54 = vld [vmem:[#allocation83_spill] sm:$0xff]  ;;  %v7601_v39 = vld [vmem:[#allocation41_spill] sm:$0xff] }
 0x10a   : > { %v5122_v18 = vsel %vm599_vm1, %v7592_v2, %v1563_v26  ;;  %v869_v34 = vadd.f32 %v861_v24, %v5009_v19  ;;  %v887_v30 = vadd.f32 %v879_v31, %v5011_v59  ;;  %v905_v22 = vadd.f32 %v897_v1, %v5013_v45  ;;  %1959 = vrot.lane.b32.xlu1 %v7598_v38, %s3534_s20 }
 0x10b   : > { %v5138_v26 = vmul.f32 %v7595_v61, %v4671_v23  ;;  %v864_v12 = vmul.f32 %v7587_v21, %v850_v15  ;;  %v882_v52 = vmul.f32 %v7588_v25, %v850_v15  ;;  %v900_v42 = vmul.f32 %v7589_v63, %v850_v15  ;;  %v7602_v15 = vld [vmem:[#allocation42_spill] sm:$0xff] }
 0x10c   : > { %v5144_v0 = vadd.f32 %v7597_v11, %v870_v37  ;;  %v863_v19 = vmul.f32 %v7587_v21, %v848_v55  ;;  %v881_v59 = vmul.f32 %v7588_v25, %v848_v55  ;;  %v899_v45 = vmul.f32 %v7589_v63, %v848_v55  ;;  %1957 = vrot.lane.b32.xlu0 %v7600_v54, %s3534_s20  ;;  %v854_v37 = vpop.permute.xlu1 %853  ;;  %v7605_v55 = vld [vmem:[#allocation44_spill] sm:$0xff] }
 0x10d   : > { %7596 = vst [vmem:[#allocation69_spill] sm:$0xff] %v5138_v26  ;;  %v1013_v9 = vadd.f32 %v7599_v32, %v888_v48  ;;  %v872_v51 = vadd.f32 %v864_v12, %v5026_v16  ;;  %v890_v44 = vadd.f32 %v882_v52, %v5028_v29  ;;  %v908_v46 = vadd.f32 %v900_v42, %v5030_v58  ;;  %v852_v12 = vpop.permute.xlu0 %851  ;;  %v7603_v52 = vld [vmem:[#allocation43_spill] sm:$0xff] }
 0x10e   : > { %v1066_v24 = vadd.f32 %v7601_v39, %v906_v14  ;;  %v871_v31 = vadd.f32 %v863_v19, %v5035_v53  ;;  %v889_v1 = vadd.f32 %v881_v59, %v5037_v36  ;;  %v907_v2 = vadd.f32 %v899_v45, %v5039_v4  ;;  %v7604_v4 = vld [vmem:[#allocation88_spill] sm:$0xff] }
 0x10f   : > { %v959_v48 = vadd.f32 %v7602_v15, %v869_v34  ;;  %v866_v16 = vmul.f32 %v7587_v21, %v854_v37  ;;  %v884_v29 = vmul.f32 %v7588_v25, %v854_v37  ;;  %v902_v58 = vmul.f32 %v7589_v63, %v854_v37  ;;  %1963 = vrot.lane.b32.xlu1 %v7604_v4, %s3534_s20  ;;  %v7606_v45 = vld [vmem:[#allocation84_spill] sm:$0xff] }
 0x110   : > { %v1012_v42 = vadd.f32 %v7603_v52, %v887_v30  ;;  %v865_v14 = vmul.f32 %v7587_v21, %v852_v12  ;;  %v883_v53 = vmul.f32 %v7588_v25, %v852_v12  ;;  %v901_v36 = vmul.f32 %v7589_v63, %v852_v12  ;;  %1961 = vrot.lane.b32.xlu0 %v7606_v45, %s3534_s20  ;;  %v7607_v30 = vld [vmem:[#allocation46_spill] sm:$0xff]  ;;  %v858_v12 = vpop.permute.xlu1 %857  ;;  %v7608_v52 = vld [vmem:[#allocation47_spill] sm:$0xff] }
 0x111   : > { %v1065_v34 = vadd.f32 %v7605_v55, %v905_v22  ;;  %v874_v11 = vadd.f32 %v866_v16, %v5052_v35  ;;  %v892_v19 = vadd.f32 %v884_v29, %v5054_v33  ;;  %v910_v59 = vadd.f32 %v902_v58, %v5056_v10  ;;  %v856_v16 = vpop.permute.xlu0 %855  ;;  %v7609_v29 = vld [vmem:[#allocation50_spill] sm:$0xff] }
 0x112   : > { %v962_v32 = vadd.f32 %v7607_v30, %v872_v51  ;;  %v873_v39 = vadd.f32 %v865_v14, %v5061_v13  ;;  %v891_v37 = vadd.f32 %v883_v53, %v5063_v20  ;;  %v909_v15 = vadd.f32 %v901_v36, %v5065_v41  ;;  %v7610_v41 = vld [vmem:[#allocation45_spill] sm:$0xff] }
 0x113   : > { %v1015_v22 = vadd.f32 %v7608_v52, %v890_v44  ;;  %v868_v35 = vmul.f32 %v7587_v21, %v858_v12  ;;  %v886_v33 = vmul.f32 %v7588_v25, %v858_v12  ;;  %v904_v10 = vmul.f32 %v7589_v63, %v858_v12  ;;  %2021 = vrot.lane.b32.xlu1 %v4440_v6, %s3535_s30  ;;  %v7612_v30 = vld [vmem:[#allocation49_spill] sm:$0xff]  ;;  %v7614_v52 = vld [vmem:[#allocation86_spill] sm:$0xff] }
 0x114   : > { %v1068_v58 = vadd.f32 %v7609_v29, %v908_v46  ;;  %v867_v51 = vmul.f32 %v7587_v21, %v856_v16  ;;  %v885_v13 = vmul.f32 %v7588_v25, %v856_v16  ;;  %v903_v20 = vmul.f32 %v7589_v63, %v856_v16  ;;  %2019 = vrot.lane.b32.xlu0 %v4443_v7, %s3535_s30  ;;  %v7611_v46 = vld [vmem:[#allocation48_spill] sm:$0xff]  ;;  %v1101_v6 = vpop.permute.xlu1 %1100  ;;  %v7613_v12 = vld [vmem:[#allocation85_spill] sm:$0xff] }
 0x115   : > { %v961_v44 = vadd.f32 %v7610_v41, %v871_v31  ;;  %v876_v14 = vadd.f32 %v868_v35, %v5078_v8  ;;  %v894_v53 = vadd.f32 %v886_v33, %v5080_v3  ;;  %v912_v36 = vadd.f32 %v904_v10, %v5082_v40  ;;  %v7615_v35 = vld [vmem:[#allocation87_spill] sm:$0xff]  ;;  %v1099_v33 = vpop.permute.xlu0 %1098 }
 0x116   : > { %v1014_v21 = vadd.f32 %v7611_v46, %v889_v1  ;;  %v875_v25 = vadd.f32 %v867_v51, %v5093_v49  ;;  %v893_v63 = vadd.f32 %v885_v13, %v5095_v50  ;;  %v911_v55 = vadd.f32 %v903_v20, %v5097_v27  ;;  %v7616_v10 = vld [vmem:[#allocation51_spill] sm:$0xff] }
 0x117   : > { %v1067_v31 = vadd.f32 %v7612_v30, %v907_v2  ;;  %v1117_v8 = vmul.f32 %v7613_v12, %v1101_v6  ;;  %v1135_v3 = vmul.f32 %v7614_v52, %v1101_v6  ;;  %v1153_v40 = vmul.f32 %v7615_v35, %v1101_v6  ;;  %2025 = vrot.lane.b32.xlu1 %v4446_v62, %s3535_s30  ;;  %v7617_v27 = vld [vmem:[#allocation55_spill] sm:$0xff] }
 0x118   : > { %v964_v7 = vadd.f32 %v7616_v10, %v874_v11  ;;  %v1116_v1 = vmul.f32 %v7613_v12, %v1099_v33  ;;  %v1134_v49 = vmul.f32 %v7614_v52, %v1099_v33  ;;  %v1152_v50 = vmul.f32 %v7615_v35, %v1099_v33  ;;  %2023 = vrot.lane.b32.xlu0 %v7593_v60, %s3535_s30  ;;  %v7618_v11 = vld [vmem:[#allocation57_spill] sm:$0xff]  ;;  %v1105_v62 = vpop.permute.xlu1 %1104 }
 0x119   : > { %v1017_v2 = vadd.f32 %v7617_v27, %v892_v19  ;;  %v5213_v16 = vadd.f32 %v1117_v8, %v5144_v0  ;;  %v5215_v29 = vadd.f32 %v1135_v3, %v1013_v9  ;;  %v5217_v51 = vadd.f32 %v1153_v40, %v1066_v24  ;;  %v7619_v19 = vld [vmem:[#allocation52_spill] sm:$0xff]  ;;  %v1103_v30 = vpop.permute.xlu0 %1102  ;;  %v7620_v8 = vld [vmem:[#allocation53_spill] sm:$0xff] }
 0x11a   : > { %v1070_v13 = vadd.f32 %v7618_v11, %v910_v59  ;;  %v5222_v20 = vadd.f32 %v1116_v1, %v959_v48  ;;  %v5224_v41 = vadd.f32 %v1134_v49, %v1012_v42  ;;  %v5226_v46 = vadd.f32 %v1152_v50, %v1065_v34  ;;  %v7621_v34 = vld [vmem:[#allocation56_spill] sm:$0xff]  ;;  %v7623_v27 = vld [vmem:[#allocation61_spill] sm:$0xff] }
 0x11b   : > { %v963_v6 = vadd.f32 %v7619_v19, %v873_v39  ;;  %v1119_v0 = vmul.f32 %v7613_v12, %v1105_v62  ;;  %v1137_v9 = vmul.f32 %v7614_v52, %v1105_v62  ;;  %v1155_v24 = vmul.f32 %v7615_v35, %v1105_v62  ;;  %2029 = vrot.lane.b32.xlu1 %v7598_v38, %s3535_s30  ;;  %v7624_v62 = vld [vmem:[#allocation62_spill] sm:$0xff] }
 0x11c   : > { %v1016_v60 = vadd.f32 %v7620_v8, %v891_v37  ;;  %v1118_v59 = vmul.f32 %v7613_v12, %v1103_v30  ;;  %v1136_v48 = vmul.f32 %v7614_v52, %v1103_v30  ;;  %v1154_v42 = vmul.f32 %v7615_v35, %v1103_v30  ;;  %2027 = vrot.lane.b32.xlu0 %v7600_v54, %s3535_s30  ;;  %v7622_v37 = vld [vmem:[#allocation58_spill] sm:$0xff]  ;;  %v1109_v38 = vpop.permute.xlu1 %1108 }
 0x11d   : > { %v1069_v39 = vadd.f32 %v7621_v34, %v909_v15  ;;  %v5239_v3 = vadd.f32 %v1119_v0, %v962_v32  ;;  %v5241_v40 = vadd.f32 %v1137_v9, %v1015_v22  ;;  %v5243_v33 = vadd.f32 %v1155_v24, %v1068_v58  ;;  %v1107_v11 = vpop.permute.xlu0 %1106  ;;  %v7628_v34 = vld [vmem:[#allocation96_spill] sm:$0xff] }
 0x11e   : > { %v966_v10 = vadd.f32 %v7622_v37, %v876_v14  ;;  %v5248_v1 = vadd.f32 %v1118_v59, %v961_v44  ;;  %v5250_v49 = vadd.f32 %v1136_v48, %v1014_v21  ;;  %v5252_v50 = vadd.f32 %v1154_v42, %v1067_v31  ;;  %v7625_v31 = vld [vmem:[#allocation59_spill] sm:$0xff] }
 0x11f   : > { %v1019_v15 = vadd.f32 %v7623_v27, %v894_v53  ;;  %v1121_v32 = vmul.f32 %v7613_v12, %v1109_v38  ;;  %v1139_v22 = vmul.f32 %v7614_v52, %v1109_v38  ;;  %v1157_v58 = vmul.f32 %v7615_v35, %v1109_v38  ;;  %2033 = vrot.lane.b32.xlu1 %v7604_v4, %s3535_s30  ;;  %v7627_v48 = vld [vmem:[#allocation63_spill] sm:$0xff] }
 0x120   : > { %v1072_v54 = vadd.f32 %v7624_v62, %v912_v36  ;;  %v1120_v14 = vmul.f32 %v7613_v12, %v1107_v11  ;;  %v1138_v44 = vmul.f32 %v7614_v52, %v1107_v11  ;;  %v1156_v21 = vmul.f32 %v7615_v35, %v1107_v11  ;;  %2031 = vrot.lane.b32.xlu0 %v7606_v45, %s3535_s30  ;;  %v7626_v36 = vld [vmem:[#allocation60_spill] sm:$0xff]  ;;  %v1113_v4 = vpop.permute.xlu1 %1112  ;;  %v7633_v62 = vld [vmem:[#allocation90_spill] sm:$0xff] }
 0x121   : > { %v965_v53 = vadd.f32 %v7625_v31, %v875_v25  ;;  %v5265_v19 = vadd.f32 %v1121_v32, %v964_v7  ;;  %v5267_v0 = vadd.f32 %v1139_v22, %v1017_v2  ;;  %v5269_v9 = vadd.f32 %v1157_v58, %v1070_v13  ;;  %v1111_v42 = vpop.permute.xlu0 %1110  ;;  %v7630_v32 = vld [vmem:[#allocation136_spill] sm:$0xff] }
 0x122   : > { %v1018_v24 = vadd.f32 %v7626_v36, %v893_v63  ;;  %v5274_v30 = vadd.f32 %v1120_v14, %v963_v6  ;;  %v5276_v8 = vadd.f32 %v1138_v44, %v1016_v60  ;;  %v5278_v59 = vadd.f32 %v1156_v21, %v1069_v39  ;;  %v7629_v39 = vld [vmem:[#allocation101_spill] sm:$0xff]  ;;  %v7634_v14 = vld [vmem:[#allocation91_spill] sm:$0xff] }
 0x123   : > { %v1071_v25 = vadd.f32 %v7627_v48, %v911_v55  ;;  %v1123_v7 = vmul.f32 %v7613_v12, %v1113_v4  ;;  %v1141_v2 = vmul.f32 %v7614_v52, %v1113_v4  ;;  %v1159_v13 = vmul.f32 %v7615_v35, %v1113_v4  ;;  %2145 = vrot.lane.b32.xlu1 %v7628_v34, %s3534_s20  ;;  %v7635_v4 = vld [vmem:[#allocation110_spill] sm:$0xff] }
 0x124   : > { %v7369_v45 = vrot.slane %v5131_v17, 1  ;;  %v1122_v63 = vmul.f32 %v7613_v12, %v1111_v42  ;;  %v1140_v6 = vmul.f32 %v7614_v52, %v1111_v42  ;;  %v1158_v60 = vmul.f32 %v7615_v35, %v1111_v42  ;;  %2143 = vrot.lane.b32.xlu0 %v7629_v39, %s3534_s20  ;;  %v1171_v52 = vpop.permute.xlu1 %1170 }
 0x125   : > { %v7367_v55 = vrot.slane %v5138_v26, 1  ;;  %v5293_v37 = vadd.f32 %v1123_v7, %v966_v10  ;;  %v5295_v38 = vadd.f32 %v1141_v2, %v1019_v15  ;;  %v5297_v27 = vadd.f32 %v1159_v13, %v1072_v54  ;;  %v7632_v15 = vld [vmem:[#allocation89_spill] sm:$0xff]  ;;  %v1169_v21 = vpop.permute.xlu0 %1168 }
 0x126   : > { %v5301_v12 = vmul.f32 %v7594_v47, %v7630_v32  ;;  %v5303_v35 = vadd.f32 %v1122_v63, %v965_v53  ;;  %v5305_v22 = vadd.f32 %v1140_v6, %v1018_v24  ;;  %v5307_v58 = vadd.f32 %v1158_v60, %v1071_v25  ;;  %v7636_v13 = vld [vmem:[#allocation105_spill] sm:$0xff] }
 0x127   : > { %v5314_v10 = vsel %vm599_vm1, %v7369_v45, %v7367_v55  ;;  %v1187_v11 = vmul.f32 %v7632_v15, %v1171_v52  ;;  %v1205_v54 = vmul.f32 %v7633_v62, %v1171_v52  ;;  %v1223_v44 = vmul.f32 %v7634_v14, %v1171_v52  ;;  %2149 = vrot.lane.b32.xlu1 %v7635_v4, %s3534_s20 }
 0x128   : > { %7631 = vst [vmem:[#allocation73_spill] sm:$0xff] %v5314_v10  ;;  %v5321_v31 = vmul.f32 %v7595_v61, %v7630_v32  ;;  %v1186_v53 = vmul.f32 %v7632_v15, %v1169_v21  ;;  %v1204_v36 = vmul.f32 %v7633_v62, %v1169_v21  ;;  %v1222_v24 = vmul.f32 %v7634_v14, %v1169_v21  ;;  %v1175_v52 = vpop.permute.xlu1 %1174  ;;  %v7637_v21 = vld [vmem:[#allocation138_spill] sm:$0xff]  ;;  %v7643_v32 = vld [vmem:[#allocation95_spill] sm:$0xff]  ;;  %v7649_v10 = vld [vmem:[#allocation100_spill] sm:$0xff] }
 0x129   : > { %v1195_v25 = vadd.f32 %v1187_v11, %v5213_v16  ;;  %v1213_v7 = vadd.f32 %v1205_v54, %v5215_v29  ;;  %v1231_v2 = vadd.f32 %v1223_v44, %v5217_v51  ;;  %2147 = vrot.lane.b32.xlu0 %v7636_v13, %s3534_s20  ;;  %v5340_v55 = vmul.f32 %v7594_v47, %v7637_v21  ;;  %v1173_v11 = vpop.permute.xlu0 %1172  ;;  %v7638_v54 = vld [vmem:[#allocation92_spill] sm:$0xff] }
 0x12a   : > { %v1194_v63 = vadd.f32 %v1186_v53, %v5222_v20  ;;  %v1212_v6 = vadd.f32 %v1204_v36, %v5224_v41  ;;  %v1230_v60 = vadd.f32 %v1222_v24, %v5226_v46  ;;  %v1189_v16 = vmul.f32 %v7632_v15, %v1175_v52  ;;  %v7639_v53 = vld [vmem:[#allocation119_spill] sm:$0xff]  ;;  %v7640_v36 = vld [vmem:[#allocation93_spill] sm:$0xff] }
 0x12b   : > { %v1207_v29 = vmul.f32 %v7633_v62, %v1175_v52  ;;  %v1225_v51 = vmul.f32 %v7634_v14, %v1175_v52  ;;  %v5346_v44 = vadd.f32 %v7638_v54, %v1195_v25  ;;  %v1188_v20 = vmul.f32 %v7632_v15, %v1173_v11  ;;  %2153 = vrot.lane.b32.xlu1 %v7639_v53, %s3534_s20  ;;  %v7641_v25 = vld [vmem:[#allocation112_spill] sm:$0xff]  ;;  %v7642_v54 = vld [vmem:[#allocation94_spill] sm:$0xff] }
 0x12c   : > { %v1206_v41 = vmul.f32 %v7633_v62, %v1173_v11  ;;  %v1224_v46 = vmul.f32 %v7634_v14, %v1173_v11  ;;  %v1267_v24 = vadd.f32 %v7640_v36, %v1213_v7  ;;  %v1197_v56 = vadd.f32 %v1189_v16, %v5239_v3  ;;  %v1179_v26 = vpop.permute.xlu1 %1178 }
 0x12d   : > { %v1215_v45 = vadd.f32 %v1207_v29, %v5241_v40  ;;  %v1233_v52 = vadd.f32 %v1225_v51, %v5243_v33  ;;  %2151 = vrot.lane.b32.xlu0 %v7641_v25, %s3534_s20  ;;  %v1285_v48 = vadd.f32 %v7642_v54, %v1231_v2  ;;  %v1196_v42 = vadd.f32 %v1188_v20, %v5248_v1  ;;  %v1177_v16 = vpop.permute.xlu0 %1176  ;;  %v7644_v29 = vld [vmem:[#allocation97_spill] sm:$0xff]  ;;  %v7646_v20 = vld [vmem:[#allocation98_spill] sm:$0xff] }
 0x12e   : > { %v1214_v11 = vadd.f32 %v1206_v41, %v5250_v49  ;;  %v1232_v47 = vadd.f32 %v1224_v46, %v5252_v50  ;;  %v1248_v7 = vadd.f32 %v7643_v32, %v1194_v63  ;;  %v1191_v3 = vmul.f32 %v7632_v15, %v1179_v26  ;;  %v7645_v50 = vld [vmem:[#allocation137_spill] sm:$0xff]  ;;  %v7647_v46 = vld [vmem:[#allocation123_spill] sm:$0xff] }
 0x12f   : > { %v1209_v40 = vmul.f32 %v7633_v62, %v1179_v26  ;;  %v1227_v33 = vmul.f32 %v7634_v14, %v1179_v26  ;;  %v1266_v51 = vadd.f32 %v7644_v29, %v1212_v6  ;;  %v1190_v2 = vmul.f32 %v7632_v15, %v1177_v16  ;;  %2157 = vrot.lane.b32.xlu1 %v7645_v50, %s3534_s20  ;;  %v7648_v6 = vld [vmem:[#allocation99_spill] sm:$0xff] }
 0x130   : > { %v1208_v1 = vmul.f32 %v7633_v62, %v1177_v16  ;;  %v1226_v49 = vmul.f32 %v7634_v14, %v1177_v16  ;;  %v1284_v32 = vadd.f32 %v7646_v20, %v1230_v60  ;;  %v1199_v63 = vadd.f32 %v1191_v3, %v5265_v19  ;;  %v1183_v23 = vpop.permute.xlu1 %1182  ;;  %v7653_v20 = vld [vmem:[#allocation108_spill] sm:$0xff] }
 0x131   : > { %v1217_v41 = vadd.f32 %v1209_v40, %v5267_v0  ;;  %v1235_v26 = vadd.f32 %v1227_v33, %v5269_v9  ;;  %2155 = vrot.lane.b32.xlu0 %v7647_v46, %s3534_s20  ;;  %v1251_v36 = vadd.f32 %v7648_v6, %v1197_v56  ;;  %v1198_v54 = vadd.f32 %v1190_v2, %v5274_v30  ;;  %v1181_v3 = vpop.permute.xlu0 %1180  ;;  %v7650_v40 = vld [vmem:[#allocation102_spill] sm:$0xff] }
 0x132   : > { %v1216_v16 = vadd.f32 %v1208_v1, %v5276_v8  ;;  %v1234_v29 = vadd.f32 %v1226_v49, %v5278_v59  ;;  %v1269_v60 = vadd.f32 %v7649_v10, %v1215_v45  ;;  %v1193_v19 = vmul.f32 %v7632_v15, %v1183_v23  ;;  %v7651_v59 = vld [vmem:[#allocation103_spill] sm:$0xff]  ;;  %v7654_v6 = vld [vmem:[#allocation106_spill] sm:$0xff] }
 0x133   : > { %v1211_v0 = vmul.f32 %v7633_v62, %v1183_v23  ;;  %v1229_v9 = vmul.f32 %v7634_v14, %v1183_v23  ;;  %v1287_v33 = vadd.f32 %v7650_v40, %v1233_v52  ;;  %v1192_v56 = vmul.f32 %v7632_v15, %v1181_v3  ;;  %2215 = vrot.lane.b32.xlu1 %v7628_v34, %s3535_s30  ;;  %v7652_v52 = vld [vmem:[#allocation104_spill] sm:$0xff] }
 0x134   : > { %v1210_v30 = vmul.f32 %v7633_v62, %v1181_v3  ;;  %v1228_v8 = vmul.f32 %v7634_v14, %v1181_v3  ;;  %v1250_v45 = vadd.f32 %v7651_v59, %v1196_v42  ;;  %v1201_v10 = vadd.f32 %v1193_v19, %v5293_v37  ;;  %v1295_v49 = vpop.permute.xlu1 %1294  ;;  %v7655_v19 = vld [vmem:[#allocation107_spill] sm:$0xff]  ;;  %v7657_v3 = vld [vmem:[#allocation109_spill] sm:$0xff] }
 0x135   : > { %v1219_v2 = vadd.f32 %v1211_v0, %v5295_v38  ;;  %v1237_v23 = vadd.f32 %v1229_v9, %v5297_v27  ;;  %2213 = vrot.lane.b32.xlu0 %v7629_v39, %s3535_s30  ;;  %v1268_v15 = vadd.f32 %v7652_v52, %v1214_v11  ;;  %v1200_v62 = vadd.f32 %v1192_v56, %v5303_v35  ;;  %v7656_v0 = vld [vmem:[#allocation113_spill] sm:$0xff]  ;;  %v1293_v9 = vpop.permute.xlu0 %1292 }
 0x136   : > { %v1218_v14 = vadd.f32 %v1210_v30, %v5305_v22  ;;  %v1236_v1 = vadd.f32 %v1228_v8, %v5307_v58  ;;  %v1286_v42 = vadd.f32 %v7653_v20, %v1232_v47  ;;  %v1311_v37 = vmul.f32 %v7654_v6, %v1295_v49  ;;  %v7658_v58 = vld [vmem:[#allocation111_spill] sm:$0xff] }
 0x137   : > { %v1329_v38 = vmul.f32 %v7655_v19, %v1295_v49  ;;  %v1347_v27 = vmul.f32 %v7656_v0, %v1295_v49  ;;  %v1253_v40 = vadd.f32 %v7657_v3, %v1199_v63  ;;  %v1310_v11 = vmul.f32 %v7654_v6, %v1293_v9  ;;  %2219 = vrot.lane.b32.xlu1 %v7635_v4, %s3535_s30  ;;  %v7659_v63 = vld [vmem:[#allocation114_spill] sm:$0xff] }
 0x138   : > { %v1328_v35 = vmul.f32 %v7655_v19, %v1293_v9  ;;  %v1346_v22 = vmul.f32 %v7656_v0, %v1293_v9  ;;  %v1271_v47 = vadd.f32 %v7658_v58, %v1217_v41  ;;  %v5415_v56 = vadd.f32 %v1311_v37, %v5346_v44  ;;  %v1299_v9 = vpop.permute.xlu1 %1298  ;;  %v7660_v41 = vld [vmem:[#allocation115_spill] sm:$0xff] }
 0x139   : > { %v5417_v30 = vadd.f32 %v1329_v38, %v1267_v24  ;;  %v5419_v8 = vadd.f32 %v1347_v27, %v1285_v48  ;;  %2217 = vrot.lane.b32.xlu0 %v7636_v13, %s3535_s30  ;;  %v1289_v59 = vadd.f32 %v7659_v63, %v1235_v26  ;;  %v5424_v52 = vadd.f32 %v1310_v11, %v1248_v7  ;;  %v1297_v37 = vpop.permute.xlu0 %1296  ;;  %v7661_v38 = vld [vmem:[#allocation116_spill] sm:$0xff]  ;;  %v7691_v13 = vld [vmem:[#allocation142_spill] sm:$0xff] }
 0x13a   : > { %v5426_v49 = vadd.f32 %v1328_v35, %v1266_v51  ;;  %v5428_v20 = vadd.f32 %v1346_v22, %v1284_v32  ;;  %v1252_v3 = vadd.f32 %v7660_v41, %v1198_v54  ;;  %v1313_v44 = vmul.f32 %v7654_v6, %v1299_v9  ;;  %v7662_v32 = vld [vmem:[#allocation117_spill] sm:$0xff] }
 0x13b   : > { %v1331_v24 = vmul.f32 %v7655_v19, %v1299_v9  ;;  %v1349_v48 = vmul.f32 %v7656_v0, %v1299_v9  ;;  %v1270_v27 = vadd.f32 %v7661_v38, %v1216_v16  ;;  %v1312_v26 = vmul.f32 %v7654_v6, %v1297_v37  ;;  %2223 = vrot.lane.b32.xlu1 %v7639_v53, %s3535_s30  ;;  %v7663_v16 = vld [vmem:[#allocation118_spill] sm:$0xff]  ;;  %v7664_v38 = vld [vmem:[#allocation120_spill] sm:$0xff] }
 0x13c   : > { %v1330_v7 = vmul.f32 %v7655_v19, %v1297_v37  ;;  %v1348_v51 = vmul.f32 %v7656_v0, %v1297_v37  ;;  %v1288_v54 = vadd.f32 %v7662_v32, %v1234_v29  ;;  %v5441_v11 = vadd.f32 %v1313_v44, %v1251_v36  ;;  %v1303_v37 = vpop.permute.xlu1 %1302 }
 0x13d   : > { %v5443_v35 = vadd.f32 %v1331_v24, %v1269_v60  ;;  %v5445_v22 = vadd.f32 %v1349_v48, %v1287_v33  ;;  %2221 = vrot.lane.b32.xlu0 %v7641_v25, %s3535_s30  ;;  %v1255_v58 = vadd.f32 %v7663_v16, %v1201_v10  ;;  %v5450_v63 = vadd.f32 %v1312_v26, %v1250_v45  ;;  %v1301_v44 = vpop.permute.xlu0 %1300  ;;  %v7665_v24 = vld [vmem:[#allocation121_spill] sm:$0xff] }
 0x13e   : > { %v5452_v9 = vadd.f32 %v1330_v7, %v1268_v15  ;;  %v5454_v41 = vadd.f32 %v1348_v51, %v1286_v42  ;;  %v1273_v29 = vadd.f32 %v7664_v38, %v1219_v2  ;;  %v1315_v36 = vmul.f32 %v7654_v6, %v1303_v37  ;;  %v7666_v42 = vld [vmem:[#allocation122_spill] sm:$0xff] }
 0x13f   : > { %v1333_v60 = vmul.f32 %v7655_v19, %v1303_v37  ;;  %v1351_v33 = vmul.f32 %v7656_v0, %v1303_v37  ;;  %v1291_v48 = vadd.f32 %v7665_v24, %v1237_v23  ;;  %v1314_v10 = vmul.f32 %v7654_v6, %v1301_v44  ;;  %2227 = vrot.lane.b32.xlu1 %v7645_v50, %s3535_s30  ;;  %v7667_v23 = vld [vmem:[#allocation124_spill] sm:$0xff]  ;;  %v7668_v24 = vld [vmem:[#allocation125_spill] sm:$0xff] }
 0x140   : > { %v1332_v45 = vmul.f32 %v7655_v19, %v1301_v44  ;;  %v1350_v15 = vmul.f32 %v7656_v0, %v1301_v44  ;;  %v1254_v2 = vadd.f32 %v7666_v42, %v1200_v62  ;;  %v5467_v26 = vadd.f32 %v1315_v36, %v1253_v40  ;;  %v1307_v44 = vpop.permute.xlu1 %1306 }
 0x141   : > { %v5469_v7 = vadd.f32 %v1333_v60, %v1271_v47  ;;  %v5471_v51 = vadd.f32 %v1351_v33, %v1289_v59  ;;  %2225 = vrot.lane.b32.xlu0 %v7647_v46, %s3535_s30  ;;  %v1272_v32 = vadd.f32 %v7667_v23, %v1218_v14  ;;  %v5476_v16 = vadd.f32 %v1314_v10, %v1252_v3  ;;  %v1305_v36 = vpop.permute.xlu0 %1304  ;;  %v7671_v33 = vld [vmem:[#allocation126_spill] sm:$0xff]  ;;  %v7673_v23 = vld [vmem:[#allocation127_spill] sm:$0xff] }
 0x142   : > { %v5478_v37 = vadd.f32 %v1332_v45, %v1270_v27  ;;  %v5480_v38 = vadd.f32 %v1350_v15, %v1288_v54  ;;  %v1290_v62 = vadd.f32 %v7668_v24, %v1236_v1  ;;  %v1317_v40 = vmul.f32 %v7654_v6, %v1307_v44 }
 0x143   : > { %v1335_v47 = vmul.f32 %v7655_v19, %v1307_v44  ;;  %v1353_v59 = vmul.f32 %v7656_v0, %v1307_v44  ;;  %v7669_v60 = vrot.slane %v5321_v31, 1  ;;  %v7670_v14 = vrot.slane %v5301_v12, 1  ;;  %2478 = vrot.lane.b32.xlu1 %v7671_v33, %s3534_s20 }
 0x144   : > { %v1316_v27 = vmul.f32 %v7654_v6, %v1305_v36  ;;  %v1334_v54 = vmul.f32 %v7655_v19, %v1305_v36  ;;  %v1352_v1 = vmul.f32 %v7656_v0, %v1305_v36  ;;  %v5500_v10 = vmul.f32 %v7595_v61, %v7637_v21  ;;  %v1365_v24 = vpop.permute.xlu1 %1364  ;;  %v7678_v61 = vld [vmem:[#allocation151_spill] sm:$0xff] }
 0x145   : > { %v5491_v3 = vsel %vm599_vm1, %v7670_v14, %v7669_v60  ;;  %v5502_v45 = vadd.f32 %v1317_v40, %v1255_v58  ;;  %v5504_v15 = vadd.f32 %v1335_v47, %v1273_v29  ;;  %v5506_v42 = vadd.f32 %v1353_v59, %v1291_v48  ;;  %2476 = vrot.lane.b32.xlu0 %v7673_v23, %s3534_s20  ;;  %v7674_v58 = vld [vmem:[#allocation128_spill] sm:$0xff]  ;;  %v7675_v29 = vld [vmem:[#allocation129_spill] sm:$0xff]  ;;  %v7676_v48 = vld [vmem:[#allocation130_spill] sm:$0xff]  ;;  %v1363_v60 = vpop.permute.xlu0 %1362 }
 0x146   : > { %7672 = vst [vmem:[#allocation70_spill] sm:$0xff] %v5500_v10  ;;  %v1567_v6 = vrot.slane %v5340_v55, 1  ;;  %v5511_v19 = vadd.f32 %v1316_v27, %v1254_v2  ;;  %v5513_v0 = vadd.f32 %v1334_v54, %v1272_v32  ;;  %v5515_v44 = vadd.f32 %v1352_v1, %v1290_v62  ;;  %v7680_v54 = vld [vmem:[#allocation131_spill] sm:$0xff] }
 0x147   : > { %v7379_v36 = vrot.slane %v5500_v10, 1  ;;  %v1381_v40 = vmul.f32 %v7674_v58, %v1365_v24  ;;  %v1399_v47 = vmul.f32 %v7675_v29, %v1365_v24  ;;  %v1417_v59 = vmul.f32 %v7676_v48, %v1365_v24  ;;  %2482 = vrot.lane.b32.xlu1 %v7680_v54, %s3534_s20  ;;  %v7697_v10 = vld [vmem:[#allocation68_spill] sm:$0xff] }
 0x148   : > { %v7677_v14 = vrot.slane %v5131_v17, 1  ;;  %v7679_v55 = vrot.slane %v7678_v61, 1  ;;  %v1380_v32 = vmul.f32 %v7674_v58, %v1363_v60  ;;  %v1398_v62 = vmul.f32 %v7675_v29, %v1363_v60 }
 0x149   : > { %v1416_v27 = vmul.f32 %v7676_v48, %v1363_v60  ;;  %v5536_v1 = vsel %vm599_vm1, %v1567_v6, %v7379_v36  ;;  %v1389_v17 = vadd.f32 %v1381_v40, %v5415_v56  ;;  %v1407_v61 = vadd.f32 %v1399_v47, %v5417_v30  ;;  %v7683_v60 = vld [vmem:[#allocation153_spill] sm:$0xff]  ;;  %v1369_v40 = vpop.permute.xlu1 %1368 }
 0x14a   : > { %v5526_v2 = vsel %vm599_vm1, %v7679_v55, %v7677_v14  ;;  %v1425_v24 = vadd.f32 %v1417_v59, %v5419_v8  ;;  %v7681_v14 = vld [vmem:[#allocation132_spill] sm:$0xff]  ;;  %v7682_v55 = vrot.slane %v5301_v12, 1  ;;  %v7684_v50 = vrot.slane %v7683_v60, 1 }
 0x14b   : > { %2480 = vrot.lane.b32.xlu0 %v7681_v14, %s3534_s20  ;;  %v1388_v53 = vadd.f32 %v1380_v32, %v5424_v52  ;;  %v1406_v36 = vadd.f32 %v1398_v62, %v5426_v49  ;;  %v1424_v56 = vadd.f32 %v1416_v27, %v5428_v20  ;;  %v7685_v30 = vrot.slane %v4925_v5, 1  ;;  %v7687_v5 = vld [vmem:[#allocation133_spill] sm:$0xff] }
 0x14c   : > { %v5548_v46 = vsel %vm599_vm1, %v7684_v50, %v7682_v55  ;;  %v1383_v47 = vmul.f32 %v7674_v58, %v1369_v40  ;;  %v1401_v12 = vmul.f32 %v7675_v29, %v1369_v40  ;;  %v1419_v59 = vmul.f32 %v7676_v48, %v1369_v40  ;;  %v1367_v50 = vpop.permute.xlu0 %1366  ;;  %v7686_v55 = vld [vmem:[#allocation140_spill] sm:$0xff]  ;;  %2486 = vrot.lane.b32.xlu1 %v7687_v5, %s3534_s20 }
 0x14d   : > { %v5556_v8 = vsel %vm599_vm1, %v7685_v30, %v1567_v6  ;;  %v5562_v60 = vadd.f32 %v7686_v55, %v1389_v17  ;;  %v1382_v52 = vmul.f32 %v7674_v58, %v1367_v50  ;;  %v1400_v49 = vmul.f32 %v7675_v29, %v1367_v50  ;;  %v7688_v6 = vld [vmem:[#allocation141_spill] sm:$0xff]  ;;  %v7689_v17 = vld [vmem:[#allocation134_spill] sm:$0xff]  ;;  %v1373_v39 = vpop.permute.xlu1 %1372 }
 0x14e   : > { %v1418_v20 = vmul.f32 %v7676_v48, %v1367_v50  ;;  %v1531_v32 = vadd.f32 %v7688_v6, %v1407_v61  ;;  %v1391_v62 = vadd.f32 %v1383_v47, %v5441_v11  ;;  %v1409_v27 = vadd.f32 %v1401_v12, %v5443_v35  ;;  %v7690_v30 = vld [vmem:[#allocation145_spill] sm:$0xff]  ;;  %v7692_v12 = vld [vmem:[#allocation143_spill] sm:$0xff] }
 0x14f   : > { %v1427_v40 = vadd.f32 %v1419_v59, %v5445_v22  ;;  %2484 = vrot.lane.b32.xlu0 %v7689_v17, %s3534_s20  ;;  %v1584_v55 = vadd.f32 %v7690_v30, %v1425_v24  ;;  %v1390_v25 = vadd.f32 %v1382_v52, %v5450_v63  ;;  %v1408_v50 = vadd.f32 %v1400_v49, %v5452_v9  ;;  %v7694_v52 = vld [vmem:[#allocation150_spill] sm:$0xff] }
 0x150   : > { %v1426_v4 = vadd.f32 %v1418_v20, %v5454_v41  ;;  %v1477_v61 = vadd.f32 %v7691_v13, %v1388_v53  ;;  %v1385_v11 = vmul.f32 %v7674_v58, %v1373_v39  ;;  %v1403_v35 = vmul.f32 %v7675_v29, %v1373_v39  ;;  %v1371_v47 = vpop.permute.xlu0 %1370  ;;  %v7693_v41 = vld [vmem:[#allocation146_spill] sm:$0xff]  ;;  %v7695_v20 = vld [vmem:[#allocation139_spill] sm:$0xff] }
 0x151   : > { %v1421_v22 = vmul.f32 %v7676_v48, %v1373_v39  ;;  %v1530_v59 = vadd.f32 %v7692_v12, %v1406_v36  ;;  %v1384_v24 = vmul.f32 %v7674_v58, %v1371_v47  ;;  %v1402_v63 = vmul.f32 %v7675_v29, %v1371_v47  ;;  %2490 = vrot.lane.b32.xlu1 %v7693_v41, %s3534_s20  ;;  %v7696_v36 = vld [vmem:[#allocation152_spill] sm:$0xff]  ;;  %v1377_v34 = vpop.permute.xlu1 %1376 }
 0x152   : > { %v1420_v9 = vmul.f32 %v7676_v48, %v1371_v47  ;;  %v1583_v13 = vadd.f32 %v7694_v52, %v1424_v56  ;;  %v1393_v53 = vadd.f32 %v1385_v11, %v5467_v26  ;;  %v1411_v49 = vadd.f32 %v1403_v35, %v5469_v7 }
 0x153   : > { %v1429_v39 = vadd.f32 %v1421_v22, %v5471_v51  ;;  %2488 = vrot.lane.b32.xlu0 %v7695_v20, %s3534_s20  ;;  %v1480_v6 = vadd.f32 %v7696_v36, %v1391_v62  ;;  %v1392_v30 = vadd.f32 %v1384_v24, %v5476_v16  ;;  %v1410_v47 = vadd.f32 %v1402_v63, %v5478_v37 }
 0x154   : > { %v1428_v12 = vadd.f32 %v1420_v9, %v5480_v38  ;;  %v1533_v56 = vadd.f32 %v7697_v10, %v1409_v27  ;;  %v1387_v26 = vmul.f32 %v7674_v58, %v1377_v34  ;;  %v1405_v7 = vmul.f32 %v7675_v29, %v1377_v34  ;;  %v1375_v11 = vpop.permute.xlu0 %1374 }
 0x155   : > { %v1423_v51 = vmul.f32 %v7676_v48, %v1377_v34  ;;  %v1586_v35 = vadd.f32 %v5102_v28, %v1427_v40  ;;  %v1386_v62 = vmul.f32 %v7674_v58, %v1375_v11  ;;  %v1404_v16 = vmul.f32 %v7675_v29, %v1375_v11  ;;  %2548 = vrot.lane.b32.xlu1 %v7671_v33, %s3535_s30  ;;  %v7699_v29 = vld [vmem:[#allocation148_spill] sm:$0xff]  ;;  %v7700_v40 = vld [vmem:[#allocation149_spill] sm:$0xff] }
 0x156   : > { %v1422_v37 = vmul.f32 %v7676_v48, %v1375_v11  ;;  %v1479_v38 = vadd.f32 %v5091_v57, %v1390_v25  ;;  %v5611_v10 = vadd.f32 %v1387_v26, %v5502_v45  ;;  %v5614_v27 = vadd.f32 %v1405_v7, %v5504_v15  ;;  %v1628_v25 = vpop.permute.xlu1 %1627  ;;  %v7698_v15 = vld [vmem:[#allocation147_spill] sm:$0xff] }
 0x157   : > { %v5617_v34 = vadd.f32 %v1423_v51, %v5506_v42  ;;  %2546 = vrot.lane.b32.xlu0 %v7673_v23, %s3535_s30  ;;  %v1532_v28 = vadd.f32 %v5112_v43, %v1408_v50  ;;  %v5623_v58 = vadd.f32 %v1386_v62, %v5511_v19  ;;  %v5626_v33 = vadd.f32 %v1404_v16, %v5513_v0  ;;  %v7701_v43 = vld [vmem:[#allocation73_spill] sm:$0xff] }
 0x158   : > { %v5629_v57 = vadd.f32 %v1422_v37, %v5515_v44  ;;  %v1585_v45 = vadd.f32 %v5122_v18, %v1426_v4  ;;  %v1644_v42 = vmul.f32 %v7698_v15, %v1628_v25  ;;  %v1662_v48 = vmul.f32 %v7699_v29, %v1628_v25  ;;  %v1626_v22 = vpop.permute.xlu0 %1625 }
 0x159   : > { %v1680_v23 = vmul.f32 %v7700_v40, %v1628_v25  ;;  %v1482_v50 = vadd.f32 %v7701_v43, %v1393_v53  ;;  %v1643_v19 = vmul.f32 %v7698_v15, %v1626_v22  ;;  %v1661_v0 = vmul.f32 %v7699_v29, %v1626_v22  ;;  %2552 = vrot.lane.b32.xlu1 %v7680_v54, %s3535_s30 }
 0x15a   : > { %v1679_v24 = vmul.f32 %v7700_v40, %v1626_v22  ;;  %v1535_v18 = vadd.f32 %v5491_v3, %v1411_v49  ;;  %v5643_v4 = vadd.f32 %v1644_v42, %v5562_v60  ;;  %v5645_v44 = vadd.f32 %v1662_v48, %v1531_v32  ;;  %v1632_v54 = vpop.permute.xlu1 %1631  ;;  %v7705_v48 = vld [vmem:[#allocation136_spill] sm:$0xff] }
 0x15b   : > { %v5647_v63 = vadd.f32 %v1680_v23, %v1584_v55  ;;  %2550 = vrot.lane.b32.xlu0 %v7681_v14, %s3535_s30  ;;  %v1588_v9 = vadd.f32 %v5536_v1, %v1429_v39  ;;  %v5652_v52 = vadd.f32 %v1643_v19, %v1477_v61  ;;  %v5654_v53 = vadd.f32 %v1661_v0, %v1530_v59 }
 0x15c   : > { %v5656_v36 = vadd.f32 %v1679_v24, %v1583_v13  ;;  %v1481_v3 = vadd.f32 %v5526_v2, %v1392_v30  ;;  %v1646_v60 = vmul.f32 %v7698_v15, %v1632_v54  ;;  %v1664_v32 = vmul.f32 %v7699_v29, %v1632_v54  ;;  %v1630_v49 = vpop.permute.xlu0 %1629 }
 0x15d   : > { %v1682_v55 = vmul.f32 %v7700_v40, %v1632_v54  ;;  %v1534_v14 = vadd.f32 %v5548_v46, %v1410_v47  ;;  %v1645_v1 = vmul.f32 %v7698_v15, %v1630_v49  ;;  %v1663_v61 = vmul.f32 %v7699_v29, %v1630_v49  ;;  %2556 = vrot.lane.b32.xlu1 %v7687_v5, %s3535_s30  ;;  %v7702_v46 = vld [vmem:[#allocation135_spill] sm:$0xff]  ;;  %v7703_v47 = vld [vmem:[#allocation65_spill] sm:$0xff] }
 0x15e   : > { %v1681_v59 = vmul.f32 %v7700_v40, %v1630_v49  ;;  %v1587_v2 = vadd.f32 %v5556_v8, %v1428_v12  ;;  %v5669_v13 = vadd.f32 %v1646_v60, %v1480_v6  ;;  %v5671_v39 = vadd.f32 %v1664_v32, %v1533_v56  ;;  %v1636_v5 = vpop.permute.xlu1 %1635  ;;  %v7704_v8 = vld [vmem:[#allocation67_spill] sm:$0xff]  ;;  %v7706_v49 = vld [vmem:[#allocation69_spill] sm:$0xff] }
 0x15f   : > { %v5673_v30 = vadd.f32 %v1682_v55, %v1586_v35  ;;  %2554 = vrot.lane.b32.xlu0 %v7689_v17, %s3535_s30  ;;  %v1441_v26 = vmul.f32 %v7703_v47, %v7702_v46  ;;  %v5679_v7 = vadd.f32 %v1645_v1, %v1479_v38  ;;  %v5681_v51 = vadd.f32 %v1663_v61, %v1532_v28 }
 0x160   : > { %v5683_v11 = vadd.f32 %v1681_v59, %v1585_v45  ;;  %v1442_v6 = vmul.f32 %v7704_v8, %v7702_v46  ;;  %v1648_v12 = vmul.f32 %v7698_v15, %v1636_v5  ;;  %v1666_v56 = vmul.f32 %v7699_v29, %v1636_v5  ;;  %v1634_v17 = vpop.permute.xlu0 %1633 }
 0x161   : > { %v1684_v35 = vmul.f32 %v7700_v40, %v1636_v5  ;;  %v1465_v62 = vrot.slane %v1441_v26, 1  ;;  %v1647_v16 = vmul.f32 %v7698_v15, %v1634_v17  ;;  %v1665_v37 = vmul.f32 %v7699_v29, %v1634_v17  ;;  %2560 = vrot.lane.b32.xlu1 %v7693_v41, %s3535_s30 }
 0x162   : > { %v1683_v38 = vmul.f32 %v7700_v40, %v1634_v17  ;;  %v1467_v28 = vrot.slane %v1442_v6, 1  ;;  %v5695_v25 = vadd.f32 %v1648_v12, %v1482_v50  ;;  %v5697_v45 = vadd.f32 %v1666_v56, %v1535_v18  ;;  %v1640_v50 = vpop.permute.xlu1 %1639  ;;  %v7709_v12 = vld [vmem:[#allocation70_spill] sm:$0xff] }
 0x163   : > { %v5699_v42 = vadd.f32 %v1684_v35, %v1588_v9  ;;  %2558 = vrot.lane.b32.xlu0 %v7695_v20, %s3535_s30  ;;  %v1494_v23 = vmul.f32 %v7703_v47, %v7705_v48  ;;  %v5705_v22 = vadd.f32 %v1647_v16, %v1481_v3  ;;  %v5707_v43 = vadd.f32 %v1665_v37, %v1534_v14 }
 0x164   : > { %v5709_v19 = vadd.f32 %v1683_v38, %v1587_v2  ;;  %v1468_v41 = vsel %vm599_vm1, %v1465_v62, %v1467_v28  ;;  %v1495_v24 = vmul.f32 %v7704_v8, %v7705_v48  ;;  %v1547_v18 = vmul.f32 %v7703_v47, %v7637_v21  ;;  %v1638_v9 = vpop.permute.xlu0 %1637 }
 0x165   : > { %v1484_v0 = vadd.f32 %v1468_v41, %v5611_v10  ;;  %v1518_v20 = vrot.slane %v1494_v23, 1  ;;  %v1548_v54 = vmul.f32 %v7704_v8, %v7637_v21  ;;  %v1650_v3 = vmul.f32 %v7698_v15, %v1640_v50 }
 0x166   : > { %v1668_v60 = vmul.f32 %v7699_v29, %v1640_v50  ;;  %v1686_v10 = vmul.f32 %v7700_v40, %v1640_v50  ;;  %v1520_v32 = vrot.slane %v1495_v24, 1  ;;  %v1571_v55 = vrot.slane %v1547_v18, 1  ;;  %v1698_v5 = vpop.permute.xlu1 %1697 }
 0x167   : > { %v7707_v14 = vrot.slane %v7706_v49, 1  ;;  %v7708_v61 = vrot.slane %v5321_v31, 1  ;;  %v1573_v2 = vrot.slane %v1548_v54, 1  ;;  %v5734_v46 = vadd.f32 %v1650_v3, %v1484_v0  ;;  %v7713_v0 = vld [vmem:[#allocation101_spill] sm:$0xff] }
 0x168   : > { %v1521_v6 = vsel %vm599_vm1, %v1518_v20, %v1520_v32  ;;  %v7710_v56 = vrot.slane %v7709_v12, 1  ;;  %v1649_v17 = vmul.f32 %v7698_v15, %v1638_v9  ;;  %v1667_v31 = vmul.f32 %v7699_v29, %v1638_v9  ;;  %v7711_v15 = vld [vmem:[#allocation96_spill] sm:$0xff] }
 0x169   : > { %v1466_v1 = vsel %vm599_vm1, %v7707_v14, %v1465_v62  ;;  %v1519_v59 = vsel %vm599_vm1, %v7708_v61, %v1518_v20  ;;  %v1696_v62 = vpop.permute.xlu0 %1695  ;;  %v1537_v16 = vadd.f32 %v1521_v6, %v5614_v27  ;;  %v1685_v37 = vmul.f32 %v7700_v40, %v1638_v9  ;;  %v7712_v27 = vld [vmem:[#allocation105_spill] sm:$0xff]  ;;  %v7714_v14 = vld [vmem:[#allocation110_spill] sm:$0xff] }
 0x16a   : > { %v1483_v21 = vadd.f32 %v1466_v1, %v5623_v58  ;;  %v1536_v26 = vadd.f32 %v1519_v59, %v5626_v33  ;;  %v1572_v35 = vsel %vm599_vm1, %v7710_v56, %v1571_v55  ;;  %v1574_v58 = vsel %vm599_vm1, %v1571_v55, %v1573_v2  ;;  %v1702_v20 = vpop.permute.xlu1 %1701 }
 0x16b   : > { %v1589_v33 = vadd.f32 %v1572_v35, %v5629_v57  ;;  %v1590_v38 = vadd.f32 %v1574_v58, %v5617_v34  ;;  %v2776_v29 = vrot.slane %v7711_v15, 2  ;;  %v5754_v23 = vadd.f32 %v1668_v60, %v1537_v16 }
 0x16c   : > { %v5749_v28 = vadd.f32 %v1649_v17, %v1483_v21  ;;  %v5751_v48 = vadd.f32 %v1667_v31, %v1536_v26  ;;  %v2778_v50 = vrot.slane %v7712_v27, 2  ;;  %v2775_v24 = vrot.slane %v7713_v0, 2  ;;  %v7715_v21 = vld [vmem:[#allocation112_spill] sm:$0xff] }
 0x16d   : > { %v5756_v41 = vadd.f32 %v1685_v37, %v1589_v33  ;;  %v5760_v57 = vadd.f32 %v1686_v10, %v1590_v38  ;;  %v5763_v40 = vstv %s5712_s9  ;;  %v5766_v34 = vstv %s5719_s10  ;;  %v1700_v9 = vpop.permute.xlu0 %1699  ;;  %v7717_v38 = vld [vmem:[#allocation123_spill] sm:$0xff]  ;;  %s6432_s9 = sld [smem:[#allocation2 + $0x14]]  ;;  %s6434_s10 = sld [smem:[#allocation2 + $0x2f]] }
 0x16e   : > { %v5769_v18 = vstv %s5721_s11  ;;  %v5772_v54 = vsel %vm933_vm0, %v2776_v29, %v2778_v50  ;;  %v5775_v3 = vsel %vm933_vm0, %v2775_v24, %v2776_v29  ;;  %v1714_v60 = vmul.f32 %v5763_v40, %v1698_v5  ;;  %v1706_v6 = vpop.permute.xlu1 %1705  ;;  %s6444_s11 = sld [smem:[#allocation2 + $0x4a]] }
 0x16f   : > { %v1732_v32 = vmul.f32 %v5766_v34, %v1698_v5  ;;  %2802 = vrot.lane.b32.xlu1 %v5772_v54, %s3534_s20  ;;  %2800 = vrot.lane.b32.xlu0 %v5775_v3, %s3534_s20  ;;  %v1750_v10 = vmul.f32 %v5769_v18, %v1698_v5  ;;  %v1713_v55 = vmul.f32 %v5763_v40, %v1696_v62  ;;  %v2780_v1 = vrot.slane %v7714_v14, 2 }
 0x170   : > { %v1731_v49 = vmul.f32 %v5766_v34, %v1696_v62  ;;  %v5788_v61 = vadd.f32 %v1714_v60, %v5643_v4  ;;  %v1749_v2 = vmul.f32 %v5769_v18, %v1696_v62  ;;  %v2782_v26 = vrot.slane %v7715_v21, 2  ;;  %v7716_v62 = vld [vmem:[#allocation119_spill] sm:$0xff] }
 0x171   : > { %v5791_v59 = vadd.f32 %v1732_v32, %v5645_v44  ;;  %v5796_v12 = vadd.f32 %v1750_v10, %v5647_v63  ;;  %v5799_v5 = vadd.f32 %v1713_v55, %v5652_v52  ;;  %v5805_v4 = vsel %vm933_vm0, %v2778_v50, %v2780_v1  ;;  %v1704_v35 = vpop.permute.xlu0 %1703  ;;  %v7718_v55 = vld [vmem:[#allocation137_spill] sm:$0xff] }
 0x172   : > { %v5802_v56 = vadd.f32 %v1731_v49, %v5654_v53  ;;  %v5808_v44 = vadd.f32 %v1749_v2, %v5656_v36  ;;  %v5811_v17 = vsel %vm933_vm0, %v2780_v1, %v2782_v26  ;;  %v1716_v31 = vmul.f32 %v5763_v40, %v1702_v20  ;;  %v1710_v50 = vpop.permute.xlu1 %1709 }
 0x173   : > { %v1734_v63 = vmul.f32 %v5766_v34, %v1702_v20  ;;  %2806 = vrot.lane.b32.xlu1 %v5811_v17, %s3534_s20  ;;  %2804 = vrot.lane.b32.xlu0 %v5805_v4, %s3534_s20  ;;  %v1752_v52 = vmul.f32 %v5769_v18, %v1702_v20  ;;  %v1715_v53 = vmul.f32 %v5763_v40, %v1700_v9  ;;  %v2784_v16 = vrot.slane %v7716_v62, 2 }
 0x174   : > { %v1733_v36 = vmul.f32 %v5766_v34, %v1700_v9  ;;  %v5826_v58 = vadd.f32 %v1716_v31, %v5669_v13  ;;  %v1751_v37 = vmul.f32 %v5769_v18, %v1700_v9  ;;  %v2786_v29 = vrot.slane %v7717_v38, 2  ;;  %v7719_v31 = vld [vmem:[#allocation144_spill] sm:$0xff] }
 0x175   : > { %v5829_v33 = vadd.f32 %v1734_v63, %v5671_v39  ;;  %v5834_v24 = vadd.f32 %v1752_v52, %v5673_v30  ;;  %v5837_v20 = vadd.f32 %v1715_v53, %v5679_v7  ;;  %v5843_v13 = vsel %vm933_vm0, %v2782_v26, %v2784_v16  ;;  %v1708_v32 = vpop.permute.xlu0 %1707 }
 0x176   : > { %v5840_v60 = vadd.f32 %v1733_v36, %v5681_v51  ;;  %v5846_v39 = vadd.f32 %v1751_v37, %v5683_v11  ;;  %v5849_v9 = vsel %vm933_vm0, %v2784_v16, %v2786_v29  ;;  %v1718_v10 = vmul.f32 %v5763_v40, %v1706_v6 }
 0x177   : > { %v1736_v30 = vmul.f32 %v5766_v34, %v1706_v6  ;;  %2810 = vrot.lane.b32.xlu1 %v5849_v9, %s3534_s20  ;;  %2808 = vrot.lane.b32.xlu0 %v5843_v13, %s3534_s20  ;;  %v1754_v7 = vmul.f32 %v5769_v18, %v1706_v6  ;;  %v1717_v51 = vmul.f32 %v5763_v40, %v1704_v35  ;;  %v2788_v49 = vrot.slane %v7718_v55, 2  ;;  %v1952_v6 = vpop.permute.xlu1 %1951 }
 0x178   : > { %v1735_v11 = vmul.f32 %v5766_v34, %v1704_v35  ;;  %v5868_v1 = vadd.f32 %v1718_v10, %v5695_v25  ;;  %v1753_v26 = vmul.f32 %v5769_v18, %v1704_v35  ;;  %v2790_v63 = vrot.slane %v7719_v31, 2 }
 0x179   : > { %v5871_v2 = vadd.f32 %v1736_v30, %v5697_v45  ;;  %v5880_v52 = vadd.f32 %v1754_v7, %v5699_v42  ;;  %v5883_v53 = vadd.f32 %v1717_v51, %v5705_v22  ;;  %v5889_v45 = vsel %vm933_vm0, %v2786_v29, %v2788_v49  ;;  %v1950_v35 = vpop.permute.xlu0 %1949  ;;  %v7720_v51 = vld [vmem:[#allocation16_spill] sm:$0xff] }
 0x17a   : > { %v5886_v25 = vadd.f32 %v1735_v11, %v5707_v43  ;;  %v5892_v36 = vadd.f32 %v1753_v26, %v5709_v19  ;;  %v5895_v16 = vsel %vm933_vm0, %v2788_v49, %v2790_v63  ;;  %v1720_v37 = vmul.f32 %v5763_v40, %v1710_v50 }
 0x17b   : > { %v1738_v42 = vmul.f32 %v5766_v34, %v1710_v50  ;;  %2814 = vrot.lane.b32.xlu1 %v5895_v16, %s3534_s20  ;;  %2812 = vrot.lane.b32.xlu0 %v5889_v45, %s3534_s20  ;;  %v1756_v22 = vmul.f32 %v5769_v18, %v1710_v50  ;;  %v1719_v43 = vmul.f32 %v5763_v40, %v1708_v32  ;;  %v5907_v29 = vstv %s5823_s17  ;;  %s6156_s20 = sld [smem:[#allocation2 + $0x11]]  ;;  %s6446_s17 = sld [smem:[#allocation2 + $0x15]] }
 0x17c   : > { %v1737_v19 = vmul.f32 %v5766_v34, %v1708_v32  ;;  %v5910_v10 = vadd.f32 %v1720_v37, %v5734_v46  ;;  %v1755_v7 = vmul.f32 %v5769_v18, %v1708_v32  ;;  %v1768_v11 = vmul.f32 %v7720_v51, %v5907_v29  ;;  %v7721_v46 = vld [vmem:[#allocation40_spill] sm:$0xff]  ;;  %v5931_v18 = vpop.permute.xlu1 %1955 }
 0x17d   : > { %v5913_v30 = vadd.f32 %v1738_v42, %v5754_v23  ;;  %v5919_v50 = vadd.f32 %v1756_v22, %v5760_v57  ;;  %v5922_v40 = vadd.f32 %v1719_v43, %v5749_v28  ;;  %v5929_v23 = vmul.f32 %v7721_v46, %v5907_v29  ;;  %v5942_v26 = vpop.permute.xlu0 %1953 }
 0x17e   : > { %v5925_v34 = vadd.f32 %v1737_v19, %v5751_v48  ;;  %v5934_v32 = vadd.f32 %v1755_v7, %v5756_v41  ;;  %v1786_v57 = vrot.slane %v1768_v11, 2  ;;  %v5937_v49 = vstv %s5853_s19  ;;  %s6522_s19 = sld [smem:[#allocation2 + $0x30]] }
 0x17f   : > { %v5940_v28 = vstv %s5855_s24  ;;  %2872 = vrot.lane.b32.xlu1 %v5772_v54, %s3535_s30  ;;  %2870 = vrot.lane.b32.xlu0 %v5775_v3, %s3535_s30  ;;  %v7386_v48 = vrot.slane %v5929_v23, 2  ;;  %v1821_v63 = vmul.f32 %v7720_v51, %v5937_v49  ;;  %v5953_v41 = vmul.f32 %v7721_v46, %v5937_v49  ;;  %s6524_s24 = sld [smem:[#allocation2 + $0x4b]] }
 0x180   : > { %7722 = vst [vmem:[#allocation11_spill] sm:$0xff] %v5934_v32  ;;  %v1874_v37 = vmul.f32 %v7720_v51, %v5940_v28  ;;  %v5959_v42 = vmul.f32 %v7721_v46, %v5940_v28  ;;  %v5962_v54 = vstv %s5865_s25  ;;  %v5965_v22 = vstv %s5875_s26  ;;  %s6526_s25 = sld [smem:[#allocation2 + $0x16]]  ;;  %s6543_s26 = sld [smem:[#allocation2 + $0x31]] }
 0x181   : > { %v5968_v3 = vstv %s5877_s27  ;;  %v1789_v43 = vsel %vm933_vm0, %v1786_v57, %v7386_v48  ;;  %v1839_v19 = vrot.slane %v1821_v63, 2  ;;  %v7387_v7 = vrot.slane %v5953_v41, 2  ;;  %v7723_v48 = vld [vmem:[#allocation18_spill] sm:$0xff]  ;;  %s6545_s27 = sld [smem:[#allocation2 + $0x4c]] }
 0x182   : > { %v1892_v11 = vrot.slane %v1874_v37, 2  ;;  %v1894_v51 = vrot.slane %v5959_v42, 2  ;;  %v1811_v31 = vadd.f32 %v1789_v43, %v5788_v61  ;;  %v1968_v46 = vmul.f32 %v5962_v54, %v1952_v6  ;;  %v5988_v61 = vpop.permute.xlu1 %1959 }
 0x183   : > { %v1986_v38 = vmul.f32 %v5965_v22, %v1952_v6  ;;  %v1842_v55 = vsel %vm933_vm0, %v1839_v19, %v7387_v7  ;;  %v2004_v21 = vmul.f32 %v5968_v3, %v1952_v6  ;;  %v1767_v63 = vmul.f32 %v7723_v48, %v5907_v29  ;;  %2876 = vrot.lane.b32.xlu1 %v5811_v17, %s3535_s30  ;;  %v5998_v7 = vpop.permute.xlu0 %1957 }
 0x184   : > { %v1820_v37 = vmul.f32 %v7723_v48, %v5937_v49  ;;  %v1895_v42 = vsel %vm933_vm0, %v1892_v11, %v1894_v51  ;;  %v1864_v43 = vadd.f32 %v1842_v55, %v5791_v59  ;;  %v5992_v62 = vadd.f32 %v1968_v46, %v1811_v31  ;;  %2874 = vrot.lane.b32.xlu0 %v5805_v4, %s3535_s30  ;;  %v7724_v46 = vld [vmem:[#allocation38_spill] sm:$0xff] }
 0x185   : > { %v1873_v6 = vmul.f32 %v7723_v48, %v5940_v28  ;;  %v1917_v27 = vadd.f32 %v1895_v42, %v5796_v12  ;;  %v1785_v14 = vrot.slane %v1767_v63, 2  ;;  %v1967_v0 = vmul.f32 %v5962_v54, %v1950_v35 }
 0x186   : > { %v1838_v17 = vrot.slane %v1820_v37, 2  ;;  %v6002_v15 = vadd.f32 %v1986_v38, %v1864_v43  ;;  %v1985_v59 = vmul.f32 %v5965_v22, %v1950_v35  ;;  %v2003_v55 = vmul.f32 %v5968_v3, %v1950_v35  ;;  %v7725_v35 = vld [vmem:[#allocation64_spill] sm:$0xff] }
 0x187   : > { %v1891_v32 = vrot.slane %v1873_v6, 2  ;;  %v6006_v31 = vadd.f32 %v2004_v21, %v1917_v27  ;;  %v1787_v48 = vsel %vm933_vm0, %v1785_v14, %v1786_v57  ;;  %v1770_v12 = vmul.f32 %v7724_v46, %v5907_v29  ;;  %2880 = vrot.lane.b32.xlu1 %v5849_v9, %s3535_s30 }
 0x188   : > { %v1840_v4 = vsel %vm933_vm0, %v1838_v17, %v1839_v19  ;;  %v1810_v63 = vadd.f32 %v1787_v48, %v5799_v5  ;;  %v6019_v27 = vmul.f32 %v7725_v35, %v5907_v29  ;;  %2878 = vrot.lane.b32.xlu0 %v5843_v13, %s3535_s30  ;;  %v1823_v57 = vmul.f32 %v7724_v46, %v5937_v49  ;;  %v6030_v5 = vpop.permute.xlu1 %1963 }
 0x189   : > { %v1893_v38 = vsel %vm933_vm0, %v1891_v32, %v1892_v11  ;;  %v1863_v37 = vadd.f32 %v1840_v4, %v5802_v56  ;;  %v1790_v21 = vrot.slane %v1770_v12, 2  ;;  %v6028_v9 = vmul.f32 %v7725_v35, %v5937_v49 }
 0x18a   : > { %v1916_v14 = vadd.f32 %v1893_v38, %v5808_v44  ;;  %v6032_v56 = vadd.f32 %v1967_v0, %v1810_v63  ;;  %v1792_v19 = vrot.slane %v6019_v27, 2  ;;  %v1876_v13 = vmul.f32 %v7724_v46, %v5940_v28  ;;  %v6039_v44 = vpop.permute.xlu0 %1961 }
 0x18b   : > { %v6034_v32 = vadd.f32 %v1985_v59, %v1863_v37  ;;  %v1843_v42 = vrot.slane %v1823_v57, 2  ;;  %v1845_v43 = vrot.slane %v6028_v9, 2  ;;  %v6046_v6 = vmul.f32 %v7725_v35, %v5940_v28  ;;  %2884 = vrot.lane.b32.xlu1 %v5895_v16, %s3535_s30 }
 0x18c   : > { %v6041_v11 = vadd.f32 %v2003_v55, %v1916_v14  ;;  %v1793_v0 = vsel %vm933_vm0, %v1790_v21, %v1792_v19  ;;  %v1896_v17 = vrot.slane %v1876_v13, 2  ;;  %v1970_v59 = vmul.f32 %v5962_v54, %v5931_v18  ;;  %2882 = vrot.lane.b32.xlu0 %v5889_v45, %s3535_s30  ;;  %v6075_v57 = vpop.permute.xlu1 %2021  ;;  %s6166_s30 = sld [smem:[#allocation2 + $0x2c]] }
 0x18d   : > { %v1988_v55 = vmul.f32 %v5965_v22, %v5931_v18  ;;  %v1813_v48 = vadd.f32 %v1793_v0, %v5826_v58  ;;  %v1846_v4 = vsel %vm933_vm0, %v1843_v42, %v1845_v43  ;;  %v1898_v46 = vrot.slane %v6046_v6, 2 }
 0x18e   : > { %v2006_v16 = vmul.f32 %v5968_v3, %v5931_v18  ;;  %v1866_v12 = vadd.f32 %v1846_v4, %v5829_v33  ;;  %v7726_v38 = vrot.slane %v5929_v23, 2  ;;  %v7727_v37 = vrot.slane %v5953_v41, 2 }
 0x18f   : > { %v1897_v45 = vsel %vm933_vm0, %v1894_v51, %v1896_v17  ;;  %v1899_v58 = vsel %vm933_vm0, %v1896_v17, %v1898_v46  ;;  %v6071_v27 = vadd.f32 %v1970_v59, %v1813_v48  ;;  %v6083_v51 = vpop.permute.xlu0 %2019  ;;  %v1987_v9 = vmul.f32 %v5965_v22, %v5942_v26 }
 0x190   : > { %v1791_v63 = vsel %vm933_vm0, %v7726_v38, %v1790_v21  ;;  %v1844_v35 = vsel %vm933_vm0, %v7727_v37, %v1843_v42  ;;  %v1919_v33 = vadd.f32 %v1899_v58, %v5834_v24  ;;  %v6078_v23 = vadd.f32 %v1988_v55, %v1866_v12  ;;  %v7729_v24 = vld [vmem:[#allocation66_spill] sm:$0xff]  ;;  %v6119_v58 = vpop.permute.xlu1 %2025 }
 0x191   : > { %v1812_v14 = vadd.f32 %v1791_v63, %v5837_v20  ;;  %v1865_v18 = vadd.f32 %v1844_v35, %v5840_v60  ;;  %v1918_v41 = vadd.f32 %v1897_v45, %v5846_v39  ;;  %v1969_v21 = vmul.f32 %v5962_v54, %v5942_v26  ;;  %v7728_v60 = vld [vmem:[#allocation54_spill] sm:$0xff] }
 0x192   : > { %v2005_v20 = vmul.f32 %v5968_v3, %v5942_v26  ;;  %v1772_v13 = vmul.f32 %v7728_v60, %v5907_v29  ;;  %v6093_v42 = vmul.f32 %v7729_v24, %v5907_v29  ;;  %v6095_v6 = vadd.f32 %v2006_v16, %v1919_v33 }
 0x193   : > { %v6097_v39 = vadd.f32 %v1969_v21, %v1812_v14  ;;  %v1825_v0 = vmul.f32 %v7728_v60, %v5937_v49  ;;  %v1826_v17 = vmul.f32 %v7729_v24, %v5937_v49  ;;  %v6103_v59 = vadd.f32 %v1987_v9, %v1865_v18  ;;  %v6123_v21 = vpop.permute.xlu0 %2023 }
 0x194   : > { %v6105_v26 = vadd.f32 %v2005_v20, %v1918_v41  ;;  %v1794_v55 = vrot.slane %v1772_v13, 2  ;;  %v1796_v48 = vrot.slane %v6093_v42, 2  ;;  %v1878_v16 = vmul.f32 %v7728_v60, %v5940_v28 }
 0x195   : > { %v1847_v4 = vrot.slane %v1825_v0, 2  ;;  %v1849_v12 = vrot.slane %v1826_v17, 2  ;;  %v1879_v38 = vmul.f32 %v7729_v24, %v5940_v28  ;;  %v1972_v37 = vmul.f32 %v5962_v54, %v5988_v61 }
 0x196   : > { %v1797_v63 = vsel %vm933_vm0, %v1794_v55, %v1796_v48  ;;  %v1990_v35 = vmul.f32 %v5965_v22, %v5988_v61  ;;  %v2008_v45 = vmul.f32 %v5968_v3, %v5988_v61  ;;  %v1900_v33 = vrot.slane %v1878_v16, 2 }
 0x197   : > { %v1815_v14 = vadd.f32 %v1797_v63, %v5868_v1  ;;  %v1850_v18 = vsel %vm933_vm0, %v1847_v4, %v1849_v12  ;;  %v1902_v41 = vrot.slane %v1879_v38, 2  ;;  %v1795_v20 = vsel %vm933_vm0, %v1792_v19, %v1794_v55 }
 0x198   : > { %v1868_v9 = vadd.f32 %v1850_v18, %v5871_v2  ;;  %v1848_v60 = vsel %vm933_vm0, %v1845_v43, %v1847_v4  ;;  %v1971_v13 = vmul.f32 %v5962_v54, %v5998_v7  ;;  %v1814_v1 = vadd.f32 %v1795_v20, %v5883_v53 }
 0x199   : > { %v1903_v61 = vsel %vm933_vm0, %v1900_v33, %v1902_v41  ;;  %v6131_v24 = vadd.f32 %v1972_v37, %v1815_v14  ;;  %v1867_v42 = vadd.f32 %v1848_v60, %v5886_v25  ;;  %v1901_v2 = vsel %vm933_vm0, %v1898_v46, %v1900_v33 }
 0x19a   : > { %v1921_v0 = vadd.f32 %v1903_v61, %v5880_v52  ;;  %v6136_v17 = vadd.f32 %v1990_v35, %v1868_v9  ;;  %v1989_v19 = vmul.f32 %v5965_v22, %v5998_v7  ;;  %v1920_v43 = vadd.f32 %v1901_v2, %v5892_v36  ;;  %v6158_v36 = vpop.permute.xlu1 %2029 }
 0x19b   : > { %v6142_v55 = vadd.f32 %v1971_v13, %v1814_v1  ;;  %v2007_v4 = vmul.f32 %v5968_v3, %v5998_v7  ;;  %v1774_v53 = vmul.f32 %v7703_v47, %v5907_v29  ;;  %v1775_v46 = vmul.f32 %v7704_v8, %v5907_v29  ;;  %v6170_v29 = vpop.permute.xlu0 %2027 }
 0x19c   : > { %v6148_v25 = vadd.f32 %v2008_v45, %v1921_v0  ;;  %v6150_v52 = vadd.f32 %v1989_v19, %v1867_v42  ;;  %v1827_v16 = vmul.f32 %v7703_v47, %v5937_v49  ;;  %v1828_v63 = vmul.f32 %v7704_v8, %v5937_v49 }
 0x19d   : > { %v6160_v38 = vadd.f32 %v2007_v4, %v1920_v43  ;;  %v1798_v7 = vrot.slane %v1774_v53, 2  ;;  %v1880_v37 = vmul.f32 %v7703_v47, %v5940_v28  ;;  %v1800_v35 = vrot.slane %v1775_v46, 2  ;;  %v7730_v43 = vld [vmem:[#allocation11_spill] sm:$0xff] }
 0x19e   : > { %v1851_v45 = vrot.slane %v1827_v16, 2  ;;  %v1881_v14 = vmul.f32 %v7704_v8, %v5940_v28  ;;  %v1974_v18 = vmul.f32 %v5962_v54, %v6030_v5  ;;  %v1853_v33 = vrot.slane %v1828_v63, 2 }
 0x19f   : > { %v1904_v9 = vrot.slane %v1880_v37, 2  ;;  %v1992_v49 = vmul.f32 %v5965_v22, %v6030_v5  ;;  %v2010_v47 = vmul.f32 %v5968_v3, %v6030_v5  ;;  %v1801_v20 = vsel %vm933_vm0, %v1798_v7, %v1800_v35 }
 0x1a0   : > { %v1906_v60 = vrot.slane %v1881_v14, 2  ;;  %v1799_v13 = vsel %vm933_vm0, %v1796_v48, %v1798_v7  ;;  %v1852_v61 = vsel %vm933_vm0, %v1849_v12, %v1851_v45  ;;  %v1817_v8 = vadd.f32 %v1801_v20, %v5910_v10  ;;  %v2034_v12 = vpop.permute.xlu1 %2033 }
 0x1a1   : > { %v1854_v28 = vsel %vm933_vm0, %v1851_v45, %v1853_v33  ;;  %v1816_v1 = vadd.f32 %v1799_v13, %v5922_v40  ;;  %v1869_v42 = vadd.f32 %v1852_v61, %v5925_v34  ;;  %v1905_v2 = vsel %vm933_vm0, %v1902_v41, %v1904_v9 }
 0x1a2   : > { %v1870_v0 = vadd.f32 %v1854_v28, %v5913_v30  ;;  %v1907_v5 = vsel %vm933_vm0, %v1904_v9, %v1906_v60  ;;  %v1973_v48 = vmul.f32 %v5962_v54, %v6039_v44  ;;  %v6193_v19 = vadd.f32 %v1974_v18, %v1817_v8  ;;  %v2032_v30 = vpop.permute.xlu0 %2031 }
 0x1a3   : > { %v1923_v10 = vadd.f32 %v1907_v5, %v5919_v50  ;;  %v1922_v40 = vadd.f32 %v1905_v2, %v7730_v43  ;;  %v1991_v34 = vmul.f32 %v5965_v22, %v6039_v44  ;;  %v2009_v41 = vmul.f32 %v5968_v3, %v6039_v44 }
 0x1a4   : > { %v2000_v4 = vadd.f32 %v1992_v49, %v1870_v0  ;;  %v6198_v53 = vadd.f32 %v1973_v48, %v1816_v1  ;;  %v2036_v46 = vstv %s6156_s20  ;;  %v2054_v7 = vstv %s6166_s30  ;;  %s6749_s20 = sld [smem:[#allocation2 + $0x17]]  ;;  %s6757_s30 = sld [smem:[#allocation2 + $0x32]] }
 0x1a5   : > { %v2018_v16 = vadd.f32 %v2010_v47, %v1923_v10  ;;  %v1999_v54 = vadd.f32 %v1991_v34, %v1869_v42  ;;  %v2072_v63 = vstv %s6168_s28  ;;  %v2017_v50 = vadd.f32 %v2009_v41, %v1922_v40  ;;  %s6759_s28 = sld [smem:[#allocation2 + $0x4d]] }
 0x1a6   : > { %v2038_v37 = vmul.f32 %v2036_v46, %v6075_v57  ;;  %v2056_v35 = vmul.f32 %v2054_v7, %v6075_v57  ;;  %v2074_v45 = vmul.f32 %v2072_v63, %v6075_v57  ;;  %v2037_v22 = vmul.f32 %v2036_v46, %v6083_v51  ;;  %v6222_v57 = vpop.permute.xlu1 %2145 }
 0x1a7   : > { %v2055_v14 = vmul.f32 %v2054_v7, %v6083_v51  ;;  %v2073_v18 = vmul.f32 %v2072_v63, %v6083_v51  ;;  %v2040_v3 = vmul.f32 %v2036_v46, %v6119_v58  ;;  %v2058_v49 = vmul.f32 %v2054_v7, %v6119_v58 }
 0x1a8   : > { %v6213_v44 = vadd.f32 %v2038_v37, %v5992_v62  ;;  %v6216_v33 = vadd.f32 %v2056_v35, %v6002_v15  ;;  %v6219_v9 = vadd.f32 %v2074_v45, %v6006_v31  ;;  %v6225_v47 = vadd.f32 %v2037_v22, %v6032_v56  ;;  %v6238_v15 = vpop.permute.xlu0 %2143 }
 0x1a9   : > { %v6228_v51 = vadd.f32 %v2055_v14, %v6034_v32  ;;  %v6231_v20 = vadd.f32 %v2073_v18, %v6041_v11  ;;  %v6234_v62 = vadd.f32 %v2040_v3, %v6071_v27  ;;  %v6241_v31 = vadd.f32 %v2058_v49, %v6078_v23 }
 0x1aa   : > { %v2076_v60 = vmul.f32 %v2072_v63, %v6119_v58  ;;  %v2039_v56 = vmul.f32 %v2036_v46, %v6123_v21  ;;  %v2057_v32 = vmul.f32 %v2054_v7, %v6123_v21  ;;  %v2075_v11 = vmul.f32 %v2072_v63, %v6123_v21 }
 0x1ab   : > { %v2042_v27 = vmul.f32 %v2036_v46, %v6158_v36  ;;  %v2060_v13 = vmul.f32 %v2054_v7, %v6158_v36  ;;  %v2078_v61 = vmul.f32 %v2072_v63, %v6158_v36  ;;  %v2041_v28 = vmul.f32 %v2036_v46, %v6170_v29 }
 0x1ac   : > { %v6257_v23 = vadd.f32 %v2076_v60, %v6095_v6  ;;  %v6260_v58 = vadd.f32 %v2039_v56, %v6097_v39  ;;  %v6263_v8 = vadd.f32 %v2057_v32, %v6103_v59  ;;  %v6271_v21 = vadd.f32 %v2075_v11, %v6105_v26  ;;  %v2150_v26 = vpop.permute.xlu1 %2149  ;;  %v6287_v48 = vpop.permute.xlu0 %2147 }
 0x1ad   : > { %v6274_v36 = vadd.f32 %v2042_v27, %v6131_v24  ;;  %v6277_v6 = vadd.f32 %v2060_v13, %v6136_v17  ;;  %v6280_v39 = vadd.f32 %v2078_v61, %v6148_v25  ;;  %v6283_v59 = vadd.f32 %v2041_v28, %v6142_v55  ;;  %v7733_v28 = vld [vmem:[#allocation110_spill] sm:$0xff] }
 0x1ae   : > { %v2059_v1 = vmul.f32 %v2054_v7, %v6170_v29  ;;  %v2077_v42 = vmul.f32 %v2072_v63, %v6170_v29  ;;  %v2044_v0 = vmul.f32 %v2036_v46, %v2034_v12  ;;  %v2062_v5 = vmul.f32 %v2054_v7, %v2034_v12 }
 0x1af   : > { %v2080_v24 = vmul.f32 %v2072_v63, %v2034_v12  ;;  %v2043_v2 = vmul.f32 %v2036_v46, %v2032_v30  ;;  %v2061_v17 = vmul.f32 %v2054_v7, %v2032_v30  ;;  %v2079_v10 = vmul.f32 %v2072_v63, %v2032_v30 }
 0x1b0   : > { %v6290_v25 = vadd.f32 %v2059_v1, %v6150_v52  ;;  %v6293_v55 = vadd.f32 %v2077_v42, %v6160_v38  ;;  %v6296_v29 = vadd.f32 %v2044_v0, %v6193_v19  ;;  %v6298_v43 = vadd.f32 %v2062_v5, %v2000_v4  ;;  %v7731_v19 = vld [vmem:[#allocation96_spill] sm:$0xff]  ;;  %v2154_v35 = vpop.permute.xlu1 %2153  ;;  %v6342_v3 = vpop.permute.xlu0 %2151 }
 0x1b1   : > { %v6300_v12 = vadd.f32 %v2080_v24, %v2018_v16  ;;  %v6303_v40 = vadd.f32 %v2043_v2, %v6198_v53  ;;  %v6305_v34 = vadd.f32 %v2061_v17, %v1999_v54  ;;  %v6307_v52 = vadd.f32 %v2079_v10, %v2017_v50  ;;  %v7732_v50 = vld [vmem:[#allocation101_spill] sm:$0xff] }
 0x1b2   : > { %v6310_v41 = vstv %s6236_s29  ;;  %v6313_v38 = vstv %s6246_s4  ;;  %v6316_v46 = vstv %s6248_s5  ;;  %v6325_v16 = vstv %s6254_s6  ;;  %s6812_s29 = sld [smem:[#allocation2 + $0x18]]  ;;  %s6817_s4 = sld [smem:[#allocation2 + $0x33]] }
 0x1b3   : > { %v2092_v30 = vmul.f32 %v7731_v19, %v6310_v41  ;;  %v2110_v4 = vmul.f32 %v7731_v19, %v6313_v38  ;;  %v2128_v53 = vmul.f32 %v7731_v19, %v6316_v46  ;;  %v6328_v54 = vstv %s6266_s7  ;;  %s6819_s5 = sld [smem:[#allocation2 + $0x4e]]  ;;  %s6830_s6 = sld [smem:[#allocation2 + $0x19]] }
 0x1b4   : > { %v6331_v7 = vstv %s6268_s8  ;;  %v2162_v63 = vmul.f32 %v6325_v16, %v6222_v57  ;;  %v2091_v37 = vmul.f32 %v7732_v50, %v6310_v41  ;;  %v2180_v18 = vmul.f32 %v6328_v54, %v6222_v57  ;;  %s6832_s7 = sld [smem:[#allocation2 + $0x34]]  ;;  %s6849_s8 = sld [smem:[#allocation2 + $0x4f]] }
 0x1b5   : > { %v2100_v45 = vadd.f32 %v2092_v30, %v6213_v44  ;;  %v2118_v22 = vadd.f32 %v2110_v4, %v6216_v33  ;;  %v2136_v14 = vadd.f32 %v2128_v53, %v6219_v9  ;;  %v2198_v49 = vmul.f32 %v6331_v7, %v6222_v57  ;;  %v6383_v4 = vpop.permute.xlu0 %2155  ;;  %v7734_v53 = vld [vmem:[#allocation105_spill] sm:$0xff] }
 0x1b6   : > { %v2109_v60 = vmul.f32 %v7732_v50, %v6313_v38  ;;  %v2127_v56 = vmul.f32 %v7732_v50, %v6316_v46  ;;  %v2099_v44 = vadd.f32 %v2091_v37, %v6225_v47  ;;  %v2161_v9 = vmul.f32 %v6325_v16, %v6238_v15 }
 0x1b7   : > { %v6351_v32 = vadd.f32 %v2162_v63, %v2100_v45  ;;  %v6353_v33 = vadd.f32 %v2180_v18, %v2118_v22  ;;  %v2179_v11 = vmul.f32 %v6328_v54, %v6238_v15  ;;  %v6359_v27 = vadd.f32 %v2198_v49, %v2136_v14 }
 0x1b8   : > { %v2117_v57 = vadd.f32 %v2109_v60, %v6228_v51  ;;  %v2135_v13 = vadd.f32 %v2127_v56, %v6231_v20  ;;  %v2197_v61 = vmul.f32 %v6331_v7, %v6238_v15  ;;  %v6365_v47 = vadd.f32 %v2161_v9, %v2099_v44  ;;  %v2158_v15 = vpop.permute.xlu1 %2157  ;;  %v7735_v56 = vld [vmem:[#allocation119_spill] sm:$0xff] }
 0x1b9   : > { %v2094_v1 = vmul.f32 %v7733_v28, %v6310_v41  ;;  %v2112_v42 = vmul.f32 %v7733_v28, %v6313_v38  ;;  %v2130_v0 = vmul.f32 %v7733_v28, %v6316_v46  ;;  %v2164_v51 = vmul.f32 %v6325_v16, %v2150_v26 }
 0x1ba   : > { %v6373_v5 = vadd.f32 %v2179_v11, %v2117_v57  ;;  %v6375_v24 = vadd.f32 %v2197_v61, %v2135_v13  ;;  %v2182_v20 = vmul.f32 %v6328_v54, %v2150_v26  ;;  %v2200_v30 = vmul.f32 %v6331_v7, %v2150_v26 }
 0x1bb   : > { %v2102_v2 = vadd.f32 %v2094_v1, %v6234_v62  ;;  %v2120_v17 = vadd.f32 %v2112_v42, %v6241_v31  ;;  %v2138_v10 = vadd.f32 %v2130_v0, %v6257_v23  ;;  %v2093_v63 = vmul.f32 %v7734_v53, %v6310_v41 }
 0x1bc   : > { %v2111_v37 = vmul.f32 %v7734_v53, %v6313_v38  ;;  %v2129_v45 = vmul.f32 %v7734_v53, %v6316_v46  ;;  %v2163_v62 = vmul.f32 %v6325_v16, %v6287_v48  ;;  %v2181_v26 = vmul.f32 %v6328_v54, %v6287_v48 }
 0x1bd   : > { %v6393_v22 = vadd.f32 %v2164_v51, %v2102_v2  ;;  %v6395_v31 = vadd.f32 %v2182_v20, %v2120_v17  ;;  %v6397_v23 = vadd.f32 %v2200_v30, %v2138_v10  ;;  %v2101_v14 = vadd.f32 %v2093_v63, %v6260_v58  ;;  %v2214_v51 = vpop.permute.xlu0 %2213  ;;  %v7736_v20 = vld [vmem:[#allocation112_spill] sm:$0xff] }
 0x1be   : > { %v2119_v18 = vadd.f32 %v2111_v37, %v6263_v8  ;;  %v2137_v49 = vadd.f32 %v2129_v45, %v6271_v21  ;;  %v2199_v60 = vmul.f32 %v6331_v7, %v6287_v48  ;;  %v2096_v44 = vmul.f32 %v7735_v56, %v6310_v41  ;;  %v2216_v48 = vpop.permute.xlu1 %2215 }
 0x1bf   : > { %v2114_v9 = vmul.f32 %v7735_v56, %v6313_v38  ;;  %v2132_v11 = vmul.f32 %v7735_v56, %v6316_v46  ;;  %v2166_v57 = vmul.f32 %v6325_v16, %v2154_v35  ;;  %v6413_v13 = vadd.f32 %v2163_v62, %v2101_v14 }
 0x1c0   : > { %v6415_v58 = vadd.f32 %v2181_v26, %v2119_v18  ;;  %v6417_v8 = vadd.f32 %v2199_v60, %v2137_v49  ;;  %v2184_v21 = vmul.f32 %v6328_v54, %v2154_v35  ;;  %v2104_v61 = vadd.f32 %v2096_v44, %v6274_v36  ;;  %v7737_v26 = vld [vmem:[#allocation137_spill] sm:$0xff] }
 0x1c1   : > { %v2122_v1 = vadd.f32 %v2114_v9, %v6277_v6  ;;  %v2140_v42 = vadd.f32 %v2132_v11, %v6280_v39  ;;  %v2202_v0 = vmul.f32 %v6331_v7, %v2154_v35  ;;  %v2095_v2 = vmul.f32 %v7736_v20, %v6310_v41 }
 0x1c2   : > { %v2113_v17 = vmul.f32 %v7736_v20, %v6313_v38  ;;  %v2131_v10 = vmul.f32 %v7736_v20, %v6316_v46  ;;  %v2165_v30 = vmul.f32 %v6325_v16, %v6342_v3  ;;  %v6436_v36 = vadd.f32 %v2166_v57, %v2104_v61  ;;  %v2218_v61 = vpop.permute.xlu0 %2217 }
 0x1c3   : > { %v6438_v6 = vadd.f32 %v2184_v21, %v2122_v1  ;;  %v6440_v39 = vadd.f32 %v2202_v0, %v2140_v42  ;;  %v2183_v35 = vmul.f32 %v6328_v54, %v6342_v3  ;;  %v2103_v63 = vadd.f32 %v2095_v2, %v6283_v59  ;;  %v7738_v1 = vld [vmem:[#allocation123_spill] sm:$0xff] }
 0x1c4   : > { %v2121_v37 = vadd.f32 %v2113_v17, %v6290_v25  ;;  %v2139_v45 = vadd.f32 %v2131_v10, %v6293_v55  ;;  %v2201_v62 = vmul.f32 %v6331_v7, %v6342_v3  ;;  %v2098_v14 = vmul.f32 %v7737_v26, %v6310_v41  ;;  %v2220_v3 = vpop.permute.xlu1 %2219 }
 0x1c5   : > { %v2116_v18 = vmul.f32 %v7737_v26, %v6313_v38  ;;  %v2134_v49 = vmul.f32 %v7737_v26, %v6316_v46  ;;  %v2168_v60 = vmul.f32 %v6325_v16, %v2158_v15  ;;  %v6460_v44 = vadd.f32 %v2165_v30, %v2103_v63 }
 0x1c6   : > { %v6462_v59 = vadd.f32 %v2183_v35, %v2121_v37  ;;  %v6464_v25 = vadd.f32 %v2201_v62, %v2139_v45  ;;  %v2186_v55 = vmul.f32 %v6328_v54, %v2158_v15  ;;  %v2106_v9 = vadd.f32 %v2098_v14, %v6296_v29 }
 0x1c7   : > { %v2124_v11 = vadd.f32 %v2116_v18, %v6298_v43  ;;  %v2142_v57 = vadd.f32 %v2134_v49, %v6300_v12  ;;  %v2204_v21 = vmul.f32 %v6331_v7, %v2158_v15  ;;  %v2097_v42 = vmul.f32 %v7738_v1, %v6310_v41 }
 0x1c8   : > { %v2115_v0 = vmul.f32 %v7738_v1, %v6313_v38  ;;  %v2133_v29 = vmul.f32 %v7738_v1, %v6316_v46  ;;  %v2167_v43 = vmul.f32 %v6325_v16, %v6383_v4  ;;  %v6479_v2 = vadd.f32 %v2168_v60, %v2106_v9  ;;  %v2224_v18 = vpop.permute.xlu1 %2223 }
 0x1c9   : > { %v6481_v12 = vadd.f32 %v2186_v55, %v2124_v11  ;;  %v6483_v15 = vadd.f32 %v2204_v21, %v2142_v57  ;;  %v2185_v17 = vmul.f32 %v6328_v54, %v6383_v4  ;;  %v2105_v41 = vadd.f32 %v2097_v42, %v6303_v40 }
 0x1ca   : > { %v2123_v10 = vadd.f32 %v2115_v0, %v6305_v34  ;;  %v2141_v38 = vadd.f32 %v2133_v29, %v6307_v52  ;;  %v2203_v46 = vmul.f32 %v6331_v7, %v6383_v4  ;;  %v2230_v30 = vstv %s6432_s9  ;;  %v2222_v34 = vpop.permute.xlu0 %2221  ;;  %s7040_s9 = sld [smem:[#allocation2 + $0x1a]] }
 0x1cb   : > { %v2248_v16 = vstv %s6434_s10  ;;  %v2266_v35 = vstv %s6444_s11  ;;  %v6496_v63 = vstv %s6446_s17  ;;  %v2175_v37 = vadd.f32 %v2167_v43, %v2105_v41  ;;  %s7050_s10 = sld [smem:[#allocation2 + $0x35]]  ;;  %s7052_s11 = sld [smem:[#allocation2 + $0x50]] }
 0x1cc   : > { %v2193_v45 = vadd.f32 %v2185_v17, %v2123_v10  ;;  %v2211_v62 = vadd.f32 %v2203_v46, %v2141_v38  ;;  %v2232_v14 = vmul.f32 %v2230_v30, %v2216_v48  ;;  %v2250_v54 = vmul.f32 %v2248_v16, %v2216_v48  ;;  %v2228_v43 = vpop.permute.xlu1 %2227  ;;  %s7058_s17 = sld [smem:[#allocation5]] }
 0x1cd   : > { %v2268_v49 = vmul.f32 %v2266_v35, %v2216_v48  ;;  %v2231_v40 = vmul.f32 %v2230_v30, %v2214_v51  ;;  %v2249_v60 = vmul.f32 %v2248_v16, %v2214_v51  ;;  %v2267_v55 = vmul.f32 %v2266_v35, %v2214_v51 }
 0x1ce   : > { %v6499_v52 = vadd.f32 %v2232_v14, %v6351_v32  ;;  %v2234_v7 = vmul.f32 %v2230_v30, %v2220_v3  ;;  %v2252_v4 = vmul.f32 %v2248_v16, %v2220_v3  ;;  %v6502_v9 = vadd.f32 %v2250_v54, %v6353_v33  ;;  %v2226_v41 = vpop.permute.xlu0 %2225 }
 0x1cf   : > { %v6505_v11 = vadd.f32 %v2268_v49, %v6359_v27  ;;  %v6508_v57 = vadd.f32 %v2231_v40, %v6365_v47  ;;  %v6511_v48 = vadd.f32 %v2249_v60, %v6373_v5  ;;  %v6514_v21 = vadd.f32 %v2267_v55, %v6375_v24 }
 0x1d0   : > { %v6517_v32 = vadd.f32 %v2234_v7, %v6393_v22  ;;  %v6520_v51 = vadd.f32 %v2252_v4, %v6395_v31  ;;  %v2270_v33 = vmul.f32 %v2266_v35, %v2220_v3  ;;  %v2233_v27 = vmul.f32 %v2230_v30, %v2218_v61 }
 0x1d1   : > { %v2251_v42 = vmul.f32 %v2248_v16, %v2218_v61  ;;  %v2269_v0 = vmul.f32 %v2266_v35, %v2218_v61  ;;  %v2236_v47 = vmul.f32 %v2230_v30, %v2224_v18  ;;  %v2254_v24 = vmul.f32 %v2248_v16, %v2224_v18 }
 0x1d2   : > { %v6529_v5 = vadd.f32 %v2270_v33, %v6397_v23  ;;  %v2272_v22 = vmul.f32 %v2266_v35, %v2224_v18  ;;  %v2235_v29 = vmul.f32 %v2230_v30, %v2222_v34  ;;  %v6532_v31 = vadd.f32 %v2233_v27, %v6413_v13 }
 0x1d3   : > { %v6535_v3 = vadd.f32 %v2251_v42, %v6415_v58  ;;  %v6538_v61 = vadd.f32 %v2269_v0, %v6417_v8  ;;  %v6541_v17 = vadd.f32 %v2236_v47, %v6436_v36  ;;  %v6548_v23 = vadd.f32 %v2254_v24, %v6438_v6  ;;  %v2477_v24 = vpop.permute.xlu0 %2476 }
 0x1d4   : > { %v6551_v13 = vadd.f32 %v2272_v22, %v6440_v39  ;;  %v6554_v58 = vadd.f32 %v2235_v29, %v6460_v44  ;;  %v2253_v10 = vmul.f32 %v2248_v16, %v2222_v34  ;;  %v2271_v8 = vmul.f32 %v2266_v35, %v2222_v34 }
 0x1d5   : > { %v2238_v38 = vmul.f32 %v2230_v30, %v2228_v43  ;;  %v2256_v36 = vmul.f32 %v2248_v16, %v2228_v43  ;;  %v2274_v46 = vmul.f32 %v2266_v35, %v2228_v43  ;;  %v2237_v18 = vmul.f32 %v2230_v30, %v2226_v41 }
 0x1d6   : > { %v6557_v14 = vadd.f32 %v2253_v10, %v6462_v59  ;;  %v2255_v6 = vmul.f32 %v2248_v16, %v2226_v41  ;;  %v2273_v54 = vmul.f32 %v2266_v35, %v2226_v41  ;;  %v6560_v39 = vadd.f32 %v2271_v8, %v6464_v25  ;;  %v2479_v35 = vpop.permute.xlu1 %2478 }
 0x1d7   : > { %v6563_v44 = vadd.f32 %v2238_v38, %v6479_v2  ;;  %v6566_v49 = vadd.f32 %v2256_v36, %v6481_v12  ;;  %v6569_v40 = vadd.f32 %v2274_v46, %v6483_v15  ;;  %v6571_v60 = vadd.f32 %v2237_v18, %v2175_v37 }
 0x1d8   : > { %v6573_v59 = vadd.f32 %v2255_v6, %v2193_v45  ;;  %v6575_v30 = vadd.f32 %v2273_v54, %v2211_v62  ;;  %v2286_v25 = vmul.f32 %v7731_v19, %v6496_v63  ;;  %v6581_v2 = vmul.f32 %v7734_v53, %v6496_v63 }
 0x1d9   : > { %v6584_v12 = vstv %s6522_s19  ;;  %v6587_v16 = vstv %s6524_s24  ;;  %v6590_v15 = vstv %s6526_s25  ;;  %v6606_v4 = vstv %s6543_s26  ;;  %s7060_s19 = sld [smem:[#allocation5 + $0x1]]  ;;  %s7064_s24 = sld [smem:[#allocation5 + $0x2]] }
 0x1da   : > { %v2304_v37 = vrot.slane %v2286_v25, 1  ;;  %v2339_v45 = vmul.f32 %v7731_v19, %v6584_v12  ;;  %v6596_v62 = vmul.f32 %v7734_v53, %v6584_v12  ;;  %v2392_v34 = vmul.f32 %v7731_v19, %v6587_v16  ;;  %s188_s25 = sand.u32 1, %s3522_s13  }
 0x1db   : > { %v7388_v55 = vrot.slane %v6581_v2, 1  ;;  %v6603_v7 = vmul.f32 %v7734_v53, %v6587_v16  ;;  %v6609_v33 = vstv %s6545_s27  ;;  %v2495_v47 = vmul.f32 %v6590_v15, %v2479_v35  ;;  %s7118_s26 = smul.u32 192, %s188_s25 }
 0x1dc   : > { %v2357_v27 = vrot.slane %v2339_v45, 1  ;;  %v2359_v42 = vrot.slane %v6596_v62, 1  ;;  %v2410_v0 = vrot.slane %v2392_v34, 1  ;;  %v2513_v43 = vmul.f32 %v6606_v4, %v2479_v35 }
 0x1dd   : > { %v2307_v22 = vsel %vm599_vm1, %v2304_v37, %v7388_v55  ;;  %v2412_v29 = vrot.slane %v6603_v7, 1  ;;  %v2531_v41 = vmul.f32 %v6609_v33, %v2479_v35  ;;  %v2285_v38 = vmul.f32 %v7732_v50, %v6496_v63  ;;  %v2483_v55 = vpop.permute.xlu1 %2482  ;;  %s7144_s27 = scalar_lea.vmem [#allocation7], %s7118_s26 }
 0x1de   : > { %v2360_v10 = vsel %vm599_vm1, %v2357_v27, %v2359_v42  ;;  %v2329_v8 = vadd.f32 %v2307_v22, %v6499_v52  ;;  %v2338_v36 = vmul.f32 %v7732_v50, %v6584_v12  ;;  %v2391_v6 = vmul.f32 %v7732_v50, %v6587_v16 }
 0x1df   : > { %v2413_v46 = vsel %vm599_vm1, %v2410_v0, %v2412_v29  ;;  %v2382_v18 = vadd.f32 %v2360_v10, %v6502_v9  ;;  %v2494_v54 = vmul.f32 %v6590_v15, %v2477_v24  ;;  %v2303_v52 = vrot.slane %v2285_v38, 1 }
 0x1e0   : > { %v2435_v25 = vadd.f32 %v2413_v46, %v6505_v11  ;;  %v6631_v35 = vadd.f32 %v2495_v47, %v2329_v8  ;;  %v2356_v45 = vrot.slane %v2338_v36, 1  ;;  %v2409_v34 = vrot.slane %v2391_v6, 1  ;;  %v2481_v47 = vpop.permute.xlu0 %2480 }
 0x1e1   : > { %v6633_v62 = vadd.f32 %v2513_v43, %v2382_v18  ;;  %v2512_v7 = vmul.f32 %v6606_v4, %v2477_v24  ;;  %v2530_v22 = vmul.f32 %v6609_v33, %v2477_v24  ;;  %v2305_v10 = vsel %vm599_vm1, %v2303_v52, %v2304_v37 }
 0x1e2   : > { %v6637_v9 = vadd.f32 %v2531_v41, %v2435_v25  ;;  %v2358_v50 = vsel %vm599_vm1, %v2356_v45, %v2357_v27  ;;  %v2288_v11 = vmul.f32 %v7733_v28, %v6496_v63  ;;  %v2411_v8 = vsel %vm599_vm1, %v2409_v34, %v2410_v0  ;;  %v2487_v34 = vpop.permute.xlu1 %2486 }
 0x1e3   : > { %v2328_v43 = vadd.f32 %v2305_v10, %v6508_v57  ;;  %v2381_v38 = vadd.f32 %v2358_v50, %v6511_v48  ;;  %v6648_v24 = vmul.f32 %v7736_v20, %v6496_v63  ;;  %v2434_v41 = vadd.f32 %v2411_v8, %v6514_v21 }
 0x1e4   : > { %v2308_v36 = vrot.slane %v2288_v11, 1  ;;  %v2341_v37 = vmul.f32 %v7733_v28, %v6584_v12  ;;  %v2342_v27 = vmul.f32 %v7736_v20, %v6584_v12  ;;  %v2394_v50 = vmul.f32 %v7733_v28, %v6587_v16  ;;  %v2485_v8 = vpop.permute.xlu0 %2484 }
 0x1e5   : > { %v6655_v46 = vadd.f32 %v2494_v54, %v2328_v43  ;;  %v6657_v0 = vadd.f32 %v2512_v7, %v2381_v38  ;;  %v2310_v57 = vrot.slane %v6648_v24, 1  ;;  %v6662_v48 = vadd.f32 %v2530_v22, %v2434_v41 }
 0x1e6   : > { %v2361_v18 = vrot.slane %v2341_v37, 1  ;;  %v2363_v21 = vrot.slane %v2342_v27, 1  ;;  %v2395_v6 = vmul.f32 %v7736_v20, %v6587_v16  ;;  %v2414_v52 = vrot.slane %v2394_v50, 1 }
 0x1e7   : > { %v2311_v25 = vsel %vm599_vm1, %v2308_v36, %v2310_v57  ;;  %v2497_v54 = vmul.f32 %v6590_v15, %v2483_v55  ;;  %v2515_v45 = vmul.f32 %v6606_v4, %v2483_v55  ;;  %v2533_v22 = vmul.f32 %v6609_v33, %v2483_v55 }
 0x1e8   : > { %v2331_v7 = vadd.f32 %v2311_v25, %v6517_v32  ;;  %v2364_v10 = vsel %vm599_vm1, %v2361_v18, %v2363_v21  ;;  %v2416_v11 = vrot.slane %v2395_v6, 1  ;;  %v7739_v38 = vrot.slane %v6581_v2, 1 }
 0x1e9   : > { %v2384_v43 = vadd.f32 %v2364_v10, %v6520_v51  ;;  %v2362_v41 = vsel %vm599_vm1, %v2359_v42, %v2361_v18  ;;  %v2415_v37 = vsel %vm599_vm1, %v2412_v29, %v2414_v52  ;;  %v2496_v2 = vmul.f32 %v6590_v15, %v2481_v47  ;;  %v6709_v10 = vpop.permute.xlu0 %2488 }
 0x1ea   : > { %v2309_v24 = vsel %vm599_vm1, %v7739_v38, %v2308_v36  ;;  %v2417_v27 = vsel %vm599_vm1, %v2414_v52, %v2416_v11  ;;  %v6679_v50 = vadd.f32 %v2497_v54, %v2331_v7  ;;  %v2383_v6 = vadd.f32 %v2362_v41, %v6535_v3  ;;  %v2491_v52 = vpop.permute.xlu1 %2490 }
 0x1eb   : > { %v2330_v32 = vadd.f32 %v2309_v24, %v6532_v31  ;;  %v2437_v55 = vadd.f32 %v2417_v27, %v6529_v5  ;;  %v6684_v25 = vadd.f32 %v2515_v45, %v2384_v43  ;;  %v2436_v51 = vadd.f32 %v2415_v37, %v6538_v61 }
 0x1ec   : > { %v2514_v42 = vmul.f32 %v6606_v4, %v2481_v47  ;;  %v2532_v29 = vmul.f32 %v6609_v33, %v2481_v47  ;;  %v2290_v36 = vmul.f32 %v7735_v56, %v6496_v63  ;;  %v6694_v31 = vmul.f32 %v7738_v1, %v6496_v63 }
 0x1ed   : > { %v6696_v3 = vadd.f32 %v2533_v22, %v2437_v55  ;;  %v6698_v5 = vadd.f32 %v2496_v2, %v2330_v32  ;;  %v2343_v61 = vmul.f32 %v7735_v56, %v6584_v12  ;;  %v2344_v18 = vmul.f32 %v7738_v1, %v6584_v12 }
 0x1ee   : > { %v6704_v54 = vadd.f32 %v2514_v42, %v2383_v6  ;;  %v6706_v47 = vadd.f32 %v2532_v29, %v2436_v51  ;;  %v2312_v45 = vrot.slane %v2290_v36, 1  ;;  %v2314_v7 = vrot.slane %v6694_v31, 1 }
 0x1ef   : > { %v2365_v22 = vrot.slane %v2343_v61, 1  ;;  %v2367_v43 = vrot.slane %v2344_v18, 1  ;;  %v2396_v38 = vmul.f32 %v7735_v56, %v6587_v16  ;;  %v2397_v24 = vmul.f32 %v7738_v1, %v6587_v16 }
 0x1f0   : > { %v2315_v41 = vsel %vm599_vm1, %v2312_v45, %v2314_v7  ;;  %v2499_v37 = vmul.f32 %v6590_v15, %v2487_v34  ;;  %v2517_v27 = vmul.f32 %v6606_v4, %v2487_v34  ;;  %v2535_v32 = vmul.f32 %v6609_v33, %v2487_v34 }
 0x1f1   : > { %v2333_v6 = vadd.f32 %v2315_v41, %v6541_v17  ;;  %v2368_v55 = vsel %vm599_vm1, %v2365_v22, %v2367_v43  ;;  %v2418_v51 = vrot.slane %v2396_v38, 1  ;;  %v2420_v2 = vrot.slane %v2397_v24, 1  ;;  %v2549_v41 = vpop.permute.xlu1 %2548 }
 0x1f2   : > { %v2386_v42 = vadd.f32 %v2368_v55, %v6548_v23  ;;  %v2313_v29 = vsel %vm599_vm1, %v2310_v57, %v2312_v45  ;;  %v2366_v36 = vsel %vm599_vm1, %v2363_v21, %v2365_v22  ;;  %v2498_v31 = vmul.f32 %v6590_v15, %v2485_v8  ;;  %v2547_v21 = vpop.permute.xlu0 %2546 }
 0x1f3   : > { %v2421_v61 = vsel %vm599_vm1, %v2418_v51, %v2420_v2  ;;  %v6726_v18 = vadd.f32 %v2499_v37, %v2333_v6  ;;  %v2332_v34 = vadd.f32 %v2313_v29, %v6554_v58  ;;  %v2385_v17 = vadd.f32 %v2366_v36, %v6557_v14 }
 0x1f4   : > { %v2439_v38 = vadd.f32 %v2421_v61, %v6551_v13  ;;  %v6731_v24 = vadd.f32 %v2517_v27, %v2386_v42  ;;  %v2419_v23 = vsel %vm599_vm1, %v2416_v11, %v2418_v51  ;;  %v2516_v57 = vmul.f32 %v6606_v4, %v2485_v8  ;;  %v7740_v13 = vld [vmem:[#allocation144_spill] sm:$0xff] }
 0x1f5   : > { %v2438_v45 = vadd.f32 %v2419_v23, %v6560_v39  ;;  %v6736_v22 = vadd.f32 %v2498_v31, %v2332_v34  ;;  %v2534_v37 = vmul.f32 %v6609_v33, %v2485_v8  ;;  %v2292_v58 = vmul.f32 %v7737_v26, %v6496_v63  ;;  %v2553_v34 = vpop.permute.xlu1 %2552 }
 0x1f6   : > { %v6741_v14 = vadd.f32 %v2535_v32, %v2439_v38  ;;  %v6743_v6 = vadd.f32 %v2516_v57, %v2385_v17  ;;  %v2293_v27 = vmul.f32 %v7740_v13, %v6496_v63  ;;  %v2345_v11 = vmul.f32 %v7737_v26, %v6584_v12 }
 0x1f7   : > { %v6751_v39 = vadd.f32 %v2534_v37, %v2438_v45  ;;  %v2316_v55 = vrot.slane %v2292_v58, 1  ;;  %v2346_v8 = vmul.f32 %v7740_v13, %v6584_v12  ;;  %v2398_v32 = vmul.f32 %v7737_v26, %v6587_v16  ;;  %v2551_v45 = vpop.permute.xlu0 %2550 }
 0x1f8   : > { %v2318_v51 = vrot.slane %v2293_v27, 1  ;;  %v2369_v63 = vrot.slane %v2345_v11, 1  ;;  %v2399_v42 = vmul.f32 %v7740_v13, %v6587_v16  ;;  %v2501_v29 = vmul.f32 %v6590_v15, %v2491_v52 }
 0x1f9   : > { %v2371_v36 = vrot.slane %v2346_v8, 1  ;;  %v2422_v31 = vrot.slane %v2398_v32, 1  ;;  %v2519_v61 = vmul.f32 %v6606_v4, %v2491_v52  ;;  %v2537_v12 = vmul.f32 %v6609_v33, %v2491_v52 }
 0x1fa   : > { %v2319_v17 = vsel %vm599_vm1, %v2316_v55, %v2318_v51  ;;  %v2424_v38 = vrot.slane %v2399_v42, 1  ;;  %v2317_v23 = vsel %vm599_vm1, %v2314_v7, %v2316_v55  ;;  %v2370_v57 = vsel %vm599_vm1, %v2367_v43, %v2369_v63 }
 0x1fb   : > { %v2335_v16 = vadd.f32 %v2319_v17, %v6563_v44  ;;  %v2372_v37 = vsel %vm599_vm1, %v2369_v63, %v2371_v36  ;;  %v2334_v58 = vadd.f32 %v2317_v23, %v6571_v60  ;;  %v2387_v27 = vadd.f32 %v2370_v57, %v6573_v59  ;;  %v2557_v36 = vpop.permute.xlu1 %2556 }
 0x1fc   : > { %v2388_v52 = vadd.f32 %v2372_v37, %v6566_v49  ;;  %v2425_v11 = vsel %vm599_vm1, %v2422_v31, %v2424_v38  ;;  %v2423_v7 = vsel %vm599_vm1, %v2420_v2, %v2422_v31  ;;  %v2500_v43 = vmul.f32 %v6590_v15, %v6709_v10 }
 0x1fd   : > { %v2441_v55 = vadd.f32 %v2425_v11, %v6569_v40  ;;  %v6779_v44 = vadd.f32 %v2501_v29, %v2335_v16  ;;  %v2440_v8 = vadd.f32 %v2423_v7, %v6575_v30  ;;  %v2518_v60 = vmul.f32 %v6606_v4, %v6709_v10  ;;  %v2555_v30 = vpop.permute.xlu0 %2554 }
 0x1fe   : > { %v2527_v59 = vadd.f32 %v2519_v61, %v2388_v52  ;;  %v6784_v32 = vadd.f32 %v2500_v43, %v2334_v58  ;;  %v2536_v49 = vmul.f32 %v6609_v33, %v6709_v10  ;;  %v2563_v51 = vstv %s6749_s20  ;;  %s3257_s20 = smul.u32 3072, %s3580_s16 }
 0x1ff   : > { %v2545_v2 = vadd.f32 %v2537_v12, %v2441_v55  ;;  %v2526_v63 = vadd.f32 %v2518_v60, %v2387_v27  ;;  %v2581_v42 = vstv %s6757_s30  ;;  %v2599_v15 = vstv %s6759_s28  ;;  %v2561_v52 = vpop.permute.xlu1 %2560  ;;  %s3034_s30 = sshll.u32 %s7144_s27, 4  ;;  %s7219_s30 = int_to_ptr.vmem [resolvable:$true] %s3034_s30 }
 0x200   : > { %v2544_v40 = vadd.f32 %v2536_v49, %v2440_v8  ;;  %v2565_v29 = vmul.f32 %v2563_v51, %v2549_v41  ;;  %v2583_v31 = vmul.f32 %v2581_v42, %v2549_v41  ;;  %v2601_v17 = vmul.f32 %v2599_v15, %v2549_v41 }
 0x201   : > { %v2564_v38 = vmul.f32 %v2563_v51, %v2547_v21  ;;  %v2582_v23 = vmul.f32 %v2581_v42, %v2547_v21  ;;  %v2600_v4 = vmul.f32 %v2599_v15, %v2547_v21  ;;  %v2567_v61 = vmul.f32 %v2563_v51, %v2553_v34  ;;  %v2559_v7 = vpop.permute.xlu0 %2558 }
 0x202   : > { %v6792_v57 = vadd.f32 %v2565_v29, %v6631_v35  ;;  %v6795_v33 = vadd.f32 %v2583_v31, %v6633_v62  ;;  %v6798_v10 = vadd.f32 %v2601_v17, %v6637_v9  ;;  %v2585_v12 = vmul.f32 %v2581_v42, %v2553_v34 }
 0x203   : > { %v6801_v16 = vadd.f32 %v2564_v38, %v6655_v46  ;;  %v6804_v41 = vadd.f32 %v2582_v23, %v6657_v0  ;;  %v6807_v37 = vadd.f32 %v2600_v4, %v6662_v48  ;;  %v6810_v21 = vadd.f32 %v2567_v61, %v6679_v50 }
 0x204   : > { %v6815_v35 = vadd.f32 %v2585_v12, %v6684_v25  ;;  %v2603_v62 = vmul.f32 %v2599_v15, %v2553_v34  ;;  %v2566_v9 = vmul.f32 %v2563_v51, %v2551_v45  ;;  %v2584_v58 = vmul.f32 %v2581_v42, %v2551_v45 }
 0x205   : > { %v2602_v46 = vmul.f32 %v2599_v15, %v2551_v45  ;;  %v2569_v0 = vmul.f32 %v2563_v51, %v2557_v36  ;;  %v2587_v27 = vmul.f32 %v2581_v42, %v2557_v36  ;;  %v2605_v48 = vmul.f32 %v2599_v15, %v2557_v36 }
 0x206   : > { %v6822_v50 = vadd.f32 %v2603_v62, %v6696_v3  ;;  %v6825_v11 = vadd.f32 %v2566_v9, %v6698_v5  ;;  %v6828_v25 = vadd.f32 %v2584_v58, %v6704_v54  ;;  %v2568_v34 = vmul.f32 %v2563_v51, %v2555_v30 }
 0x207   : > { %v6835_v45 = vadd.f32 %v2602_v46, %v6706_v47  ;;  %v6838_v43 = vadd.f32 %v2569_v0, %v6726_v18  ;;  %v6841_v3 = vadd.f32 %v2587_v27, %v6731_v24  ;;  %v6844_v5 = vadd.f32 %v2605_v48, %v6741_v14  ;;  %v2801_v27 = vpop.permute.xlu0 %2800 }
 0x208   : > { %v6847_v54 = vadd.f32 %v2568_v34, %v6736_v22  ;;  %v2586_v55 = vmul.f32 %v2581_v42, %v2555_v30  ;;  %v2604_v8 = vmul.f32 %v2599_v15, %v2555_v30  ;;  %v2571_v60 = vmul.f32 %v2563_v51, %v2561_v52 }
 0x209   : > { %v2589_v47 = vmul.f32 %v2581_v42, %v2561_v52  ;;  %v2607_v18 = vmul.f32 %v2599_v15, %v2561_v52  ;;  %v2570_v49 = vmul.f32 %v2563_v51, %v2559_v7  ;;  %v2588_v36 = vmul.f32 %v2581_v42, %v2559_v7 }
 0x20a   : > { %v6852_v24 = vadd.f32 %v2586_v55, %v6743_v6  ;;  %v6855_v14 = vadd.f32 %v2604_v8, %v6751_v39  ;;  %v6858_v22 = vadd.f32 %v2571_v60, %v6779_v44  ;;  %v2606_v29 = vmul.f32 %v2599_v15, %v2559_v7  ;;  %v2803_v15 = vpop.permute.xlu1 %2802  ;;  %v7741_v60 = vld [vmem:[#allocation101_spill] sm:$0xff] }
 0x20b   : > { %v6860_v31 = vadd.f32 %v2589_v47, %v2527_v59  ;;  %v6862_v17 = vadd.f32 %v2607_v18, %v2545_v2  ;;  %v6865_v30 = vadd.f32 %v2570_v49, %v6784_v32  ;;  %v6867_v51 = vadd.f32 %v2588_v36, %v2526_v63 }
 0x20c   : > { %v6869_v6 = vadd.f32 %v2606_v29, %v2544_v40  ;;  %v6872_v42 = vstv %s6812_s29  ;;  %v6875_v39 = vstv %s6817_s4  ;;  %v6878_v44 = vstv %s6819_s5  ;;  %s7224_s29 = scalar_lea.hbm %s7273_s3, %s3257_s20  ;;  %s7229_s4 = scalar_lea.sflag [#allocation3], %s188_s25 }
 0x20d   : > { %v2619_v59 = vmul.f32 %v7731_v19, %v6872_v42  ;;  %v6884_v2 = vmul.f32 %v7734_v53, %v6872_v42  ;;  %v2672_v32 = vmul.f32 %v7731_v19, %v6875_v39  ;;  %v6890_v63 = vmul.f32 %v7734_v53, %v6875_v39  ;;  %s3460_s5 = scalar_lea.vmem %s7219_s30, 3072 }
 0x20e   : > { %v2725_v40 = vmul.f32 %v7731_v19, %v6878_v44  ;;  %v6896_v38 = vmul.f32 %v7734_v53, %v6878_v44  ;;  %v6899_v23 = vstv %s6830_s6  ;;  %v6902_v4 = vstv %s6832_s7  ;;  %p3461_p10 = scmp.ne.s32.totalorder %s7219_s30, %s3460_s5  ;;  %s3536_s6 = smov [#allocation7]  }
 0x20f   : > { %v2637_v61 = vrot.slane %v2619_v59, 2  ;;  %v2639_v12 = vrot.slane %v6884_v2, 2  ;;  %v2690_v62 = vrot.slane %v2672_v32, 2  ;;  %v2692_v9 = vrot.slane %v6890_v63, 2  ;;  %s3464_s7 = sshll.u32 %s3536_s6, 4  ;;  %s3465_s7 = int_to_ptr.vmem [resolvable:$false] %s3464_s7 }
 0x210   : > { %v2743_v58 = vrot.slane %v2725_v40, 2  ;;  %v2745_v46 = vrot.slane %v6896_v38, 2  ;;  %v6908_v0 = vstv %s6849_s8  ;;  %v2819_v19 = vmul.f32 %v6899_v23, %v2803_v15  ;;  %p3462_p0 = pnand %p3461_p10, %p7742_p12  ;;  %s3466_s8 = scalar_lea.vmem %s3465_s7, 6144 }
 0x211   : > { %v2640_v53 = vsel %vm933_vm0, %v2637_v61, %v2639_v12  ;;  %v2693_v48 = vsel %vm933_vm0, %v2690_v62, %v2692_v9  ;;  %v2837_v52 = vmul.f32 %v6902_v4, %v2803_v15  ;;  %v2855_v34 = vmul.f32 %v6908_v0, %v2803_v15  ;;  %p3467_p8 = scmp.lt.s32.totalorder %s7219_s30, %s3465_s7  ;;  %p3468_p11 = scmp.lt.s32.totalorder %s3466_s8, %s3460_s5 }
 0x212   : > { %v2746_v7 = vsel %vm933_vm0, %v2743_v58, %v2745_v46  ;;  %v2662_v55 = vadd.f32 %v2640_v53, %v6792_v57  ;;  %v2715_v8 = vadd.f32 %v2693_v48, %v6795_v33  ;;  %v2618_v47 = vmul.f32 %v7741_v60, %v6872_v42  ;;  %p3463_p7 = pneg %p3462_p0 }
 0x213   : > { %v2768_v18 = vadd.f32 %v2746_v7, %v6798_v10  ;;  %v2671_v49 = vmul.f32 %v7741_v60, %v6875_v39  ;;  %v2724_v36 = vmul.f32 %v7741_v60, %v6878_v44  ;;  %v2818_v29 = vmul.f32 %v6899_v23, %v2801_v27  ;;  %v2807_v60 = vpop.permute.xlu1 %2806  ;;  %p3469_p13 = por %p3468_p11, %p3467_p8 }
 0x214   : > { %v6926_v59 = vadd.f32 %v2819_v19, %v2662_v55  ;;  %v6928_v2 = vadd.f32 %v2837_v52, %v2715_v8  ;;  %v2636_v57 = vrot.slane %v2618_v47, 2  ;;  %v2836_v33 = vmul.f32 %v6902_v4, %v2801_v27 }
 0x215   : > { %v6931_v32 = vadd.f32 %v2855_v34, %v2768_v18  ;;  %v2689_v63 = vrot.slane %v2671_v49, 2  ;;  %v2742_v15 = vrot.slane %v2724_v36, 2  ;;  %v2854_v10 = vmul.f32 %v6908_v0, %v2801_v27  ;;  %p3470_p1 = pnand %p3469_p13, %p3463_p7 }
 0x216   : > { %v2638_v40 = vsel %vm933_vm0, %v2636_v57, %v2637_v61  ;;  %v2621_v38 = vmul.f32 %v7733_v28, %v6872_v42  ;;  %v6939_v19 = vmul.f32 %v7736_v20, %v6872_v42  ;;  %v2674_v53 = vmul.f32 %v7733_v28, %v6875_v39 }
 0x217   : > { %v2691_v48 = vsel %vm933_vm0, %v2689_v63, %v2690_v62  ;;  %v2744_v52 = vsel %vm933_vm0, %v2742_v15, %v2743_v58  ;;  %v2661_v34 = vadd.f32 %v2638_v40, %v6801_v16  ;;  %v6948_v27 = vmul.f32 %v7736_v20, %v6875_v39 }
 0x218   : > { %v2714_v61 = vadd.f32 %v2691_v48, %v6804_v41  ;;  %v2767_v7 = vadd.f32 %v2744_v52, %v6807_v37  ;;  %v2641_v55 = vrot.slane %v2621_v38, 2  ;;  %v2643_v8 = vrot.slane %v6939_v19, 2 }
 0x219   : > { %v6953_v47 = vadd.f32 %v2818_v29, %v2661_v34  ;;  %v2694_v18 = vrot.slane %v2674_v53, 2  ;;  %v2696_v62 = vrot.slane %v6948_v27, 2  ;;  %v2727_v16 = vmul.f32 %v7733_v28, %v6878_v44 }
 0x21a   : > { %v6958_v58 = vadd.f32 %v2836_v33, %v2714_v61  ;;  %v6960_v49 = vadd.f32 %v2854_v10, %v2767_v7  ;;  %v2644_v41 = vsel %vm933_vm0, %v2641_v55, %v2643_v8  ;;  %v2728_v37 = vmul.f32 %v7736_v20, %v6878_v44  ;;  %v2805_v10 = vpop.permute.xlu0 %2804 }
 0x21b   : > { %v2664_v36 = vadd.f32 %v2644_v41, %v6810_v21  ;;  %v2697_v29 = vsel %vm933_vm0, %v2694_v18, %v2696_v62  ;;  %v2747_v57 = vrot.slane %v2727_v16, 2  ;;  %v2821_v63 = vmul.f32 %v6899_v23, %v2807_v60 }
 0x21c   : > { %v2717_v15 = vadd.f32 %v2697_v29, %v6815_v35  ;;  %v2749_v40 = vrot.slane %v2728_v37, 2  ;;  %v2839_v28 = vmul.f32 %v6902_v4, %v2807_v60  ;;  %v2857_v33 = vmul.f32 %v6908_v0, %v2807_v60 }
 0x21d   : > { %v6971_v38 = vadd.f32 %v2821_v63, %v2664_v36  ;;  %v2642_v19 = vsel %vm933_vm0, %v2639_v12, %v2641_v55  ;;  %v2695_v20 = vsel %vm933_vm0, %v2692_v9, %v2694_v18  ;;  %v2748_v21 = vsel %vm933_vm0, %v2745_v46, %v2747_v57 }
 0x21e   : > { %v2750_v53 = vsel %vm933_vm0, %v2747_v57, %v2749_v40  ;;  %v6977_v48 = vadd.f32 %v2839_v28, %v2717_v15  ;;  %v2663_v35 = vadd.f32 %v2642_v19, %v6825_v11  ;;  %v2716_v52 = vadd.f32 %v2695_v20, %v6828_v25  ;;  %v2811_v25 = vpop.permute.xlu1 %2810  ;;  %v2809_v15 = vpop.permute.xlu0 %2808 }
 0x21f   : > { %v2770_v34 = vadd.f32 %v2750_v53, %v6822_v50  ;;  %v2769_v27 = vadd.f32 %v2748_v21, %v6835_v45  ;;  %v2820_v61 = vmul.f32 %v6899_v23, %v2805_v10  ;;  %v2838_v12 = vmul.f32 %v6902_v4, %v2805_v10 }
 0x220   : > { %v2856_v9 = vmul.f32 %v6908_v0, %v2805_v10  ;;  %v2623_v46 = vmul.f32 %v7735_v56, %v6872_v42  ;;  %v6990_v7 = vmul.f32 %v7738_v1, %v6872_v42  ;;  %v2676_v11 = vmul.f32 %v7735_v56, %v6875_v39 }
 0x221   : > { %v6994_v50 = vadd.f32 %v2857_v33, %v2770_v34  ;;  %v6996_v45 = vadd.f32 %v2820_v61, %v2663_v35  ;;  %v6998_v55 = vadd.f32 %v2838_v12, %v2716_v52  ;;  %v7002_v60 = vmul.f32 %v7738_v1, %v6875_v39 }
 0x222   : > { %v7004_v18 = vadd.f32 %v2856_v9, %v2769_v27  ;;  %v2645_v16 = vrot.slane %v2623_v46, 2  ;;  %v2647_v41 = vrot.slane %v6990_v7, 2  ;;  %v2698_v37 = vrot.slane %v2676_v11, 2  ;;  %v2815_v12 = vpop.permute.xlu1 %2814 }
 0x223   : > { %v2700_v36 = vrot.slane %v7002_v60, 2  ;;  %v2729_v29 = vmul.f32 %v7735_v56, %v6878_v44  ;;  %v2730_v57 = vmul.f32 %v7738_v1, %v6878_v44  ;;  %v2823_v63 = vmul.f32 %v6899_v23, %v2811_v25 }
 0x224   : > { %v2648_v28 = vsel %vm933_vm0, %v2645_v16, %v2647_v41  ;;  %v2841_v33 = vmul.f32 %v6902_v4, %v2811_v25  ;;  %v2859_v10 = vmul.f32 %v6908_v0, %v2811_v25  ;;  %v2646_v19 = vsel %vm933_vm0, %v2643_v8, %v2645_v16 }
 0x225   : > { %v2666_v20 = vadd.f32 %v2648_v28, %v6838_v43  ;;  %v2701_v21 = vsel %vm933_vm0, %v2698_v37, %v2700_v36  ;;  %v2751_v53 = vrot.slane %v2729_v29, 2  ;;  %v2753_v56 = vrot.slane %v2730_v57, 2  ;;  %v2813_v29 = vpop.permute.xlu0 %2812 }
 0x226   : > { %v2719_v35 = vadd.f32 %v2701_v21, %v6841_v3  ;;  %v2665_v1 = vadd.f32 %v2646_v19, %v6847_v54  ;;  %v2699_v52 = vsel %vm933_vm0, %v2696_v62, %v2698_v37  ;;  %v2822_v34 = vmul.f32 %v6899_v23, %v2809_v15  ;;  %v2873_v19 = vpop.permute.xlu1 %2872 }
 0x227   : > { %v2754_v27 = vsel %vm933_vm0, %v2751_v53, %v2753_v56  ;;  %v7024_v61 = vadd.f32 %v2823_v63, %v2666_v20  ;;  %v2718_v8 = vadd.f32 %v2699_v52, %v6852_v24  ;;  %v2752_v43 = vsel %vm933_vm0, %v2749_v40, %v2751_v53 }
 0x228   : > { %v2772_v9 = vadd.f32 %v2754_v27, %v6844_v5  ;;  %v7029_v46 = vadd.f32 %v2841_v33, %v2719_v35  ;;  %v2771_v3 = vadd.f32 %v2752_v43, %v6855_v14  ;;  %v7032_v54 = vadd.f32 %v2822_v34, %v2665_v1 }
 0x229   : > { %v2840_v62 = vmul.f32 %v6902_v4, %v2809_v15  ;;  %v2858_v7 = vmul.f32 %v6908_v0, %v2809_v15  ;;  %v2625_v11 = vmul.f32 %v7737_v26, %v6872_v42  ;;  %v2626_v24 = vmul.f32 %v7740_v13, %v6872_v42 }
 0x22a   : > { %v7042_v40 = vadd.f32 %v2859_v10, %v2772_v9  ;;  %v2678_v5 = vmul.f32 %v7737_v26, %v6875_v39  ;;  %v2679_v14 = vmul.f32 %v7740_v13, %v6875_v39  ;;  %v2731_v25 = vmul.f32 %v7737_v26, %v6878_v44 }
 0x22b   : > { %v7054_v60 = vadd.f32 %v2840_v62, %v2718_v8  ;;  %v7056_v42 = vadd.f32 %v2858_v7, %v2771_v3  ;;  %v2649_v16 = vrot.slane %v2625_v11, 2  ;;  %v2651_v37 = vrot.slane %v2626_v24, 2 }
 0x22c   : > { %v2702_v57 = vrot.slane %v2678_v5, 2  ;;  %v2704_v39 = vrot.slane %v2679_v14, 2  ;;  %v2732_v26 = vmul.f32 %v7740_v13, %v6878_v44  ;;  %v2755_v63 = vrot.slane %v2731_v25, 2 }
 0x22d   : > { %v2652_v15 = vsel %vm933_vm0, %v2649_v16, %v2651_v37  ;;  %v2825_v28 = vmul.f32 %v6899_v23, %v2815_v12  ;;  %v2843_v33 = vmul.f32 %v6902_v4, %v2815_v12  ;;  %v2861_v10 = vmul.f32 %v6908_v0, %v2815_v12 }
 0x22e   : > { %v2668_v20 = vadd.f32 %v2652_v15, %v6858_v22  ;;  %v2705_v21 = vsel %vm933_vm0, %v2702_v57, %v2704_v39  ;;  %v2757_v53 = vrot.slane %v2732_v26, 2  ;;  %v2650_v13 = vsel %vm933_vm0, %v2647_v41, %v2649_v16 }
 0x22f   : > { %v2721_v44 = vadd.f32 %v2705_v21, %v6860_v31  ;;  %v2667_v35 = vadd.f32 %v2650_v13, %v6865_v30  ;;  %v2703_v1 = vsel %vm933_vm0, %v2700_v36, %v2702_v57  ;;  %v2756_v52 = vsel %vm933_vm0, %v2753_v56, %v2755_v63  ;;  %v2871_v56 = vpop.permute.xlu0 %2870 }
 0x230   : > { %v2758_v34 = vsel %vm933_vm0, %v2755_v63, %v2757_v53  ;;  %v7078_v22 = vadd.f32 %v2825_v28, %v2668_v20  ;;  %v2720_v27 = vadd.f32 %v2703_v1, %v6867_v51  ;;  %v2773_v41 = vadd.f32 %v2756_v52, %v6869_v6 }
 0x231   : > { %v2774_v8 = vadd.f32 %v2758_v34, %v6862_v17  ;;  %v7083_v31 = vadd.f32 %v2843_v33, %v2721_v44  ;;  %v2824_v30 = vmul.f32 %v6899_v23, %v2813_v29  ;;  %v2842_v36 = vmul.f32 %v6902_v4, %v2813_v29  ;;  %v2877_v4 = vpop.permute.xlu1 %2876 }
 0x232   : > { %v2860_v43 = vmul.f32 %v6908_v0, %v2813_v29  ;;  %v7089_v12 = vstv %s7040_s9  ;;  %v7092_v9 = vstv %s7050_s10  ;;  %v7095_v51 = vstv %s7052_s11 }
 0x233   : > { %v7098_v17 = vadd.f32 %v2861_v10, %v2774_v8  ;;  %v7100_v6 = vadd.f32 %v2824_v30, %v2667_v35  ;;  %v7102_v3 = vadd.f32 %v2842_v36, %v2720_v27  ;;  %v7105_v23 = vstv %s7058_s17  ;;  %v2875_v28 = vpop.permute.xlu0 %2874 }
 0x234   : > { %v7107_v62 = vadd.f32 %v2860_v43, %v2773_v41  ;;  %v7110_v7 = vstv %s7060_s19  ;;  %v7113_v0 = vstv %s7064_s24  ;;  %v2889_v11 = vmul.f32 %v7089_v12, %v2873_v19 }
 0x235   : > { %v2907_v24 = vmul.f32 %v7092_v9, %v2873_v19  ;;  %v2925_v5 = vmul.f32 %v7095_v51, %v2873_v19  ;;  %v2888_v14 = vmul.f32 %v7089_v12, %v2871_v56  ;;  %v2906_v25 = vmul.f32 %v7092_v9, %v2871_v56  ;;  %v2881_v13 = vpop.permute.xlu1 %2880 }
 0x236   : > { %v2897_v16 = vadd.f32 %v2889_v11, %v6926_v59  ;;  %v2924_v37 = vmul.f32 %v7095_v51, %v2871_v56  ;;  %v2891_v29 = vmul.f32 %v7089_v12, %v2877_v4  ;;  %v2909_v57 = vmul.f32 %v7092_v9, %v2877_v4 }
 0x237   : > { %v2915_v39 = vadd.f32 %v2907_v24, %v6928_v2  ;;  %v2933_v26 = vadd.f32 %v2925_v5, %v6931_v32  ;;  %v2896_v63 = vadd.f32 %v2888_v14, %v6953_v47  ;;  %v2914_v15 = vadd.f32 %v2906_v25, %v6958_v58  ;;  %v2879_v56 = vpop.permute.xlu0 %2878 }
 0x238   : > { %v2943_v33 = vadd.f32 %v7105_v23, %v2897_v16  ;;  %v2932_v10 = vadd.f32 %v2924_v37, %v6960_v49  ;;  %v2899_v59 = vadd.f32 %v2891_v29, %v6971_v38  ;;  %v2917_v19 = vadd.f32 %v2909_v57, %v6977_v48 }
 0x239   : > { %v2969_v20 = vadd.f32 %v7110_v7, %v2915_v39  ;;  %v2996_v2 = vadd.f32 %v7113_v0, %v2933_v26  ;;  %v2942_v32 = vadd.f32 %v7105_v23, %v2896_v63  ;;  %v2968_v47 = vadd.f32 %v7110_v7, %v2914_v15  ;;  %v2885_v63 = vpop.permute.xlu1 %2884 }
 0x23a   : > { %v2951_v21 = vmax.f32 %v2943_v33, 0.0  ;;  %v2995_v58 = vadd.f32 %v7113_v0, %v2932_v10  ;;  %v2927_v53 = vmul.f32 %v7095_v51, %v2877_v4  ;;  %v2945_v49 = vadd.f32 %v7105_v23, %v2899_v59 }
 0x23b   : > { %v2977_v44 = vmax.f32 %v2969_v20, 0.0  ;;  %v3004_v38 = vmax.f32 %v2996_v2, 0.0  ;;  %v2950_v35 = vmax.f32 %v2942_v32, 0.0  ;;  %v2976_v48 = vmax.f32 %v2968_v47, 0.0  ;;  %v2883_v59 = vpop.permute.xlu0 %2882 }
 0x23c   : > { %2959 = vst [vmem:[%s7144_s27 + $0x8] sm:$0xff] %v2951_v21  ;;  %v3003_v1 = vmax.f32 %v2995_v58, 0.0  ;;  %v2935_v52 = vadd.f32 %v2927_v53, %v6994_v50  ;;  %v2953_v34 = vmax.f32 %v2945_v49, 0.0  ;;  %v2971_v27 = vadd.f32 %v7110_v7, %v2917_v19 }
 0x23d   : > { %3236 = vst [vmem:[%s7144_s27 + $0x48] sm:$0xff] %v2977_v44  ;;  %3245 = vst [vmem:[%s7144_s27 + $0x88] sm:$0xff] %v3004_v38  ;;  %v2890_v41 = vmul.f32 %v7089_v12, %v2875_v28  ;;  %v2908_v8 = vmul.f32 %v7092_v9, %v2875_v28  ;;  %v2926_v30 = vmul.f32 %v7095_v51, %v2875_v28 }
 0x23e   : > { %2958 = vst [vmem:[%s7144_s27] sm:$0xff] %v2950_v35  ;;  %3235 = vst [vmem:[%s7144_s27 + $0x40] sm:$0xff] %v2976_v48  ;;  %v2893_v36 = vmul.f32 %v7089_v12, %v2881_v13  ;;  %v2979_v50 = vmax.f32 %v2971_v27, 0.0  ;;  %v2998_v43 = vadd.f32 %v7113_v0, %v2935_v52  ;;  %v2911_v4 = vmul.f32 %v7092_v9, %v2881_v13 }
 0x23f   : > { %3244 = vst [vmem:[%s7144_s27 + $0x80] sm:$0xff] %v3003_v1  ;;  %2961 = vst [vmem:[%s7144_s27 + $0x18] sm:$0xff] %v2953_v34  ;;  %v2929_v11 = vmul.f32 %v7095_v51, %v2881_v13  ;;  %v2898_v24 = vadd.f32 %v2890_v41, %v6996_v45  ;;  %v2916_v5 = vadd.f32 %v2908_v8, %v6998_v55 }
 0x240   : > { %v2934_v14 = vadd.f32 %v2926_v30, %v7004_v18  ;;  %v2901_v25 = vadd.f32 %v2893_v36, %v7024_v61  ;;  %3238 = vst [vmem:[%s7144_s27 + $0x58] sm:$0xff] %v2979_v50  ;;  %v3006_v16 = vmax.f32 %v2998_v43, 0.0  ;;  %v2919_v37 = vadd.f32 %v2911_v4, %v7029_v46 }
 0x241   : > { %v2937_v29 = vadd.f32 %v2929_v11, %v7042_v40  ;;  %v2892_v57 = vmul.f32 %v7089_v12, %v2879_v56  ;;  %v2944_v39 = vadd.f32 %v7105_v23, %v2898_v24  ;;  %v2970_v26 = vadd.f32 %v7110_v7, %v2916_v5 }
 0x242   : > { %v2997_v45 = vadd.f32 %v7113_v0, %v2934_v14  ;;  %v2947_v55 = vadd.f32 %v7105_v23, %v2901_v25  ;;  %3247 = vst [vmem:[%s7144_s27 + $0x98] sm:$0xff] %v3006_v16  ;;  %v2973_v18 = vadd.f32 %v7110_v7, %v2919_v37  ;;  %v2910_v40 = vmul.f32 %v7092_v9, %v2879_v56 }
 0x243   : > { %v3000_v61 = vadd.f32 %v7113_v0, %v2937_v29  ;;  %v2900_v46 = vadd.f32 %v2892_v57, %v7032_v54  ;;  %v2952_v15 = vmax.f32 %v2944_v39, 0.0  ;;  %v2978_v28 = vmax.f32 %v2970_v26, 0.0 }
 0x244   : > { %v3005_v33 = vmax.f32 %v2997_v45, 0.0  ;;  %v2955_v10 = vmax.f32 %v2947_v55, 0.0  ;;  %v2981_v19 = vmax.f32 %v2973_v18, 0.0  ;;  %v2918_v2 = vadd.f32 %v2910_v40, %v7054_v60 }
 0x245   : > { %v3008_v20 = vmax.f32 %v3000_v61, 0.0  ;;  %v2928_v32 = vmul.f32 %v7095_v51, %v2879_v56  ;;  %2960 = vst [vmem:[%s7144_s27 + $0x10] sm:$0xff] %v2952_v15  ;;  %3237 = vst [vmem:[%s7144_s27 + $0x50] sm:$0xff] %v2978_v28  ;;  %v2946_v54 = vadd.f32 %v7105_v23, %v2900_v46  ;;  %v2895_v47 = vmul.f32 %v7089_v12, %v2885_v63 }
 0x246   : > { %3246 = vst [vmem:[%s7144_s27 + $0x90] sm:$0xff] %v3005_v33  ;;  %2963 = vst [vmem:[%s7144_s27 + $0x28] sm:$0xff] %v2955_v10  ;;  %v2913_v21 = vmul.f32 %v7092_v9, %v2885_v63  ;;  %v2931_v58 = vmul.f32 %v7095_v51, %v2885_v63  ;;  %v2972_v60 = vadd.f32 %v7110_v7, %v2918_v2 }
 0x247   : > { %3240 = vst [vmem:[%s7144_s27 + $0x68] sm:$0xff] %v2981_v19  ;;  %3249 = vst [vmem:[%s7144_s27 + $0xa8] sm:$0xff] %v3008_v20  ;;  %v2936_v53 = vadd.f32 %v2928_v32, %v7056_v42  ;;  %v2894_v49 = vmul.f32 %v7089_v12, %v2883_v59  ;;  %v2912_v13 = vmul.f32 %v7092_v9, %v2883_v59  ;;  %v2954_v44 = vmax.f32 %v2946_v54, 0.0 }
 0x248   : > { %v2903_v38 = vadd.f32 %v2895_v47, %v7078_v22  ;;  %v2921_v35 = vadd.f32 %v2913_v21, %v7083_v31  ;;  %v2939_v48 = vadd.f32 %v2931_v58, %v7098_v17  ;;  %v2980_v1 = vmax.f32 %v2972_v60, 0.0 }
 0x249   : > { %v2999_v52 = vadd.f32 %v7113_v0, %v2936_v53  ;;  %v2902_v42 = vadd.f32 %v2894_v49, %v7100_v6  ;;  %v2920_v34 = vadd.f32 %v2912_v13, %v7102_v3  ;;  %2962 = vst [vmem:[%s7144_s27 + $0x20] sm:$0xff] %v2954_v44  ;;  %v2930_v31 = vmul.f32 %v7095_v51, %v2883_v59 }
 0x24a   : > { %v2949_v12 = vadd.f32 %v7105_v23, %v2903_v38  ;;  %v2975_v9 = vadd.f32 %v7110_v7, %v2921_v35  ;;  %v3002_v22 = vadd.f32 %v7113_v0, %v2939_v48  ;;  %3239 = vst [vmem:[%s7144_s27 + $0x60] sm:$0xff] %v2980_v1 }
 0x24b   : > { %v3007_v17 = vmax.f32 %v2999_v52, 0.0  ;;  %v2948_v6 = vadd.f32 %v7105_v23, %v2902_v42  ;;  %v2974_v3 = vadd.f32 %v7110_v7, %v2920_v34  ;;  %v2938_v30 = vadd.f32 %v2930_v31, %v7107_v62 }
 0x24c   : > { %v2957_v27 = vmax.f32 %v2949_v12, 0.0  ;;  %v2983_v41 = vmax.f32 %v2975_v9, 0.0  ;;  %v3010_v8 = vmax.f32 %v3002_v22, 0.0 }
 0x24d   : > { %3248 = vst [vmem:[%s7144_s27 + $0xa0] sm:$0xff] %v3007_v17  ;;  %v2956_v51 = vmax.f32 %v2948_v6, 0.0  ;;  %v2982_v36 = vmax.f32 %v2974_v3, 0.0  ;;  %v3001_v23 = vadd.f32 %v7113_v0, %v2938_v30 }
 0x24e   : > { %2965 = vst [vmem:[%s7144_s27 + $0x38] sm:$0xff] %v2957_v27  ;;  %3242 = vst [vmem:[%s7144_s27 + $0x78] sm:$0xff] %v2983_v41 }
 0x24f   : > { %3251 = vst [vmem:[%s7144_s27 + $0xb8] sm:$0xff] %v3010_v8  ;;  %2964 = vst [vmem:[%s7144_s27 + $0x30] sm:$0xff] %v2956_v51  ;;  %v3009_v62 = vmax.f32 %v3001_v23, 0.0 }
 0x250   : > { %3241 = vst [vmem:[%s7144_s27 + $0x70] sm:$0xff] %v2982_v36 }
 0x251   : > { %3250 = vst [vmem:[%s7144_s27 + $0xb0] sm:$0xff] %v3009_v62 }
 0x252   : > { %3473 = shalt.err (!%p3470_p1)
}
 0x253   : > { %s3474_s9 = scalar_lea.hbm %s7224_s29, 3072  ;;  %s3478_s17 = scalar_lea.hbm %s7273_s3, 6144 }
 0x254   : > { %p3475_p2 = scmp.ne.s32.totalorder %s7224_s29, %s3474_s9  ;;  %p3479_p9 = scmp.lt.u32.totalorder %s7224_s29, %s7273_s3 }
 0x255   : > { %p3480_p5 = scmp.lt.u32.totalorder %s3478_s17, %s3474_s9  ;;  %p3482_p10 = scmp.lt.u32.totalorder %s3474_s9, %s7224_s29 }
 0x256   : > { %p3476_p3 = pnand %p3475_p2, %p7742_p12 }
 0x257   : > { %p3481_p6 = por %p3480_p5, %p3479_p9 }
 0x258   : > { %p3477_p4 = pneg %p3476_p3 }
 0x259   : > { %p3483_p0 = por %p3482_p10, %p3481_p6 }
 0x25b   : > { %p3484_p7 = pnand %p3483_p0, %p3477_p4 }
 0x25d   : > { %3487 = shalt.err (!%p3484_p7)
}
 0x25e   : > { %s3537_s25 = smov 128   ;;  %s3538_s26 = smov 8  }
 0x25f   : > { %3266 = dma.vmem_to_hbm [thread:$0]  (%p7742_p12), %s7219_s30, 3072, %s7224_s29, %s7229_s4, %s3537_s25, %s3537_s25, %s3538_s26  }
 0x260 PF: > { %p3283_p8 = scmp.ge.s32.totalorder %s3530_s15, 2  ;;  %s3049_s27 = sand.u32 1, %s3518_s12  }
 0x261   : > { %p7743_p11 = scmp.ne.s32.totalorder %s7391_s23, 0  ;;  %s3050_s20 = scalar_lea.sflag [#allocation3], %s3049_s27 }
 0x263   : > { %p3276_p13 = pnand %p3283_p8, %p7743_p11 }
 0x265   : > { %3513 = dma.done.wait (!%p3276_p13), %s3050_s20, 3072  }
 0x266   : > { %3515 = vsyncadd (!%p3276_p13), %s3050_s20, 4294964224  ;;  %p15_p1 = scmp.ge.s32.totalorder %s3584_s18, 4   ;;  %s7744_s12 = smov %s3522_s13 }
 0x267   : > { %s7745_s13 = smov %s3526_s14  ;;  %s7746_s14 = smov %s3595_s21 }
 0x268   : > { %s7747_s15 = smov %s3584_s18  ;;  %17 = sbr.rel (!%p15_p1) target bundleno = 5 (0x5), region = 78 }
 0x26f   :  { %3055 = vsyncpa [#allocation3], 1 }
 0x270   :  { %3057 = vsyncpa [#allocation3 + $0x1], 1 }
 0x271   :  { %3058 = vsyncpa [#allocation4], 1 }
 0x272   :  { %3060 = vsyncpa [#allocation4 + $0x1], 1 }
 0x273   :  { %3061 = vsyncpa [#allocation6], 1 }

</bundles_post_ra>
